<compile_context>
chip_gen: v6e
topology: v6e:2x2x1
jax: 0.10.0
libtpu: 0.0.40
codegen_flags: <defaults>
</compile_context>

<pallas_src>
import functools

import jax
import jax.numpy as jnp
from jax.experimental import pallas as pl
from jax.experimental.pallas import tpu as pltpu

_EPS = 1e-5
PADW = 128                               # lane width of packed parameter slabs
MXU_DTYPE = jnp.bfloat16                 # MXU operand dtype (f32 accumulate everywhere)
_VMEM = pl.BlockSpec(memory_space=pltpu.MemorySpace.VMEM)
_VMEM_LIMIT = 32 * 1024 * 1024           # explicit scoped-VMEM budget (fits v5e/v6e/v7x)
_NOGRID_PARAMS = pltpu.CompilerParams(vmem_limit_bytes=_VMEM_LIMIT)


# ----------------------------- in-kernel helpers -----------------------------

def _ln(v, g, b):
    """LayerNorm over the last axis, f32 statistics."""
    mu = jnp.mean(v, axis=-1, keepdims=True)
    vc = v - mu
    var = jnp.mean(vc * vc, axis=-1, keepdims=True)
    return vc * jax.lax.rsqrt(var + _EPS) * g + b


def _mxu(a, w_ref):
    """Node-level matmul: bf16 operands on the MXU, f32 accumulation (weights stored bf16)."""
    return jnp.dot(a.astype(MXU_DTYPE), w_ref[...], preferred_element_type=jnp.float32)


class _Rows:
    """Sequential reader of a packed [rows, 128] parameter slab (static ref slices)."""

    def __init__(self, ref):
        self._ref = ref
        self._i = 0

    def take(self, dim):
        r = self._ref[self._i:self._i + 1, 0:dim]
        self._i += 1
        return r


# ----------------------------- node pre-pass kernel -----------------------------
# prenorm(x) -> packed, lane-dense [hidden, 4*HD] q|k|v|s projection (scale folded into q);
# optionally prenorm(r) -> packed [pos, 2*HD] k_r|v_r projection (per-edge).

def _make_pre_kernel(hidden, num_heads, head_dim, has_pos_emb, pos_dim):
    HD = num_heads * head_dim

    def kernel(*refs):
        it = iter(refs)
        x_ref = next(it)
        r_ref = next(it) if has_pos_emb else None
        slab_ref = next(it)
        w_qkvs = next(it)
        w_kvr = next(it) if has_pos_emb else None
        qkvs_ref = next(it)
        kvr_ref = next(it) if has_pos_emb else None

        rows = _Rows(slab_ref)
        pre_g = rows.take(hidden)
        pre_b = rows.take(hidden)
        b_qkvs = rows.take(4 * HD)

        xn = _ln(x_ref[...], pre_g, pre_b)                 # x_src == x_dst (tensor input)
        qkvs_ref[...] = _mxu(xn, w_qkvs) + b_qkvs          # lane-dense [N, 128] output

        if has_pos_emb:
            r_g = rows.take(pos_dim)
            r_b = rows.take(pos_dim)
            b_kvr = rows.take(2 * HD)
            rn = _ln(r_ref[...], r_g, r_b)
            kvr_ref[...] = _mxu(rn, w_kvr) + b_kvr         # [E, 2*HD]

    return kernel


# ----------------------------- edge streaming-softmax kernel -----------------------------
# One grid step per edge: rows of qkvs are gathered via index_maps driven by the
# scalar-prefetched edge_index; a per-target-node online softmax accumulates into
# N-resident outputs l (denominator) and acc (weighted values); m (running max) is scratch.

def _make_edge_kernel(num_heads, head_dim, has_pos_emb):
    HD = num_heads * head_dim

    def kernel(*refs):
        it = iter(refs)
        ei_ref = next(it)                       # [2, E] int32 in SMEM (scalar prefetch)
        rowd_ref = next(it)                     # [1, 1, 4*HD]  qkvs row gathered at dst
        rows_ref = next(it)                     # [1, 1, 4*HD]  qkvs row gathered at src
        kvr_ref = next(it) if has_pos_emb else None   # [1, 1, 2*HD] edge row
        sumb_ref = next(it)                     # [HD, HD] block-diag "sum head lanes + broadcast"
        l_ref = next(it)                        # [N, HD] output, resident accumulator
        acc_ref = next(it)                      # [N, HD] output, resident accumulator
        m_ref = next(it)                        # [N, HD] scratch, running per-target max

        e = pl.program_id(0)

        @pl.when(e == 0)
        def _():
            m_ref[...] = jnp.full_like(m_ref, -1e30)
            l_ref[...] = jnp.zeros_like(l_ref)
            acc_ref[...] = jnp.zeros_like(acc_ref)

        i = ei_ref[1, e]                        # target (dst) node of this edge

        row_d = rowd_ref[0]                     # [1, 4*HD]
        row_s = rows_ref[0]
        q = row_d[:, 0:HD]                      # softmax scale already folded into to_q
        k = row_s[:, HD:2 * HD]
        v = row_s[:, 2 * HD:3 * HD]
        if has_pos_emb:
            kvr = kvr_ref[0]                    # [1, 2*HD]
            k = k + kvr[:, 0:HD]
            v = v + kvr[:, HD:2 * HD]

        # per-head similarity, broadcast back over each head's lanes -> [1, HD]
        sim = jnp.dot(q * k, sumb_ref[...], preferred_element_type=jnp.float32)

        # exact per-target streaming softmax (read-modify-write one accumulator row)
        row = pl.ds(i, 1)
        m_old = m_ref[row, :]
        m_new = jnp.maximum(m_old, sim)
        alpha = jnp.exp(m_old - m_new)
        p = jnp.exp(sim - m_new)
        m_ref[row, :] = m_new
        l_ref[row, :] = alpha * l_ref[row, :] + p
        acc_ref[row, :] = alpha * acc_ref[row, :] + p * v

    return kernel


# ----------------------------- node post-pass kernel -----------------------------
# normalize aggregation, gated update, to_out, postnorm, FFN (+ optional fused downsample).

def _make_post_kernel(hidden, num_heads, head_dim, ff_dim, fuse_ds, ds_dim):
    HD = num_heads * head_dim

    def kernel(*refs):
        it = iter(refs)
        x_ref, qkvs_ref, l_ref, acc_ref = next(it), next(it), next(it), next(it)
        slab_ref = next(it)
        w_ga, w_gx, w_out, w_ff1, w_ff2 = next(it), next(it), next(it), next(it), next(it)
        w_ds = next(it) if fuse_ds else None
        o_ref = next(it)
        ds_ref = next(it) if fuse_ds else None

        rows = _Rows(slab_ref)
        pre_g = rows.take(hidden)
        pre_b = rows.take(hidden)
        b_g = rows.take(HD)
        b_out = rows.take(hidden)
        post_g = rows.take(hidden)
        post_b = rows.take(hidden)
        ffpre_g = rows.take(hidden)
        ffpre_b = rows.take(hidden)
        b_ff1 = rows.take(ff_dim)
        b_ff2 = rows.take(hidden)
        ffpost_g = rows.take(hidden)
        ffpost_b = rows.take(hidden)
        b_ds = rows.take(ds_dim) if fuse_ds else None

        x = x_ref[...]
        xn = _ln(x, pre_g, pre_b)               # prenormed x_dst for gate / to_s path

        l = l_ref[...]
        acc = acc_ref[...]
        inv = pl.reciprocal(jnp.maximum(l, 1e-30), approx=True)   # EUP slot; inference-grade
        agg = jnp.where(l > 0.0, acc * inv, 0.0)                  # nodes without in-edges -> 0

        s = qkvs_ref[:, 3 * HD:4 * HD]                            # to_s(x_dst)
        gate = jax.nn.sigmoid(_mxu(agg, w_ga) + _mxu(xn, w_gx) + b_g)
        upd = agg + gate * (s - agg)

        attn_out = _mxu(upd, w_out) + b_out
        x1 = x + _ln(attn_out, post_g, post_b)

        ff_in = _ln(x1, ffpre_g, ffpre_b)
        h = jnp.maximum(_mxu(ff_in, w_ff1) + b_ff1, 0.0)
        ff = _mxu(h, w_ff2) + b_ff2
        x2 = x1 + _ln(ff, ffpost_g, ffpost_b)

        o_ref[...] = x2
        if fuse_ds:
            ds_ref[...] = _mxu(x2, w_ds) + b_ds
        # TODO(synk): at production hidden sizes, pack o/ds into a single >=128-lane output
        # slab to get unmasked vst on the writeback path.

    return kernel


# ----------------------------- EdgeFeatureUpdate kernels -----------------------------

def _gather_pair_kernel(ei_ref, xd_ref, xs_ref, xi_ref, xj_ref):
    """Per-edge row gather x[dst] / x[src] via index_maps; body is a copy."""
    del ei_ref
    xi_ref[...] = xd_ref[...]
    xj_ref[...] = xs_ref[...]


def _make_edge_mlp_kernel(edge_hidden):
    eh = edge_hidden

    def kernel(*refs):
        it = iter(refs)
        xi_ref, xj_ref, ea_ref = next(it), next(it), next(it)
        slab_ref = next(it)
        n_w0a, n_w0b, n_w1, n_wta, n_wtb = next(it), next(it), next(it), next(it), next(it)
        e_w0a, e_w0b, e_w1, e_wta, e_wtb = next(it), next(it), next(it), next(it), next(it)
        o_ref = next(it)

        rows = _Rows(slab_ref)

        def res_mlp(a, b, w0a, w0b, w1, wta, wtb):
            # ResidualMLP on cat([a, b], -1); concat folded into split weight halves.
            b0, n0g, n0b = rows.take(eh), rows.take(eh), rows.take(eh)
            b1, n1g, n1b = rows.take(eh), rows.take(eh), rows.take(eh)
            bt, tng, tnb = rows.take(eh), rows.take(eh), rows.take(eh)
            h = _mxu(a, w0a) + _mxu(b, w0b) + b0
            h = jnp.maximum(_ln(h, n0g, n0b), 0.0)          # relu between hidden layers
            h = _ln(_mxu(h, w1) + b1, n1g, n1b)
            res = _ln(_mxu(a, wta) + _mxu(b, wtb) + bt, tng, tnb)
            return jnp.maximum(h + res, 0.0)                # no linear_out

        upd = res_mlp(xi_ref[...], xj_ref[...], n_w0a, n_w0b, n_w1, n_wta, n_wtb)
        o_ref[...] = res_mlp(upd, ea_ref[...], e_w0a, e_w0b, e_w1, e_wta, e_wtb)

    return kernel


# ----------------------------- parameter builders (packed once) -----------------------------

def _dense(key, in_dim, out_dim, bias=True):
    kw, kb = jax.random.split(key)
    w = jax.random.normal(kw, (out_dim, in_dim), jnp.float32) * 0.1       # torch-style [out, in]
    b = (jax.random.normal(kb, (out_dim,), jnp.float32) * 0.1 if bias
         else jnp.zeros((out_dim,), jnp.float32))
    return w, b


def _pack_rows(vecs, width=PADW):
    rows = []
    for v in vecs:
        v = jnp.asarray(v, jnp.float32).reshape(-1)
        rows.append(jnp.pad(v, (0, width - v.shape[0])))
    return jnp.stack(rows, axis=0)


def make_attention_layer_params(key, hidden, num_heads, head_dim, ff_dim,
                                has_pos_emb, pos_dim, ds_w=None, ds_b=None):
    HD = num_heads * head_dim
    scale = float(head_dim) ** -0.5
    ks = jax.random.split(key, 10)
    wq, bq = _dense(ks[0], hidden, HD)
    wk, _ = _dense(ks[1], hidden, HD, bias=False)
    wv, bv = _dense(ks[2], hidden, HD)
    ws, bs = _dense(ks[3], hidden, HD)
    wg, bg = _dense(ks[4], HD + hidden, HD)
    wo, bo = _dense(ks[5], HD, hidden)
    wf1, bf1 = _dense(ks[6], hidden, ff_dim)
    wf2, bf2 = _dense(ks[7], ff_dim, hidden)

    # fold the softmax scale into the q projection: sim = ((scale*q_i) * k_j).sum(-1)
    wq, bq = wq * scale, bq * scale

    one_h = jnp.ones((hidden,), jnp.float32)
    zero_h = jnp.zeros((hidden,), jnp.float32)

    pre_rows = [one_h, zero_h,
                jnp.concatenate([bq, jnp.zeros((HD,), jnp.float32), bv, bs])]
    w_kvr = None
    if has_pos_emb:
        wkr, _ = _dense(ks[8], pos_dim, HD, bias=False)
        wvr, bvr = _dense(ks[9], pos_dim, HD)
        w_kvr = jnp.concatenate([wkr, wvr], axis=0).T.astype(MXU_DTYPE)       # [pos, 2*HD]
        pre_rows += [jnp.ones((pos_dim,), jnp.float32),
                     jnp.zeros((pos_dim,), jnp.float32),
                     jnp.concatenate([jnp.zeros((HD,), jnp.float32), bvr])]

    post_rows = [one_h, zero_h,          # attn prenorm (re-applied for gate / to_s path)
                 bg, bo,
                 one_h, zero_h,          # attn postnorm
                 one_h, zero_h,          # ff prenorm
                 bf1, bf2,
                 one_h, zero_h]          # ff postnorm
    if ds_w is not None:
        post_rows.append(ds_b)

    wgt = wg.T
    # block-diagonal "sum over each head's lanes and broadcast back" matrix (replaces pool/poolT)
    sum_bcast = jnp.repeat(jnp.repeat(jnp.eye(num_heads, dtype=jnp.float32),
                                      head_dim, axis=0), head_dim, axis=1)    # [HD, HD]

    return {
        "hidden": hidden, "num_heads": num_heads, "head_dim": head_dim,
        "ff_dim": ff_dim, "has_pos_emb": has_pos_emb, "pos_dim": pos_dim,
        "sum_bcast": sum_bcast,
        "w_qkvs": jnp.concatenate([wq, wk, wv, ws], axis=0).T.astype(MXU_DTYPE),  # [hidden, 4*HD]
        "w_kvr": w_kvr,
        "w_ga": wgt[:HD, :].astype(MXU_DTYPE),
        "w_gx": wgt[HD:, :].astype(MXU_DTYPE),
        "w_out": wo.T.astype(MXU_DTYPE),
        "w_ff1": wf1.T.astype(MXU_DTYPE),
        "w_ff2": wf2.T.astype(MXU_DTYPE),
        "w_ds": ds_w,
        "pre_slab": _pack_rows(pre_rows),
        "post_slab": _pack_rows(post_rows),
    }


def make_residual_mlp_params(key, in_a, in_b, hidden_dim):
    """ResidualMLP(input_dim=in_a+in_b, hidden_dim, n_hidden=2, output_dim=None);
    the input concat is folded into per-half weight blocks."""
    ks = jax.random.split(key, 3)
    w0, b0 = _dense(ks[0], in_a + in_b, hidden_dim)
    w1, b1 = _dense(ks[1], hidden_dim, hidden_dim)
    wt, bt = _dense(ks[2], in_a + in_b, hidden_dim)
    w0t, wtt = w0.T, wt.T
    ones = jnp.ones((hidden_dim,), jnp.float32)
    zeros = jnp.zeros((hidden_dim,), jnp.float32)
    weights = [w0t[:in_a].astype(MXU_DTYPE), w0t[in_a:].astype(MXU_DTYPE),
               w1.T.astype(MXU_DTYPE),
               wtt[:in_a].astype(MXU_DTYPE), wtt[in_a:].astype(MXU_DTYPE)]
    slab_rows = [b0, ones, zeros, b1, ones, zeros, bt, ones, zeros]
    return weights, slab_rows


def make_block_params(key, lane_hidden, lane_ff, lane_heads,
                      agent_hidden, agent_ff, agent_heads, lane_conn_hidden):
    ks = jax.random.split(key, 6)
    wd, bd = _dense(ks[5], lane_hidden, agent_hidden)
    nw, nrows = make_residual_mlp_params(ks[3], agent_hidden, agent_hidden, lane_conn_hidden)
    ew, erows = make_residual_mlp_params(ks[4], lane_conn_hidden, lane_conn_hidden,
                                         lane_conn_hidden)
    return {
        "a2a": make_attention_layer_params(ks[0], agent_hidden, agent_heads,
                                           agent_hidden // agent_heads, agent_ff, False, None),
        "l2l": make_attention_layer_params(ks[1], lane_hidden, lane_heads,
                                           lane_hidden // lane_heads, lane_ff, True,
                                           lane_conn_hidden,
                                           ds_w=wd.T.astype(MXU_DTYPE), ds_b=bd),
        "l2a": make_attention_layer_params(ks[2], agent_hidden, agent_heads,
                                           agent_hidden // agent_heads, agent_ff, False, None),
        "edge_upd": {"weights": nw + ew, "slab": _pack_rows(nrows + erows)},
    }


# ----------------------------- forward wrappers -----------------------------

def attention_layer_forward(p, x, r, edge_index):
    hidden, H, D, ff_dim = p["hidden"], p["num_heads"], p["head_dim"], p["ff_dim"]
    HD = H * D
    has_pos = bool(p["has_pos_emb"]) and (r is not None)
    fuse_ds = p["w_ds"] is not None
    N = x.shape[0]
    E = edge_index.shape[1]

    # ---- 1) node pre-pass: prenorm + packed bf16 q|k|v|s projection (+ r prenorm/projection)
    pre_args = [x] + ([r] if has_pos else []) + [p["pre_slab"], p["w_qkvs"]] \
        + ([p["w_kvr"]] if has_pos else [])
    if has_pos:
        pre_out_shape = (jax.ShapeDtypeStruct((N, 4 * HD), jnp.float32),
                         jax.ShapeDtypeStruct((E, 2 * HD), jnp.float32))
        pre_out_specs = (_VMEM, _VMEM)
    else:
        pre_out_shape = jax.ShapeDtypeStruct((N, 4 * HD), jnp.float32)
        pre_out_specs = _VMEM
    pre_out = pl.pallas_call(
        _make_pre_kernel(hidden, H, D, has_pos, p["pos_dim"]),
        out_shape=pre_out_shape,
        in_specs=[_VMEM] * len(pre_args),
        out_specs=pre_out_specs,
        compiler_params=_NOGRID_PARAMS,
    )(*pre_args)
    if has_pos:
        qkvs, kvr = pre_out
    else:
        qkvs, kvr = pre_out, None

    # ---- 2) edge pass: true gathers via scalar-prefetched edge_index, grid over E,
    #         exact per-target streaming softmax into N-resident accumulators.
    qkvs3 = qkvs.reshape(N, 1, 4 * HD)           # unit middle dim -> (8,128)-compliant blocks
    in_specs = [
        pl.BlockSpec((1, 1, 4 * HD), lambda e, ei: (ei[1, e], 0, 0)),   # qkvs row @ dst
        pl.BlockSpec((1, 1, 4 * HD), lambda e, ei: (ei[0, e], 0, 0)),   # qkvs row @ src
    ]
    edge_args = [qkvs3, qkvs3]
    if has_pos:
        kvr3 = kvr.reshape(E, 1, 2 * HD)
        in_specs.append(pl.BlockSpec((1, 1, 2 * HD), lambda e, ei: (e, 0, 0)))
        edge_args.append(kvr3)
    in_specs.append(pl.BlockSpec((HD, HD), lambda e, ei: (0, 0)))
    edge_args.append(p["sum_bcast"])

    grid_spec = pltpu.PrefetchScalarGridSpec(
        num_scalar_prefetch=1,
        grid=(E,),
        in_specs=in_specs,
        out_specs=[pl.BlockSpec((N, HD), lambda e, ei: (0, 0)),
                   pl.BlockSpec((N, HD), lambda e, ei: (0, 0))],
        scratch_shapes=[pltpu.VMEM((N, HD), jnp.float32)],
    )
    # TODO(synk): at production E (~5e4) switch to E-block tiles with manual per-row DMA gathers
    # (emit_pipeline / make_async_copy) to amortize the per-grid-step overhead, and split E
    # across v7x's two TensorCores with per-core accumulators + a merge kernel.
    l_acc, v_acc = pl.pallas_call(
        _make_edge_kernel(H, D, has_pos),
        grid_spec=grid_spec,
        out_shape=(jax.ShapeDtypeStruct((N, HD), jnp.float32),
                   jax.ShapeDtypeStruct((N, HD), jnp.float32)),
        compiler_params=pltpu.CompilerParams(
            dimension_semantics=("arbitrary",),          # sequential streaming-softmax accumulation
            vmem_limit_bytes=_VMEM_LIMIT),
    )(edge_index, *edge_args)

    # ---- 3) node post-pass: gated update, to_out, postnorm, FFN (+ fused lane downsample)
    post_args = [x, qkvs, l_acc, v_acc, p["post_slab"],
                 p["w_ga"], p["w_gx"], p["w_out"], p["w_ff1"], p["w_ff2"]]
    ds_dim = 0
    if fuse_ds:
        post_args.append(p["w_ds"])
        ds_dim = p["w_ds"].shape[1]
        out_shape = (jax.ShapeDtypeStruct((N, hidden), jnp.float32),
                     jax.ShapeDtypeStruct((N, ds_dim), jnp.float32))
        out_specs = (_VMEM, _VMEM)
    else:
        out_shape = jax.ShapeDtypeStruct((N, hidden), jnp.float32)
        out_specs = _VMEM
    return pl.pallas_call(
        _make_post_kernel(hidden, H, D, ff_dim, fuse_ds, ds_dim),
        out_shape=out_shape,
        in_specs=[_VMEM] * len(post_args),
        out_specs=out_specs,
        compiler_params=_NOGRID_PARAMS,
    )(*post_args)


def edge_feature_update_forward(p, x, edge_attr, edge_index):
    N, nh = x.shape
    E, eh = edge_attr.shape

    # per-edge gather of x[dst] / x[src] through scalar-prefetched index_maps (no one-hots)
    x3 = x.reshape(N, 1, nh)
    gather_spec = pltpu.PrefetchScalarGridSpec(
        num_scalar_prefetch=1,
        grid=(E,),
        in_specs=[pl.BlockSpec((1, 1, nh), lambda e, ei: (ei[1, e], 0, 0)),
                  pl.BlockSpec((1, 1, nh), lambda e, ei: (ei[0, e], 0, 0))],
        out_specs=[pl.BlockSpec((1, 1, nh), lambda e, ei: (e, 0, 0)),
                   pl.BlockSpec((1, 1, nh), lambda e, ei: (e, 0, 0))],
    )
    x_i, x_j = pl.pallas_call(
        _gather_pair_kernel,
        grid_spec=gather_spec,
        out_shape=(jax.ShapeDtypeStruct((E, 1, nh), jnp.float32),
                   jax.ShapeDtypeStruct((E, 1, nh), jnp.float32)),
        compiler_params=pltpu.CompilerParams(
            dimension_semantics=("parallel",),           # independent per-edge copies
            vmem_limit_bytes=_VMEM_LIMIT),
    )(edge_index, x3, x3)
    x_i = x_i.reshape(E, nh)
    x_j = x_j.reshape(E, nh)

    args = [x_i, x_j, edge_attr, p["slab"]] + list(p["weights"])
    return pl.pallas_call(
        _make_edge_mlp_kernel(eh),
        out_shape=jax.ShapeDtypeStruct((E, eh), jnp.float32),
        in_specs=[_VMEM] * len(args),
        out_specs=_VMEM,
        compiler_params=_NOGRID_PARAMS,
    )(*args)


def autoencoder_factorized_attention_block(params, agent_embeddings, lane_embeddings,
                                           lane_conn_embeddings, edge_emb,
                                           a2a_edge_index, l2l_edge_index, l2a_edge_index):
    # edge_emb is accepted but unused, mirroring the PyTorch forward signature.
    del edge_emb
    L = lane_embeddings.shape[0]

    lane_new, lane_ds = attention_layer_forward(params["l2l"], lane_embeddings,
                                                lane_conn_embeddings, l2l_edge_index)
    agent_dim = jnp.concatenate([lane_ds, agent_embeddings], axis=0)       # row-concat glue
    agent_dim = attention_layer_forward(params["l2a"], agent_dim, None, l2a_edge_index)
    agent_new = attention_layer_forward(params["a2a"], agent_dim[L:], None, a2a_edge_index)
    lane_conn_new = edge_feature_update_forward(params["edge_upd"], lane_ds,
                                                lane_conn_embeddings, l2l_edge_index)
    return agent_new, lane_new, lane_conn_new


# ----------------------------- main -----------------------------

if __name__ == "__main__":
    # config (dropout = 0.0 -> deterministic / eval mode)
    lane_hidden, lane_ff, lane_heads = 32, 64, 4
    agent_hidden, agent_ff, agent_heads = 32, 64, 4
    lane_conn_hidden = 16

    L, A = 8, 6                      # lanes, agents
    E_L2L, E_A2A, E_L2A = 12, 10, 14

    key = jax.random.PRNGKey(0)
    kp, k1, k2, k3, k4, k5, k6, k7, k8 = jax.random.split(key, 9)

    params = make_block_params(kp, lane_hidden, lane_ff, lane_heads,
                               agent_hidden, agent_ff, agent_heads, lane_conn_hidden)

    agent_embeddings = jax.random.normal(k1, (A, agent_hidden), jnp.float32)
    lane_embeddings = jax.random.normal(k2, (L, lane_hidden), jnp.float32)
    lane_conn_embeddings = jax.random.normal(k3, (E_L2L, lane_conn_hidden), jnp.float32)
    edge_emb = jax.random.normal(k4, (E_L2L, lane_conn_hidden), jnp.float32)

    l2l_edge_index = jnp.stack([jax.random.randint(k5, (E_L2L,), 0, L),
                                jax.random.randint(k6, (E_L2L,), 0, L)]).astype(jnp.int32)
    a2a_edge_index = jnp.stack([jax.random.randint(k7, (E_A2A,), 0, A),
                                jax.random.randint(k8, (E_A2A,), 0, A)]).astype(jnp.int32)
    kl2a_s, kl2a_d = jax.random.split(jax.random.fold_in(key, 99))
    l2a_edge_index = jnp.stack([jax.random.randint(kl2a_s, (E_L2A,), 0, L),       # src: lanes
                                jax.random.randint(kl2a_d, (E_L2A,), L, L + A)]    # dst: agents
                               ).astype(jnp.int32)

    fwd = jax.jit(functools.partial(autoencoder_factorized_attention_block, params))
    out = fwd(agent_embeddings, lane_embeddings, lane_conn_embeddings, edge_emb,
              a2a_edge_index, l2l_edge_index, l2a_edge_index)
    jax.block_until_ready(out)

    assert out[0].shape == (A, agent_hidden)
    assert out[1].shape == (L, lane_hidden)
    assert out[2].shape == (E_L2L, lane_conn_hidden)
    assert bool(jnp.all(jnp.isfinite(out[0])))
    assert bool(jnp.all(jnp.isfinite(out[1])))
    assert bool(jnp.all(jnp.isfinite(out[2])))
    print("KERNEL_OK")
</pallas_src>

<mosaic_0001>
module attributes {stable_mosaic.version = 11 : i64} {
  func.func @kernel(%arg0: memref<8x32xf32, #tpu.memory_space<vmem>>, %arg1: memref<12x16xf32, #tpu.memory_space<vmem>>, %arg2: memref<6x128xf32, #tpu.memory_space<vmem>>, %arg3: memref<32x128xbf16, #tpu.memory_space<vmem>>, %arg4: memref<16x64xbf16, #tpu.memory_space<vmem>>, %arg5: memref<8x128xf32, #tpu.memory_space<vmem>>, %arg6: memref<12x64xf32, #tpu.memory_space<vmem>>) attributes {dimension_semantics = [], scalar_prefetch = 0 : i64, scratch_operands = 0 : i64, tpu.core_type = #tpu.core_type<tc>} {
    %c0 = arith.constant 0 : index
    %c0_0 = arith.constant 0 : index
    %0 = vector.load %arg2[%c0, %c0_0] : memref<6x128xf32, #tpu.memory_space<vmem>>, vector<1x32xf32>
    %c1 = arith.constant 1 : index
    %c0_1 = arith.constant 0 : index
    %1 = vector.load %arg2[%c1, %c0_1] : memref<6x128xf32, #tpu.memory_space<vmem>>, vector<1x32xf32>
    %c2 = arith.constant 2 : index
    %c0_2 = arith.constant 0 : index
    %2 = vector.load %arg2[%c2, %c0_2] : memref<6x128xf32, #tpu.memory_space<vmem>>, vector<1x128xf32>
    %c0_3 = arith.constant 0 : index
    %c0_4 = arith.constant 0 : index
    %3 = vector.load %arg0[%c0_3, %c0_4] : memref<8x32xf32, #tpu.memory_space<vmem>>, vector<8x32xf32>
    %cst = arith.constant dense<0.000000e+00> : vector<8xf32>
    %4 = vector.multi_reduction <add>, %3, %cst [1] : vector<8x32xf32> to vector<8xf32>
    %5 = vector.shape_cast %4 : vector<8xf32> to vector<8x1xf32>
    %cst_5 = arith.constant 3.200000e+01 : f32
    %6 = vector.broadcast %cst_5 : f32 to vector<8x1xf32>
    %7 = arith.divf %5, %6 : vector<8x1xf32>
    %8 = vector.broadcast %7 : vector<8x1xf32> to vector<8x32xf32>
    %9 = arith.subf %3, %8 : vector<8x32xf32>
    %10 = arith.mulf %9, %9 : vector<8x32xf32>
    %cst_6 = arith.constant dense<0.000000e+00> : vector<8xf32>
    %11 = vector.multi_reduction <add>, %10, %cst_6 [1] : vector<8x32xf32> to vector<8xf32>
    %12 = vector.shape_cast %11 : vector<8xf32> to vector<8x1xf32>
    %cst_7 = arith.constant 3.200000e+01 : f32
    %13 = vector.broadcast %cst_7 : f32 to vector<8x1xf32>
    %14 = arith.divf %12, %13 : vector<8x1xf32>
    %cst_8 = arith.constant 9.99999974E-6 : f32
    %15 = vector.broadcast %cst_8 : f32 to vector<8x1xf32>
    %16 = arith.addf %14, %15 : vector<8x1xf32>
    %17 = math.rsqrt %16 : vector<8x1xf32>
    %18 = vector.broadcast %17 : vector<8x1xf32> to vector<8x32xf32>
    %19 = arith.mulf %9, %18 : vector<8x32xf32>
    %20 = vector.broadcast %0 : vector<1x32xf32> to vector<8x32xf32>
    %21 = arith.mulf %19, %20 : vector<8x32xf32>
    %22 = vector.broadcast %1 : vector<1x32xf32> to vector<8x32xf32>
    %23 = arith.addf %21, %22 : vector<8x32xf32>
    %24 = arith.truncf %23 : vector<8x32xf32> to vector<8x32xbf16>
    %c0_9 = arith.constant 0 : index
    %c0_10 = arith.constant 0 : index
    %25 = vector.load %arg3[%c0_9, %c0_10] : memref<32x128xbf16, #tpu.memory_space<vmem>>, vector<32x128xbf16>
    %cst_11 = arith.constant dense<0.000000e+00> : vector<8x128xf32>
    %26 = tpu.matmul %24, %25, %cst_11 {dimension_numbers = #tpu.dot_dimension_numbers<[1], [0], [0], [1], [0, 0, 1, 1], [], []>} : vector<8x32xbf16>, vector<32x128xbf16>, vector<8x128xf32> -> vector<8x128xf32>
    %27 = vector.broadcast %2 : vector<1x128xf32> to vector<8x128xf32>
    %28 = arith.addf %26, %27 : vector<8x128xf32>
    %c0_12 = arith.constant 0 : index
    %c0_13 = arith.constant 0 : index
    %29 = vector.load %arg5[%c0_12, %c0_13] : memref<8x128xf32, #tpu.memory_space<vmem>>, vector<8x128xf32>
    tpu.vector_store %arg5[%c0_12, %c0_13], %28 {strides = array<i32>} : memref<8x128xf32, #tpu.memory_space<vmem>>, vector<8x128xf32>,
    %c3 = arith.constant 3 : index
    %c0_14 = arith.constant 0 : index
    %30 = vector.load %arg2[%c3, %c0_14] : memref<6x128xf32, #tpu.memory_space<vmem>>, vector<1x16xf32>
    %c4 = arith.constant 4 : index
    %c0_15 = arith.constant 0 : index
    %31 = vector.load %arg2[%c4, %c0_15] : memref<6x128xf32, #tpu.memory_space<vmem>>, vector<1x16xf32>
    %c5 = arith.constant 5 : index
    %c0_16 = arith.constant 0 : index
    %32 = vector.load %arg2[%c5, %c0_16] : memref<6x128xf32, #tpu.memory_space<vmem>>, vector<1x64xf32>
    %c0_17 = arith.constant 0 : index
    %c0_18 = arith.constant 0 : index
    %33 = vector.load %arg1[%c0_17, %c0_18] : memref<12x16xf32, #tpu.memory_space<vmem>>, vector<12x16xf32>
    %cst_19 = arith.constant dense<0.000000e+00> : vector<12xf32>
    %34 = vector.multi_reduction <add>, %33, %cst_19 [1] : vector<12x16xf32> to vector<12xf32>
    %35 = vector.shape_cast %34 : vector<12xf32> to vector<12x1xf32>
    %cst_20 = arith.constant 1.600000e+01 : f32
    %36 = vector.broadcast %cst_20 : f32 to vector<12x1xf32>
    %37 = arith.divf %35, %36 : vector<12x1xf32>
    %38 = vector.broadcast %37 : vector<12x1xf32> to vector<12x16xf32>
    %39 = arith.subf %33, %38 : vector<12x16xf32>
    %40 = arith.mulf %39, %39 : vector<12x16xf32>
    %cst_21 = arith.constant dense<0.000000e+00> : vector<12xf32>
    %41 = vector.multi_reduction <add>, %40, %cst_21 [1] : vector<12x16xf32> to vector<12xf32>
    %42 = vector.shape_cast %41 : vector<12xf32> to vector<12x1xf32>
    %cst_22 = arith.constant 1.600000e+01 : f32
    %43 = vector.broadcast %cst_22 : f32 to vector<12x1xf32>
    %44 = arith.divf %42, %43 : vector<12x1xf32>
    %cst_23 = arith.constant 9.99999974E-6 : f32
    %45 = vector.broadcast %cst_23 : f32 to vector<12x1xf32>
    %46 = arith.addf %44, %45 : vector<12x1xf32>
    %47 = math.rsqrt %46 : vector<12x1xf32>
    %48 = vector.broadcast %47 : vector<12x1xf32> to vector<12x16xf32>
    %49 = arith.mulf %39, %48 : vector<12x16xf32>
    %50 = vector.broadcast %30 : vector<1x16xf32> to vector<12x16xf32>
    %51 = arith.mulf %49, %50 : vector<12x16xf32>
    %52 = vector.broadcast %31 : vector<1x16xf32> to vector<12x16xf32>
    %53 = arith.addf %51, %52 : vector<12x16xf32>
    %54 = arith.truncf %53 : vector<12x16xf32> to vector<12x16xbf16>
    %c0_24 = arith.constant 0 : index
    %c0_25 = arith.constant 0 : index
    %55 = vector.load %arg4[%c0_24, %c0_25] : memref<16x64xbf16, #tpu.memory_space<vmem>>, vector<16x64xbf16>
    %cst_26 = arith.constant dense<0.000000e+00> : vector<12x64xf32>
    %56 = tpu.matmul %54, %55, %cst_26 {dimension_numbers = #tpu.dot_dimension_numbers<[1], [0], [0], [1], [0, 0, 1, 1], [], []>} : vector<12x16xbf16>, vector<16x64xbf16>, vector<12x64xf32> -> vector<12x64xf32>
    %57 = vector.broadcast %32 : vector<1x64xf32> to vector<12x64xf32>
    %58 = arith.addf %56, %57 : vector<12x64xf32>
    %c0_27 = arith.constant 0 : index
    %c0_28 = arith.constant 0 : index
    %59 = vector.load %arg6[%c0_27, %c0_28] : memref<12x64xf32, #tpu.memory_space<vmem>>, vector<12x64xf32>
    tpu.vector_store %arg6[%c0_27, %c0_28], %58 {strides = array<i32>} : memref<12x64xf32, #tpu.memory_space<vmem>>, vector<12x64xf32>,
    return
  }
}

module attributes {stable_mosaic.version = 11 : i64} {
  func.func @kernel(%arg0: i32, %arg1: memref<2x12xi32, #tpu.memory_space<smem>>, %arg2: memref<1x1x128xf32, #tpu.memory_space<vmem>>, %arg3: memref<1x1x128xf32, #tpu.memory_space<vmem>>, %arg4: memref<1x1x64xf32, #tpu.memory_space<vmem>>, %arg5: memref<32x32xf32, #tpu.memory_space<vmem>>, %arg6: memref<8x32xf32, #tpu.memory_space<vmem>>, %arg7: memref<8x32xf32, #tpu.memory_space<vmem>>, %arg8: memref<8x32xf32, #tpu.memory_space<vmem>>) attributes {dimension_semantics = [#tpu.dimension_semantics<arbitrary>], iteration_bounds = array<i64: 12>, scalar_prefetch = 1 : i64, scratch_operands = 1 : i64, tpu.core_type = #tpu.core_type<tc>, window_params = [{transform_indices = @transform_0, window_bounds = array<i64: 1, 1, 128>}, {transform_indices = @transform_1, window_bounds = array<i64: 1, 1, 128>}, {transform_indices = @transform_2, window_bounds = array<i64: 1, 1, 64>}, {pipeline_mode = #tpu.pipeline_mode<synchronous>, transform_indices = @transform_3, window_bounds = array<i64: 32, 32>}, {pipeline_mode = #tpu.pipeline_mode<synchronous>, transform_indices = @transform_4, window_bounds = array<i64: 8, 32>}, {pipeline_mode = #tpu.pipeline_mode<synchronous>, transform_indices = @transform_5, window_bounds = array<i64: 8, 32>}]} {
    %c0_i32 = arith.constant 0 : i32
    %0 = arith.cmpi eq, %arg0, %c0_i32 : i32
    %1 = arith.extui %0 : i1 to i32
    %c0_i32_0 = arith.constant 0 : i32
    %2 = arith.cmpi ne, %1, %c0_i32_0 : i32
    scf.if %2 {
      %cst_17 = arith.constant -1.000000e+30 : f32
      %43 = vector.broadcast %cst_17 : f32 to vector<8x32xf32>
      %c0_18 = arith.constant 0 : index
      %c0_19 = arith.constant 0 : index
      %44 = vector.load %arg8[%c0_18, %c0_19] : memref<8x32xf32, #tpu.memory_space<vmem>>, vector<8x32xf32>
      tpu.vector_store %arg8[%c0_18, %c0_19], %43 {strides = array<i32>} : memref<8x32xf32, #tpu.memory_space<vmem>>, vector<8x32xf32>,
      %cst_20 = arith.constant 0.000000e+00 : f32
      %45 = vector.broadcast %cst_20 : f32 to vector<8x32xf32>
      %c0_21 = arith.constant 0 : index
      %c0_22 = arith.constant 0 : index
      %46 = vector.load %arg6[%c0_21, %c0_22] : memref<8x32xf32, #tpu.memory_space<vmem>>, vector<8x32xf32>
      tpu.vector_store %arg6[%c0_21, %c0_22], %45 {strides = array<i32>} : memref<8x32xf32, #tpu.memory_space<vmem>>, vector<8x32xf32>,
      %cst_23 = arith.constant 0.000000e+00 : f32
      %47 = vector.broadcast %cst_23 : f32 to vector<8x32xf32>
      %c0_24 = arith.constant 0 : index
      %c0_25 = arith.constant 0 : index
      %48 = vector.load %arg7[%c0_24, %c0_25] : memref<8x32xf32, #tpu.memory_space<vmem>>, vector<8x32xf32>
      tpu.vector_store %arg7[%c0_24, %c0_25], %47 {strides = array<i32>} : memref<8x32xf32, #tpu.memory_space<vmem>>, vector<8x32xf32>,
    } else {
    }
    %c1 = arith.constant 1 : index
    %3 = arith.index_cast %arg0 : i32 to index
    %4 = memref.load %arg1[%c1, %3] : memref<2x12xi32, #tpu.memory_space<smem>>
    %c0 = arith.constant 0 : index
    %c0_1 = arith.constant 0 : index
    %c0_2 = arith.constant 0 : index
    %5 = vector.load %arg2[%c0, %c0_1, %c0_2] : memref<1x1x128xf32, #tpu.memory_space<vmem>>, vector<1x1x128xf32>
    %6 = vector.shape_cast %5 : vector<1x1x128xf32> to vector<1x128xf32>
    %c0_3 = arith.constant 0 : index
    %c0_4 = arith.constant 0 : index
    %c0_5 = arith.constant 0 : index
    %7 = vector.load %arg3[%c0_3, %c0_4, %c0_5] : memref<1x1x128xf32, #tpu.memory_space<vmem>>, vector<1x1x128xf32>
    %8 = vector.shape_cast %7 : vector<1x1x128xf32> to vector<1x128xf32>
    %9 = vector.extract_strided_slice %6 {offsets = [0, 0], sizes = [1, 32], strides = [1, 1]} : vector<1x128xf32> to vector<1x32xf32>
    %10 = vector.extract_strided_slice %8 {offsets = [0, 32], sizes = [1, 32], strides = [1, 1]} : vector<1x128xf32> to vector<1x32xf32>
    %11 = vector.extract_strided_slice %8 {offsets = [0, 64], sizes = [1, 32], strides = [1, 1]} : vector<1x128xf32> to vector<1x32xf32>
    %c0_6 = arith.constant 0 : index
    %c0_7 = arith.constant 0 : index
    %c0_8 = arith.constant 0 : index
    %12 = vector.load %arg4[%c0_6, %c0_7, %c0_8] : memref<1x1x64xf32, #tpu.memory_space<vmem>>, vector<1x1x64xf32>
    %13 = vector.shape_cast %12 : vector<1x1x64xf32> to vector<1x64xf32>
    %14 = vector.extract_strided_slice %13 {offsets = [0, 0], sizes = [1, 32], strides = [1, 1]} : vector<1x64xf32> to vector<1x32xf32>
    %15 = arith.addf %10, %14 : vector<1x32xf32>
    %16 = vector.extract_strided_slice %13 {offsets = [0, 32], sizes = [1, 32], strides = [1, 1]} : vector<1x64xf32> to vector<1x32xf32>
    %17 = arith.addf %11, %16 : vector<1x32xf32>
    %18 = arith.mulf %9, %15 : vector<1x32xf32>
    %c0_9 = arith.constant 0 : index
    %c0_10 = arith.constant 0 : index
    %19 = vector.load %arg5[%c0_9, %c0_10] : memref<32x32xf32, #tpu.memory_space<vmem>>, vector<32x32xf32>
    %cst = arith.constant dense<0.000000e+00> : vector<1x32xf32>
    %20 = tpu.matmul %18, %19, %cst {dimension_numbers = #tpu.dot_dimension_numbers<[1], [0], [0], [1], [0, 0, 1, 1], [], []>} : vector<1x32xf32>, vector<32x32xf32>, vector<1x32xf32> -> vector<1x32xf32>
    %21 = arith.index_cast %4 : i32 to index
    %c0_11 = arith.constant 0 : index
    %22 = vector.load %arg8[%21, %c0_11] : memref<8x32xf32, #tpu.memory_space<vmem>>, vector<1x32xf32>
    %23 = arith.maximumf %22, %20 : vector<1x32xf32>
    %24 = arith.subf %22, %23 : vector<1x32xf32>
    %25 = math.exp %24 : vector<1x32xf32>
    %26 = arith.subf %20, %23 : vector<1x32xf32>
    %27 = math.exp %26 : vector<1x32xf32>
    %28 = arith.index_cast %4 : i32 to index
    %c0_12 = arith.constant 0 : index
    %29 = vector.load %arg8[%28, %c0_12] : memref<8x32xf32, #tpu.memory_space<vmem>>, vector<1x32xf32>
    tpu.vector_store %arg8[%28, %c0_12], %23 {strides = array<i32>} : memref<8x32xf32, #tpu.memory_space<vmem>>, vector<1x32xf32>,
    %30 = arith.index_cast %4 : i32 to index
    %c0_13 = arith.constant 0 : index
    %31 = vector.load %arg6[%30, %c0_13] : memref<8x32xf32, #tpu.memory_space<vmem>>, vector<1x32xf32>
    %32 = arith.mulf %25, %31 : vector<1x32xf32>
    %33 = arith.addf %32, %27 : vector<1x32xf32>
    %34 = arith.index_cast %4 : i32 to index
    %c0_14 = arith.constant 0 : index
    %35 = vector.load %arg6[%34, %c0_14] : memref<8x32xf32, #tpu.memory_space<vmem>>, vector<1x32xf32>
    tpu.vector_store %arg6[%34, %c0_14], %33 {strides = array<i32>} : memref<8x32xf32, #tpu.memory_space<vmem>>, vector<1x32xf32>,
    %36 = arith.index_cast %4 : i32 to index
    %c0_15 = arith.constant 0 : index
    %37 = vector.load %arg7[%36, %c0_15] : memref<8x32xf32, #tpu.memory_space<vmem>>, vector<1x32xf32>
    %38 = arith.mulf %25, %37 : vector<1x32xf32>
    %39 = arith.mulf %27, %17 : vector<1x32xf32>
    %40 = arith.addf %38, %39 : vector<1x32xf32>
    %41 = arith.index_cast %4 : i32 to index
    %c0_16 = arith.constant 0 : index
    %42 = vector.load %arg7[%41, %c0_16] : memref<8x32xf32, #tpu.memory_space<vmem>>, vector<1x32xf32>
    tpu.vector_store %arg7[%41, %c0_16], %40 {strides = array<i32>} : memref<8x32xf32, #tpu.memory_space<vmem>>, vector<1x32xf32>,
    return
  }
  func.func @transform_0(%arg0: i32, %arg1: memref<2x12xi32, #tpu.memory_space<smem>>) -> (i32, i32, i32) {
    %c1 = arith.constant 1 : index
    %0 = arith.index_cast %arg0 : i32 to index
    %1 = memref.load %arg1[%c1, %0] : memref<2x12xi32, #tpu.memory_space<smem>>
    %c0_i32 = arith.constant 0 : i32
    %c0_i32_0 = arith.constant 0 : i32
    %c0_i32_1 = arith.constant 0 : i32
    return %1, %c0_i32, %c0_i32_0 : i32, i32, i32
  }
  func.func @transform_1(%arg0: i32, %arg1: memref<2x12xi32, #tpu.memory_space<smem>>) -> (i32, i32, i32) {
    %c0 = arith.constant 0 : index
    %0 = arith.index_cast %arg0 : i32 to index
    %1 = memref.load %arg1[%c0, %0] : memref<2x12xi32, #tpu.memory_space<smem>>
    %c0_i32 = arith.constant 0 : i32
    %c0_i32_0 = arith.constant 0 : i32
    %c0_i32_1 = arith.constant 0 : i32
    return %1, %c0_i32, %c0_i32_0 : i32, i32, i32
  }
  func.func @transform_2(%arg0: i32, %arg1: memref<2x12xi32, #tpu.memory_space<smem>>) -> (i32, i32, i32) {
    %c0_i32 = arith.constant 0 : i32
    %c0_i32_0 = arith.constant 0 : i32
    %c0_i32_1 = arith.constant 0 : i32
    return %arg0, %c0_i32, %c0_i32_0 : i32, i32, i32
  }
  func.func @transform_3(%arg0: i32, %arg1: memref<2x12xi32, #tpu.memory_space<smem>>) -> (i32, i32) {
    %c0_i32 = arith.constant 0 : i32
    %c0_i32_0 = arith.constant 0 : i32
    %c0_i32_1 = arith.constant 0 : i32
    return %c0_i32, %c0_i32_0 : i32, i32
  }
  func.func @transform_4(%arg0: i32, %arg1: memref<2x12xi32, #tpu.memory_space<smem>>) -> (i32, i32) {
    %c0_i32 = arith.constant 0 : i32
    %c0_i32_0 = arith.constant 0 : i32
    %c0_i32_1 = arith.constant 0 : i32
    return %c0_i32, %c0_i32_0 : i32, i32
  }
  func.func @transform_5(%arg0: i32, %arg1: memref<2x12xi32, #tpu.memory_space<smem>>) -> (i32, i32) {
    %c0_i32 = arith.constant 0 : i32
    %c0_i32_0 = arith.constant 0 : i32
    %c0_i32_1 = arith.constant 0 : i32
    return %c0_i32, %c0_i32_0 : i32, i32
  }
}

module attributes {stable_mosaic.version = 11 : i64} {
  func.func @kernel(%arg0: memref<8x32xf32, #tpu.memory_space<vmem>>, %arg1: memref<8x128xf32, #tpu.memory_space<vmem>>, %arg2: memref<8x32xf32, #tpu.memory_space<vmem>>, %arg3: memref<8x32xf32, #tpu.memory_space<vmem>>, %arg4: memref<13x128xf32, #tpu.memory_space<vmem>>, %arg5: memref<32x32xbf16, #tpu.memory_space<vmem>>, %arg6: memref<32x32xbf16, #tpu.memory_space<vmem>>, %arg7: memref<32x32xbf16, #tpu.memory_space<vmem>>, %arg8: memref<32x64xbf16, #tpu.memory_space<vmem>>, %arg9: memref<64x32xbf16, #tpu.memory_space<vmem>>, %arg10: memref<32x32xbf16, #tpu.memory_space<vmem>>, %arg11: memref<8x32xf32, #tpu.memory_space<vmem>>, %arg12: memref<8x32xf32, #tpu.memory_space<vmem>>) attributes {dimension_semantics = [], scalar_prefetch = 0 : i64, scratch_operands = 0 : i64, tpu.core_type = #tpu.core_type<tc>} {
    %c0 = arith.constant 0 : index
    %c0_0 = arith.constant 0 : index
    %0 = vector.load %arg4[%c0, %c0_0] : memref<13x128xf32, #tpu.memory_space<vmem>>, vector<1x32xf32>
    %c1 = arith.constant 1 : index
    %c0_1 = arith.constant 0 : index
    %1 = vector.load %arg4[%c1, %c0_1] : memref<13x128xf32, #tpu.memory_space<vmem>>, vector<1x32xf32>
    %c2 = arith.constant 2 : index
    %c0_2 = arith.constant 0 : index
    %2 = vector.load %arg4[%c2, %c0_2] : memref<13x128xf32, #tpu.memory_space<vmem>>, vector<1x32xf32>
    %c3 = arith.constant 3 : index
    %c0_3 = arith.constant 0 : index
    %3 = vector.load %arg4[%c3, %c0_3] : memref<13x128xf32, #tpu.memory_space<vmem>>, vector<1x32xf32>
    %c4 = arith.constant 4 : index
    %c0_4 = arith.constant 0 : index
    %4 = vector.load %arg4[%c4, %c0_4] : memref<13x128xf32, #tpu.memory_space<vmem>>, vector<1x32xf32>
    %c5 = arith.constant 5 : index
    %c0_5 = arith.constant 0 : index
    %5 = vector.load %arg4[%c5, %c0_5] : memref<13x128xf32, #tpu.memory_space<vmem>>, vector<1x32xf32>
    %c6 = arith.constant 6 : index
    %c0_6 = arith.constant 0 : index
    %6 = vector.load %arg4[%c6, %c0_6] : memref<13x128xf32, #tpu.memory_space<vmem>>, vector<1x32xf32>
    %c7 = arith.constant 7 : index
    %c0_7 = arith.constant 0 : index
    %7 = vector.load %arg4[%c7, %c0_7] : memref<13x128xf32, #tpu.memory_space<vmem>>, vector<1x32xf32>
    %c8 = arith.constant 8 : index
    %c0_8 = arith.constant 0 : index
    %8 = vector.load %arg4[%c8, %c0_8] : memref<13x128xf32, #tpu.memory_space<vmem>>, vector<1x64xf32>
    %c9 = arith.constant 9 : index
    %c0_9 = arith.constant 0 : index
    %9 = vector.load %arg4[%c9, %c0_9] : memref<13x128xf32, #tpu.memory_space<vmem>>, vector<1x32xf32>
    %c10 = arith.constant 10 : index
    %c0_10 = arith.constant 0 : index
    %10 = vector.load %arg4[%c10, %c0_10] : memref<13x128xf32, #tpu.memory_space<vmem>>, vector<1x32xf32>
    %c11 = arith.constant 11 : index
    %c0_11 = arith.constant 0 : index
    %11 = vector.load %arg4[%c11, %c0_11] : memref<13x128xf32, #tpu.memory_space<vmem>>, vector<1x32xf32>
    %c12 = arith.constant 12 : index
    %c0_12 = arith.constant 0 : index
    %12 = vector.load %arg4[%c12, %c0_12] : memref<13x128xf32, #tpu.memory_space<vmem>>, vector<1x32xf32>
    %c0_13 = arith.constant 0 : index
    %c0_14 = arith.constant 0 : index
    %13 = vector.load %arg0[%c0_13, %c0_14] : memref<8x32xf32, #tpu.memory_space<vmem>>, vector<8x32xf32>
    %cst = arith.constant dense<0.000000e+00> : vector<8xf32>
    %14 = vector.multi_reduction <add>, %13, %cst [1] : vector<8x32xf32> to vector<8xf32>
    %15 = vector.shape_cast %14 : vector<8xf32> to vector<8x1xf32>
    %cst_15 = arith.constant 3.200000e+01 : f32
    %16 = vector.broadcast %cst_15 : f32 to vector<8x1xf32>
    %17 = arith.divf %15, %16 : vector<8x1xf32>
    %18 = vector.broadcast %17 : vector<8x1xf32> to vector<8x32xf32>
    %19 = arith.subf %13, %18 : vector<8x32xf32>
    %20 = arith.mulf %19, %19 : vector<8x32xf32>
    %cst_16 = arith.constant dense<0.000000e+00> : vector<8xf32>
    %21 = vector.multi_reduction <add>, %20, %cst_16 [1] : vector<8x32xf32> to vector<8xf32>
    %22 = vector.shape_cast %21 : vector<8xf32> to vector<8x1xf32>
    %cst_17 = arith.constant 3.200000e+01 : f32
    %23 = vector.broadcast %cst_17 : f32 to vector<8x1xf32>
    %24 = arith.divf %22, %23 : vector<8x1xf32>
    %cst_18 = arith.constant 9.99999974E-6 : f32
    %25 = vector.broadcast %cst_18 : f32 to vector<8x1xf32>
    %26 = arith.addf %24, %25 : vector<8x1xf32>
    %27 = math.rsqrt %26 : vector<8x1xf32>
    %28 = vector.broadcast %27 : vector<8x1xf32> to vector<8x32xf32>
    %29 = arith.mulf %19, %28 : vector<8x32xf32>
    %30 = vector.broadcast %0 : vector<1x32xf32> to vector<8x32xf32>
    %31 = arith.mulf %29, %30 : vector<8x32xf32>
    %32 = vector.broadcast %1 : vector<1x32xf32> to vector<8x32xf32>
    %33 = arith.addf %31, %32 : vector<8x32xf32>
    %c0_19 = arith.constant 0 : index
    %c0_20 = arith.constant 0 : index
    %34 = vector.load %arg2[%c0_19, %c0_20] : memref<8x32xf32, #tpu.memory_space<vmem>>, vector<8x32xf32>
    %c0_21 = arith.constant 0 : index
    %c0_22 = arith.constant 0 : index
    %35 = vector.load %arg3[%c0_21, %c0_22] : memref<8x32xf32, #tpu.memory_space<vmem>>, vector<8x32xf32>
    %cst_23 = arith.constant 1.000000e-30 : f32
    %36 = vector.broadcast %cst_23 : f32 to vector<8x32xf32>
    %37 = arith.maximumf %34, %36 : vector<8x32xf32>
    %38 = tpu.reciprocal %37 {approx = true} : vector<8x32xf32> -> vector<8x32xf32>
    %cst_24 = arith.constant 0.000000e+00 : f32
    %39 = vector.broadcast %cst_24 : f32 to vector<8x32xf32>
    %40 = arith.cmpf ogt, %34, %39 : vector<8x32xf32>
    %41 = arith.mulf %35, %38 : vector<8x32xf32>
    %cst_25 = arith.constant 0.000000e+00 : f32
    %42 = vector.broadcast %cst_25 : f32 to vector<8x32xf32>
    %43 = arith.select %40, %41, %42 : vector<8x32xi1>, vector<8x32xf32>
    %c0_26 = arith.constant 0 : index
    %c96 = arith.constant 96 : index
    %44 = vector.load %arg1[%c0_26, %c96] : memref<8x128xf32, #tpu.memory_space<vmem>>, vector<8x32xf32>
    %45 = arith.truncf %43 : vector<8x32xf32> to vector<8x32xbf16>
    %c0_27 = arith.constant 0 : index
    %c0_28 = arith.constant 0 : index
    %46 = vector.load %arg5[%c0_27, %c0_28] : memref<32x32xbf16, #tpu.memory_space<vmem>>, vector<32x32xbf16>
    %cst_29 = arith.constant dense<0.000000e+00> : vector<8x32xf32>
    %47 = tpu.matmul %45, %46, %cst_29 {dimension_numbers = #tpu.dot_dimension_numbers<[1], [0], [0], [1], [0, 0, 1, 1], [], []>} : vector<8x32xbf16>, vector<32x32xbf16>, vector<8x32xf32> -> vector<8x32xf32>
    %48 = arith.truncf %33 : vector<8x32xf32> to vector<8x32xbf16>
    %c0_30 = arith.constant 0 : index
    %c0_31 = arith.constant 0 : index
    %49 = vector.load %arg6[%c0_30, %c0_31] : memref<32x32xbf16, #tpu.memory_space<vmem>>, vector<32x32xbf16>
    %cst_32 = arith.constant dense<0.000000e+00> : vector<8x32xf32>
    %50 = tpu.matmul %48, %49, %cst_32 {dimension_numbers = #tpu.dot_dimension_numbers<[1], [0], [0], [1], [0, 0, 1, 1], [], []>} : vector<8x32xbf16>, vector<32x32xbf16>, vector<8x32xf32> -> vector<8x32xf32>
    %51 = arith.addf %47, %50 : vector<8x32xf32>
    %52 = vector.broadcast %2 : vector<1x32xf32> to vector<8x32xf32>
    %53 = arith.addf %51, %52 : vector<8x32xf32>
    %54 = arith.negf %53 : vector<8x32xf32>
    %55 = math.exp %54 : vector<8x32xf32>
    %cst_33 = arith.constant 1.000000e+00 : f32
    %56 = vector.broadcast %cst_33 : f32 to vector<8x32xf32>
    %57 = arith.addf %56, %55 : vector<8x32xf32>
    %58 = arith.divf %56, %57 : vector<8x32xf32>
    %59 = arith.subf %44, %43 : vector<8x32xf32>
    %60 = arith.mulf %58, %59 : vector<8x32xf32>
    %61 = arith.addf %43, %60 : vector<8x32xf32>
    %62 = arith.truncf %61 : vector<8x32xf32> to vector<8x32xbf16>
    %c0_34 = arith.constant 0 : index
    %c0_35 = arith.constant 0 : index
    %63 = vector.load %arg7[%c0_34, %c0_35] : memref<32x32xbf16, #tpu.memory_space<vmem>>, vector<32x32xbf16>
    %cst_36 = arith.constant dense<0.000000e+00> : vector<8x32xf32>
    %64 = tpu.matmul %62, %63, %cst_36 {dimension_numbers = #tpu.dot_dimension_numbers<[1], [0], [0], [1], [0, 0, 1, 1], [], []>} : vector<8x32xbf16>, vector<32x32xbf16>, vector<8x32xf32> -> vector<8x32xf32>
    %65 = vector.broadcast %3 : vector<1x32xf32> to vector<8x32xf32>
    %66 = arith.addf %64, %65 : vector<8x32xf32>
    %cst_37 = arith.constant dense<0.000000e+00> : vector<8xf32>
    %67 = vector.multi_reduction <add>, %66, %cst_37 [1] : vector<8x32xf32> to vector<8xf32>
    %68 = vector.shape_cast %67 : vector<8xf32> to vector<8x1xf32>
    %cst_38 = arith.constant 3.200000e+01 : f32
    %69 = vector.broadcast %cst_38 : f32 to vector<8x1xf32>
    %70 = arith.divf %68, %69 : vector<8x1xf32>
    %71 = vector.broadcast %70 : vector<8x1xf32> to vector<8x32xf32>
    %72 = arith.subf %66, %71 : vector<8x32xf32>
    %73 = arith.mulf %72, %72 : vector<8x32xf32>
    %cst_39 = arith.constant dense<0.000000e+00> : vector<8xf32>
    %74 = vector.multi_reduction <add>, %73, %cst_39 [1] : vector<8x32xf32> to vector<8xf32>
    %75 = vector.shape_cast %74 : vector<8xf32> to vector<8x1xf32>
    %cst_40 = arith.constant 3.200000e+01 : f32
    %76 = vector.broadcast %cst_40 : f32 to vector<8x1xf32>
    %77 = arith.divf %75, %76 : vector<8x1xf32>
    %cst_41 = arith.constant 9.99999974E-6 : f32
    %78 = vector.broadcast %cst_41 : f32 to vector<8x1xf32>
    %79 = arith.addf %77, %78 : vector<8x1xf32>
    %80 = math.rsqrt %79 : vector<8x1xf32>
    %81 = vector.broadcast %80 : vector<8x1xf32> to vector<8x32xf32>
    %82 = arith.mulf %72, %81 : vector<8x32xf32>
    %83 = vector.broadcast %4 : vector<1x32xf32> to vector<8x32xf32>
    %84 = arith.mulf %82, %83 : vector<8x32xf32>
    %85 = vector.broadcast %5 : vector<1x32xf32> to vector<8x32xf32>
    %86 = arith.addf %84, %85 : vector<8x32xf32>
    %87 = arith.addf %13, %86 : vector<8x32xf32>
    %cst_42 = arith.constant dense<0.000000e+00> : vector<8xf32>
    %88 = vector.multi_reduction <add>, %87, %cst_42 [1] : vector<8x32xf32> to vector<8xf32>
    %89 = vector.shape_cast %88 : vector<8xf32> to vector<8x1xf32>
    %cst_43 = arith.constant 3.200000e+01 : f32
    %90 = vector.broadcast %cst_43 : f32 to vector<8x1xf32>
    %91 = arith.divf %89, %90 : vector<8x1xf32>
    %92 = vector.broadcast %91 : vector<8x1xf32> to vector<8x32xf32>
    %93 = arith.subf %87, %92 : vector<8x32xf32>
    %94 = arith.mulf %93, %93 : vector<8x32xf32>
    %cst_44 = arith.constant dense<0.000000e+00> : vector<8xf32>
    %95 = vector.multi_reduction <add>, %94, %cst_44 [1] : vector<8x32xf32> to vector<8xf32>
    %96 = vector.shape_cast %95 : vector<8xf32> to vector<8x1xf32>
    %cst_45 = arith.constant 3.200000e+01 : f32
    %97 = vector.broadcast %cst_45 : f32 to vector<8x1xf32>
    %98 = arith.divf %96, %97 : vector<8x1xf32>
    %cst_46 = arith.constant 9.99999974E-6 : f32
    %99 = vector.broadcast %cst_46 : f32 to vector<8x1xf32>
    %100 = arith.addf %98, %99 : vector<8x1xf32>
    %101 = math.rsqrt %100 : vector<8x1xf32>
    %102 = vector.broadcast %101 : vector<8x1xf32> to vector<8x32xf32>
    %103 = arith.mulf %93, %102 : vector<8x32xf32>
    %104 = vector.broadcast %6 : vector<1x32xf32> to vector<8x32xf32>
    %105 = arith.mulf %103, %104 : vector<8x32xf32>
    %106 = vector.broadcast %7 : vector<1x32xf32> to vector<8x32xf32>
    %107 = arith.addf %105, %106 : vector<8x32xf32>
    %108 = arith.truncf %107 : vector<8x32xf32> to vector<8x32xbf16>
    %c0_47 = arith.constant 0 : index
    %c0_48 = arith.constant 0 : index
    %109 = vector.load %arg8[%c0_47, %c0_48] : memref<32x64xbf16, #tpu.memory_space<vmem>>, vector<32x64xbf16>
    %cst_49 = arith.constant dense<0.000000e+00> : vector<8x64xf32>
    %110 = tpu.matmul %108, %109, %cst_49 {dimension_numbers = #tpu.dot_dimension_numbers<[1], [0], [0], [1], [0, 0, 1, 1], [], []>} : vector<8x32xbf16>, vector<32x64xbf16>, vector<8x64xf32> -> vector<8x64xf32>
    %111 = vector.broadcast %8 : vector<1x64xf32> to vector<8x64xf32>
    %112 = arith.addf %110, %111 : vector<8x64xf32>
    %cst_50 = arith.constant 0.000000e+00 : f32
    %113 = vector.broadcast %cst_50 : f32 to vector<8x64xf32>
    %114 = arith.maximumf %112, %113 : vector<8x64xf32>
    %115 = arith.truncf %114 : vector<8x64xf32> to vector<8x64xbf16>
    %c0_51 = arith.constant 0 : index
    %c0_52 = arith.constant 0 : index
    %116 = vector.load %arg9[%c0_51, %c0_52] : memref<64x32xbf16, #tpu.memory_space<vmem>>, vector<64x32xbf16>
    %cst_53 = arith.constant dense<0.000000e+00> : vector<8x32xf32>
    %117 = tpu.matmul %115, %116, %cst_53 {dimension_numbers = #tpu.dot_dimension_numbers<[1], [0], [0], [1], [0, 0, 1, 1], [], []>} : vector<8x64xbf16>, vector<64x32xbf16>, vector<8x32xf32> -> vector<8x32xf32>
    %118 = vector.broadcast %9 : vector<1x32xf32> to vector<8x32xf32>
    %119 = arith.addf %117, %118 : vector<8x32xf32>
    %cst_54 = arith.constant dense<0.000000e+00> : vector<8xf32>
    %120 = vector.multi_reduction <add>, %119, %cst_54 [1] : vector<8x32xf32> to vector<8xf32>
    %121 = vector.shape_cast %120 : vector<8xf32> to vector<8x1xf32>
    %cst_55 = arith.constant 3.200000e+01 : f32
    %122 = vector.broadcast %cst_55 : f32 to vector<8x1xf32>
    %123 = arith.divf %121, %122 : vector<8x1xf32>
    %124 = vector.broadcast %123 : vector<8x1xf32> to vector<8x32xf32>
    %125 = arith.subf %119, %124 : vector<8x32xf32>
    %126 = arith.mulf %125, %125 : vector<8x32xf32>
    %cst_56 = arith.constant dense<0.000000e+00> : vector<8xf32>
    %127 = vector.multi_reduction <add>, %126, %cst_56 [1] : vector<8x32xf32> to vector<8xf32>
    %128 = vector.shape_cast %127 : vector<8xf32> to vector<8x1xf32>
    %cst_57 = arith.constant 3.200000e+01 : f32
    %129 = vector.broadcast %cst_57 : f32 to vector<8x1xf32>
    %130 = arith.divf %128, %129 : vector<8x1xf32>
    %cst_58 = arith.constant 9.99999974E-6 : f32
    %131 = vector.broadcast %cst_58 : f32 to vector<8x1xf32>
    %132 = arith.addf %130, %131 : vector<8x1xf32>
    %133 = math.rsqrt %132 : vector<8x1xf32>
    %134 = vector.broadcast %133 : vector<8x1xf32> to vector<8x32xf32>
    %135 = arith.mulf %125, %134 : vector<8x32xf32>
    %136 = vector.broadcast %10 : vector<1x32xf32> to vector<8x32xf32>
    %137 = arith.mulf %135, %136 : vector<8x32xf32>
    %138 = vector.broadcast %11 : vector<1x32xf32> to vector<8x32xf32>
    %139 = arith.addf %137, %138 : vector<8x32xf32>
    %140 = arith.addf %87, %139 : vector<8x32xf32>
    %c0_59 = arith.constant 0 : index
    %c0_60 = arith.constant 0 : index
    %141 = vector.load %arg11[%c0_59, %c0_60] : memref<8x32xf32, #tpu.memory_space<vmem>>, vector<8x32xf32>
    tpu.vector_store %arg11[%c0_59, %c0_60], %140 {strides = array<i32>} : memref<8x32xf32, #tpu.memory_space<vmem>>, vector<8x32xf32>,
    %142 = arith.truncf %140 : vector<8x32xf32> to vector<8x32xbf16>
    %c0_61 = arith.constant 0 : index
    %c0_62 = arith.constant 0 : index
    %143 = vector.load %arg10[%c0_61, %c0_62] : memref<32x32xbf16, #tpu.memory_space<vmem>>, vector<32x32xbf16>
    %cst_63 = arith.constant dense<0.000000e+00> : vector<8x32xf32>
    %144 = tpu.matmul %142, %143, %cst_63 {dimension_numbers = #tpu.dot_dimension_numbers<[1], [0], [0], [1], [0, 0, 1, 1], [], []>} : vector<8x32xbf16>, vector<32x32xbf16>, vector<8x32xf32> -> vector<8x32xf32>
    %145 = vector.broadcast %12 : vector<1x32xf32> to vector<8x32xf32>
    %146 = arith.addf %144, %145 : vector<8x32xf32>
    %c0_64 = arith.constant 0 : index
    %c0_65 = arith.constant 0 : index
    %147 = vector.load %arg12[%c0_64, %c0_65] : memref<8x32xf32, #tpu.memory_space<vmem>>, vector<8x32xf32>
    tpu.vector_store %arg12[%c0_64, %c0_65], %146 {strides = array<i32>} : memref<8x32xf32, #tpu.memory_space<vmem>>, vector<8x32xf32>,
    return
  }
}

module attributes {stable_mosaic.version = 11 : i64} {
  func.func @kernel(%arg0: memref<14x32xf32, #tpu.memory_space<vmem>>, %arg1: memref<3x128xf32, #tpu.memory_space<vmem>>, %arg2: memref<32x128xbf16, #tpu.memory_space<vmem>>, %arg3: memref<14x128xf32, #tpu.memory_space<vmem>>) attributes {dimension_semantics = [], scalar_prefetch = 0 : i64, scratch_operands = 0 : i64, tpu.core_type = #tpu.core_type<tc>} {
    %c0 = arith.constant 0 : index
    %c0_0 = arith.constant 0 : index
    %0 = vector.load %arg1[%c0, %c0_0] : memref<3x128xf32, #tpu.memory_space<vmem>>, vector<1x32xf32>
    %c1 = arith.constant 1 : index
    %c0_1 = arith.constant 0 : index
    %1 = vector.load %arg1[%c1, %c0_1] : memref<3x128xf32, #tpu.memory_space<vmem>>, vector<1x32xf32>
    %c2 = arith.constant 2 : index
    %c0_2 = arith.constant 0 : index
    %2 = vector.load %arg1[%c2, %c0_2] : memref<3x128xf32, #tpu.memory_space<vmem>>, vector<1x128xf32>
    %c0_3 = arith.constant 0 : index
    %c0_4 = arith.constant 0 : index
    %3 = vector.load %arg0[%c0_3, %c0_4] : memref<14x32xf32, #tpu.memory_space<vmem>>, vector<14x32xf32>
    %cst = arith.constant dense<0.000000e+00> : vector<14xf32>
    %4 = vector.multi_reduction <add>, %3, %cst [1] : vector<14x32xf32> to vector<14xf32>
    %5 = vector.shape_cast %4 : vector<14xf32> to vector<14x1xf32>
    %cst_5 = arith.constant 3.200000e+01 : f32
    %6 = vector.broadcast %cst_5 : f32 to vector<14x1xf32>
    %7 = arith.divf %5, %6 : vector<14x1xf32>
    %8 = vector.broadcast %7 : vector<14x1xf32> to vector<14x32xf32>
    %9 = arith.subf %3, %8 : vector<14x32xf32>
    %10 = arith.mulf %9, %9 : vector<14x32xf32>
    %cst_6 = arith.constant dense<0.000000e+00> : vector<14xf32>
    %11 = vector.multi_reduction <add>, %10, %cst_6 [1] : vector<14x32xf32> to vector<14xf32>
    %12 = vector.shape_cast %11 : vector<14xf32> to vector<14x1xf32>
    %cst_7 = arith.constant 3.200000e+01 : f32
    %13 = vector.broadcast %cst_7 : f32 to vector<14x1xf32>
    %14 = arith.divf %12, %13 : vector<14x1xf32>
    %cst_8 = arith.constant 9.99999974E-6 : f32
    %15 = vector.broadcast %cst_8 : f32 to vector<14x1xf32>
    %16 = arith.addf %14, %15 : vector<14x1xf32>
    %17 = math.rsqrt %16 : vector<14x1xf32>
    %18 = vector.broadcast %17 : vector<14x1xf32> to vector<14x32xf32>
    %19 = arith.mulf %9, %18 : vector<14x32xf32>
    %20 = vector.broadcast %0 : vector<1x32xf32> to vector<14x32xf32>
    %21 = arith.mulf %19, %20 : vector<14x32xf32>
    %22 = vector.broadcast %1 : vector<1x32xf32> to vector<14x32xf32>
    %23 = arith.addf %21, %22 : vector<14x32xf32>
    %24 = arith.truncf %23 : vector<14x32xf32> to vector<14x32xbf16>
    %c0_9 = arith.constant 0 : index
    %c0_10 = arith.constant 0 : index
    %25 = vector.load %arg2[%c0_9, %c0_10] : memref<32x128xbf16, #tpu.memory_space<vmem>>, vector<32x128xbf16>
    %cst_11 = arith.constant dense<0.000000e+00> : vector<14x128xf32>
    %26 = tpu.matmul %24, %25, %cst_11 {dimension_numbers = #tpu.dot_dimension_numbers<[1], [0], [0], [1], [0, 0, 1, 1], [], []>} : vector<14x32xbf16>, vector<32x128xbf16>, vector<14x128xf32> -> vector<14x128xf32>
    %27 = vector.broadcast %2 : vector<1x128xf32> to vector<14x128xf32>
    %28 = arith.addf %26, %27 : vector<14x128xf32>
    %c0_12 = arith.constant 0 : index
    %c0_13 = arith.constant 0 : index
    %29 = vector.load %arg3[%c0_12, %c0_13] : memref<14x128xf32, #tpu.memory_space<vmem>>, vector<14x128xf32>
    tpu.vector_store %arg3[%c0_12, %c0_13], %28 {strides = array<i32>} : memref<14x128xf32, #tpu.memory_space<vmem>>, vector<14x128xf32>,
    return
  }
}

module attributes {stable_mosaic.version = 11 : i64} {
  func.func @kernel(%arg0: memref<14x32xf32, #tpu.memory_space<vmem>>, %arg1: memref<14x128xf32, #tpu.memory_space<vmem>>, %arg2: memref<14x32xf32, #tpu.memory_space<vmem>>, %arg3: memref<14x32xf32, #tpu.memory_space<vmem>>, %arg4: memref<12x128xf32, #tpu.memory_space<vmem>>, %arg5: memref<32x32xbf16, #tpu.memory_space<vmem>>, %arg6: memref<32x32xbf16, #tpu.memory_space<vmem>>, %arg7: memref<32x32xbf16, #tpu.memory_space<vmem>>, %arg8: memref<32x64xbf16, #tpu.memory_space<vmem>>, %arg9: memref<64x32xbf16, #tpu.memory_space<vmem>>, %arg10: memref<14x32xf32, #tpu.memory_space<vmem>>) attributes {dimension_semantics = [], scalar_prefetch = 0 : i64, scratch_operands = 0 : i64, tpu.core_type = #tpu.core_type<tc>} {
    %c0 = arith.constant 0 : index
    %c0_0 = arith.constant 0 : index
    %0 = vector.load %arg4[%c0, %c0_0] : memref<12x128xf32, #tpu.memory_space<vmem>>, vector<1x32xf32>
    %c1 = arith.constant 1 : index
    %c0_1 = arith.constant 0 : index
    %1 = vector.load %arg4[%c1, %c0_1] : memref<12x128xf32, #tpu.memory_space<vmem>>, vector<1x32xf32>
    %c2 = arith.constant 2 : index
    %c0_2 = arith.constant 0 : index
    %2 = vector.load %arg4[%c2, %c0_2] : memref<12x128xf32, #tpu.memory_space<vmem>>, vector<1x32xf32>
    %c3 = arith.constant 3 : index
    %c0_3 = arith.constant 0 : index
    %3 = vector.load %arg4[%c3, %c0_3] : memref<12x128xf32, #tpu.memory_space<vmem>>, vector<1x32xf32>
    %c4 = arith.constant 4 : index
    %c0_4 = arith.constant 0 : index
    %4 = vector.load %arg4[%c4, %c0_4] : memref<12x128xf32, #tpu.memory_space<vmem>>, vector<1x32xf32>
    %c5 = arith.constant 5 : index
    %c0_5 = arith.constant 0 : index
    %5 = vector.load %arg4[%c5, %c0_5] : memref<12x128xf32, #tpu.memory_space<vmem>>, vector<1x32xf32>
    %c6 = arith.constant 6 : index
    %c0_6 = arith.constant 0 : index
    %6 = vector.load %arg4[%c6, %c0_6] : memref<12x128xf32, #tpu.memory_space<vmem>>, vector<1x32xf32>
    %c7 = arith.constant 7 : index
    %c0_7 = arith.constant 0 : index
    %7 = vector.load %arg4[%c7, %c0_7] : memref<12x128xf32, #tpu.memory_space<vmem>>, vector<1x32xf32>
    %c8 = arith.constant 8 : index
    %c0_8 = arith.constant 0 : index
    %8 = vector.load %arg4[%c8, %c0_8] : memref<12x128xf32, #tpu.memory_space<vmem>>, vector<1x64xf32>
    %c9 = arith.constant 9 : index
    %c0_9 = arith.constant 0 : index
    %9 = vector.load %arg4[%c9, %c0_9] : memref<12x128xf32, #tpu.memory_space<vmem>>, vector<1x32xf32>
    %c10 = arith.constant 10 : index
    %c0_10 = arith.constant 0 : index
    %10 = vector.load %arg4[%c10, %c0_10] : memref<12x128xf32, #tpu.memory_space<vmem>>, vector<1x32xf32>
    %c11 = arith.constant 11 : index
    %c0_11 = arith.constant 0 : index
    %11 = vector.load %arg4[%c11, %c0_11] : memref<12x128xf32, #tpu.memory_space<vmem>>, vector<1x32xf32>
    %c0_12 = arith.constant 0 : index
    %c0_13 = arith.constant 0 : index
    %12 = vector.load %arg0[%c0_12, %c0_13] : memref<14x32xf32, #tpu.memory_space<vmem>>, vector<14x32xf32>
    %cst = arith.constant dense<0.000000e+00> : vector<14xf32>
    %13 = vector.multi_reduction <add>, %12, %cst [1] : vector<14x32xf32> to vector<14xf32>
    %14 = vector.shape_cast %13 : vector<14xf32> to vector<14x1xf32>
    %cst_14 = arith.constant 3.200000e+01 : f32
    %15 = vector.broadcast %cst_14 : f32 to vector<14x1xf32>
    %16 = arith.divf %14, %15 : vector<14x1xf32>
    %17 = vector.broadcast %16 : vector<14x1xf32> to vector<14x32xf32>
    %18 = arith.subf %12, %17 : vector<14x32xf32>
    %19 = arith.mulf %18, %18 : vector<14x32xf32>
    %cst_15 = arith.constant dense<0.000000e+00> : vector<14xf32>
    %20 = vector.multi_reduction <add>, %19, %cst_15 [1] : vector<14x32xf32> to vector<14xf32>
    %21 = vector.shape_cast %20 : vector<14xf32> to vector<14x1xf32>
    %cst_16 = arith.constant 3.200000e+01 : f32
    %22 = vector.broadcast %cst_16 : f32 to vector<14x1xf32>
    %23 = arith.divf %21, %22 : vector<14x1xf32>
    %cst_17 = arith.constant 9.99999974E-6 : f32
    %24 = vector.broadcast %cst_17 : f32 to vector<14x1xf32>
    %25 = arith.addf %23, %24 : vector<14x1xf32>
    %26 = math.rsqrt %25 : vector<14x1xf32>
    %27 = vector.broadcast %26 : vector<14x1xf32> to vector<14x32xf32>
    %28 = arith.mulf %18, %27 : vector<14x32xf32>
    %29 = vector.broadcast %0 : vector<1x32xf32> to vector<14x32xf32>
    %30 = arith.mulf %28, %29 : vector<14x32xf32>
    %31 = vector.broadcast %1 : vector<1x32xf32> to vector<14x32xf32>
    %32 = arith.addf %30, %31 : vector<14x32xf32>
    %c0_18 = arith.constant 0 : index
    %c0_19 = arith.constant 0 : index
    %33 = vector.load %arg2[%c0_18, %c0_19] : memref<14x32xf32, #tpu.memory_space<vmem>>, vector<14x32xf32>
    %c0_20 = arith.constant 0 : index
    %c0_21 = arith.constant 0 : index
    %34 = vector.load %arg3[%c0_20, %c0_21] : memref<14x32xf32, #tpu.memory_space<vmem>>, vector<14x32xf32>
    %cst_22 = arith.constant 1.000000e-30 : f32
    %35 = vector.broadcast %cst_22 : f32 to vector<14x32xf32>
    %36 = arith.maximumf %33, %35 : vector<14x32xf32>
    %37 = tpu.reciprocal %36 {approx = true} : vector<14x32xf32> -> vector<14x32xf32>
    %cst_23 = arith.constant 0.000000e+00 : f32
    %38 = vector.broadcast %cst_23 : f32 to vector<14x32xf32>
    %39 = arith.cmpf ogt, %33, %38 : vector<14x32xf32>
    %40 = arith.mulf %34, %37 : vector<14x32xf32>
    %cst_24 = arith.constant 0.000000e+00 : f32
    %41 = vector.broadcast %cst_24 : f32 to vector<14x32xf32>
    %42 = arith.select %39, %40, %41 : vector<14x32xi1>, vector<14x32xf32>
    %c0_25 = arith.constant 0 : index
    %c96 = arith.constant 96 : index
    %43 = vector.load %arg1[%c0_25, %c96] : memref<14x128xf32, #tpu.memory_space<vmem>>, vector<14x32xf32>
    %44 = arith.truncf %42 : vector<14x32xf32> to vector<14x32xbf16>
    %c0_26 = arith.constant 0 : index
    %c0_27 = arith.constant 0 : index
    %45 = vector.load %arg5[%c0_26, %c0_27] : memref<32x32xbf16, #tpu.memory_space<vmem>>, vector<32x32xbf16>
    %cst_28 = arith.constant dense<0.000000e+00> : vector<14x32xf32>
    %46 = tpu.matmul %44, %45, %cst_28 {dimension_numbers = #tpu.dot_dimension_numbers<[1], [0], [0], [1], [0, 0, 1, 1], [], []>} : vector<14x32xbf16>, vector<32x32xbf16>, vector<14x32xf32> -> vector<14x32xf32>
    %47 = arith.truncf %32 : vector<14x32xf32> to vector<14x32xbf16>
    %c0_29 = arith.constant 0 : index
    %c0_30 = arith.constant 0 : index
    %48 = vector.load %arg6[%c0_29, %c0_30] : memref<32x32xbf16, #tpu.memory_space<vmem>>, vector<32x32xbf16>
    %cst_31 = arith.constant dense<0.000000e+00> : vector<14x32xf32>
    %49 = tpu.matmul %47, %48, %cst_31 {dimension_numbers = #tpu.dot_dimension_numbers<[1], [0], [0], [1], [0, 0, 1, 1], [], []>} : vector<14x32xbf16>, vector<32x32xbf16>, vector<14x32xf32> -> vector<14x32xf32>
    %50 = arith.addf %46, %49 : vector<14x32xf32>
    %51 = vector.broadcast %2 : vector<1x32xf32> to vector<14x32xf32>
    %52 = arith.addf %50, %51 : vector<14x32xf32>
    %53 = arith.negf %52 : vector<14x32xf32>
    %54 = math.exp %53 : vector<14x32xf32>
    %cst_32 = arith.constant 1.000000e+00 : f32
    %55 = vector.broadcast %cst_32 : f32 to vector<14x32xf32>
    %56 = arith.addf %55, %54 : vector<14x32xf32>
    %57 = arith.divf %55, %56 : vector<14x32xf32>
    %58 = arith.subf %43, %42 : vector<14x32xf32>
    %59 = arith.mulf %57, %58 : vector<14x32xf32>
    %60 = arith.addf %42, %59 : vector<14x32xf32>
    %61 = arith.truncf %60 : vector<14x32xf32> to vector<14x32xbf16>
    %c0_33 = arith.constant 0 : index
    %c0_34 = arith.constant 0 : index
    %62 = vector.load %arg7[%c0_33, %c0_34] : memref<32x32xbf16, #tpu.memory_space<vmem>>, vector<32x32xbf16>
    %cst_35 = arith.constant dense<0.000000e+00> : vector<14x32xf32>
    %63 = tpu.matmul %61, %62, %cst_35 {dimension_numbers = #tpu.dot_dimension_numbers<[1], [0], [0], [1], [0, 0, 1, 1], [], []>} : vector<14x32xbf16>, vector<32x32xbf16>, vector<14x32xf32> -> vector<14x32xf32>
    %64 = vector.broadcast %3 : vector<1x32xf32> to vector<14x32xf32>
    %65 = arith.addf %63, %64 : vector<14x32xf32>
    %cst_36 = arith.constant dense<0.000000e+00> : vector<14xf32>
    %66 = vector.multi_reduction <add>, %65, %cst_36 [1] : vector<14x32xf32> to vector<14xf32>
    %67 = vector.shape_cast %66 : vector<14xf32> to vector<14x1xf32>
    %cst_37 = arith.constant 3.200000e+01 : f32
    %68 = vector.broadcast %cst_37 : f32 to vector<14x1xf32>
    %69 = arith.divf %67, %68 : vector<14x1xf32>
    %70 = vector.broadcast %69 : vector<14x1xf32> to vector<14x32xf32>
    %71 = arith.subf %65, %70 : vector<14x32xf32>
    %72 = arith.mulf %71, %71 : vector<14x32xf32>
    %cst_38 = arith.constant dense<0.000000e+00> : vector<14xf32>
    %73 = vector.multi_reduction <add>, %72, %cst_38 [1] : vector<14x32xf32> to vector<14xf32>
    %74 = vector.shape_cast %73 : vector<14xf32> to vector<14x1xf32>
    %cst_39 = arith.constant 3.200000e+01 : f32
    %75 = vector.broadcast %cst_39 : f32 to vector<14x1xf32>
    %76 = arith.divf %74, %75 : vector<14x1xf32>
    %cst_40 = arith.constant 9.99999974E-6 : f32
    %77 = vector.broadcast %cst_40 : f32 to vector<14x1xf32>
    %78 = arith.addf %76, %77 : vector<14x1xf32>
    %79 = math.rsqrt %78 : vector<14x1xf32>
    %80 = vector.broadcast %79 : vector<14x1xf32> to vector<14x32xf32>
    %81 = arith.mulf %71, %80 : vector<14x32xf32>
    %82 = vector.broadcast %4 : vector<1x32xf32> to vector<14x32xf32>
    %83 = arith.mulf %81, %82 : vector<14x32xf32>
    %84 = vector.broadcast %5 : vector<1x32xf32> to vector<14x32xf32>
    %85 = arith.addf %83, %84 : vector<14x32xf32>
    %86 = arith.addf %12, %85 : vector<14x32xf32>
    %cst_41 = arith.constant dense<0.000000e+00> : vector<14xf32>
    %87 = vector.multi_reduction <add>, %86, %cst_41 [1] : vector<14x32xf32> to vector<14xf32>
    %88 = vector.shape_cast %87 : vector<14xf32> to vector<14x1xf32>
    %cst_42 = arith.constant 3.200000e+01 : f32
    %89 = vector.broadcast %cst_42 : f32 to vector<14x1xf32>
    %90 = arith.divf %88, %89 : vector<14x1xf32>
    %91 = vector.broadcast %90 : vector<14x1xf32> to vector<14x32xf32>
    %92 = arith.subf %86, %91 : vector<14x32xf32>
    %93 = arith.mulf %92, %92 : vector<14x32xf32>
    %cst_43 = arith.constant dense<0.000000e+00> : vector<14xf32>
    %94 = vector.multi_reduction <add>, %93, %cst_43 [1] : vector<14x32xf32> to vector<14xf32>
    %95 = vector.shape_cast %94 : vector<14xf32> to vector<14x1xf32>
    %cst_44 = arith.constant 3.200000e+01 : f32
    %96 = vector.broadcast %cst_44 : f32 to vector<14x1xf32>
    %97 = arith.divf %95, %96 : vector<14x1xf32>
    %cst_45 = arith.constant 9.99999974E-6 : f32
    %98 = vector.broadcast %cst_45 : f32 to vector<14x1xf32>
    %99 = arith.addf %97, %98 : vector<14x1xf32>
    %100 = math.rsqrt %99 : vector<14x1xf32>
    %101 = vector.broadcast %100 : vector<14x1xf32> to vector<14x32xf32>
    %102 = arith.mulf %92, %101 : vector<14x32xf32>
    %103 = vector.broadcast %6 : vector<1x32xf32> to vector<14x32xf32>
    %104 = arith.mulf %102, %103 : vector<14x32xf32>
    %105 = vector.broadcast %7 : vector<1x32xf32> to vector<14x32xf32>
    %106 = arith.addf %104, %105 : vector<14x32xf32>
    %107 = arith.truncf %106 : vector<14x32xf32> to vector<14x32xbf16>
    %c0_46 = arith.constant 0 : index
    %c0_47 = arith.constant 0 : index
    %108 = vector.load %arg8[%c0_46, %c0_47] : memref<32x64xbf16, #tpu.memory_space<vmem>>, vector<32x64xbf16>
    %cst_48 = arith.constant dense<0.000000e+00> : vector<14x64xf32>
    %109 = tpu.matmul %107, %108, %cst_48 {dimension_numbers = #tpu.dot_dimension_numbers<[1], [0], [0], [1], [0, 0, 1, 1], [], []>} : vector<14x32xbf16>, vector<32x64xbf16>, vector<14x64xf32> -> vector<14x64xf32>
    %110 = vector.broadcast %8 : vector<1x64xf32> to vector<14x64xf32>
    %111 = arith.addf %109, %110 : vector<14x64xf32>
    %cst_49 = arith.constant 0.000000e+00 : f32
    %112 = vector.broadcast %cst_49 : f32 to vector<14x64xf32>
    %113 = arith.maximumf %111, %112 : vector<14x64xf32>
    %114 = arith.truncf %113 : vector<14x64xf32> to vector<14x64xbf16>
    %c0_50 = arith.constant 0 : index
    %c0_51 = arith.constant 0 : index
    %115 = vector.load %arg9[%c0_50, %c0_51] : memref<64x32xbf16, #tpu.memory_space<vmem>>, vector<64x32xbf16>
    %cst_52 = arith.constant dense<0.000000e+00> : vector<14x32xf32>
    %116 = tpu.matmul %114, %115, %cst_52 {dimension_numbers = #tpu.dot_dimension_numbers<[1], [0], [0], [1], [0, 0, 1, 1], [], []>} : vector<14x64xbf16>, vector<64x32xbf16>, vector<14x32xf32> -> vector<14x32xf32>
    %117 = vector.broadcast %9 : vector<1x32xf32> to vector<14x32xf32>
    %118 = arith.addf %116, %117 : vector<14x32xf32>
    %cst_53 = arith.constant dense<0.000000e+00> : vector<14xf32>
    %119 = vector.multi_reduction <add>, %118, %cst_53 [1] : vector<14x32xf32> to vector<14xf32>
    %120 = vector.shape_cast %119 : vector<14xf32> to vector<14x1xf32>
    %cst_54 = arith.constant 3.200000e+01 : f32
    %121 = vector.broadcast %cst_54 : f32 to vector<14x1xf32>
    %122 = arith.divf %120, %121 : vector<14x1xf32>
    %123 = vector.broadcast %122 : vector<14x1xf32> to vector<14x32xf32>
    %124 = arith.subf %118, %123 : vector<14x32xf32>
    %125 = arith.mulf %124, %124 : vector<14x32xf32>
    %cst_55 = arith.constant dense<0.000000e+00> : vector<14xf32>
    %126 = vector.multi_reduction <add>, %125, %cst_55 [1] : vector<14x32xf32> to vector<14xf32>
    %127 = vector.shape_cast %126 : vector<14xf32> to vector<14x1xf32>
    %cst_56 = arith.constant 3.200000e+01 : f32
    %128 = vector.broadcast %cst_56 : f32 to vector<14x1xf32>
    %129 = arith.divf %127, %128 : vector<14x1xf32>
    %cst_57 = arith.constant 9.99999974E-6 : f32
    %130 = vector.broadcast %cst_57 : f32 to vector<14x1xf32>
    %131 = arith.addf %129, %130 : vector<14x1xf32>
    %132 = math.rsqrt %131 : vector<14x1xf32>
    %133 = vector.broadcast %132 : vector<14x1xf32> to vector<14x32xf32>
    %134 = arith.mulf %124, %133 : vector<14x32xf32>
    %135 = vector.broadcast %10 : vector<1x32xf32> to vector<14x32xf32>
    %136 = arith.mulf %134, %135 : vector<14x32xf32>
    %137 = vector.broadcast %11 : vector<1x32xf32> to vector<14x32xf32>
    %138 = arith.addf %136, %137 : vector<14x32xf32>
    %139 = arith.addf %86, %138 : vector<14x32xf32>
    %c0_58 = arith.constant 0 : index
    %c0_59 = arith.constant 0 : index
    %140 = vector.load %arg10[%c0_58, %c0_59] : memref<14x32xf32, #tpu.memory_space<vmem>>, vector<14x32xf32>
    tpu.vector_store %arg10[%c0_58, %c0_59], %139 {strides = array<i32>} : memref<14x32xf32, #tpu.memory_space<vmem>>, vector<14x32xf32>,
    return
  }
}

module attributes {stable_mosaic.version = 11 : i64} {
  func.func @kernel(%arg0: i32, %arg1: memref<2x14xi32, #tpu.memory_space<smem>>, %arg2: memref<1x1x128xf32, #tpu.memory_space<vmem>>, %arg3: memref<1x1x128xf32, #tpu.memory_space<vmem>>, %arg4: memref<32x32xf32, #tpu.memory_space<vmem>>, %arg5: memref<14x32xf32, #tpu.memory_space<vmem>>, %arg6: memref<14x32xf32, #tpu.memory_space<vmem>>, %arg7: memref<14x32xf32, #tpu.memory_space<vmem>>) attributes {dimension_semantics = [#tpu.dimension_semantics<arbitrary>], iteration_bounds = array<i64: 14>, scalar_prefetch = 1 : i64, scratch_operands = 1 : i64, tpu.core_type = #tpu.core_type<tc>, window_params = [{transform_indices = @transform_0, window_bounds = array<i64: 1, 1, 128>}, {transform_indices = @transform_1, window_bounds = array<i64: 1, 1, 128>}, {pipeline_mode = #tpu.pipeline_mode<synchronous>, transform_indices = @transform_2, window_bounds = array<i64: 32, 32>}, {pipeline_mode = #tpu.pipeline_mode<synchronous>, transform_indices = @transform_3, window_bounds = array<i64: 14, 32>}, {pipeline_mode = #tpu.pipeline_mode<synchronous>, transform_indices = @transform_4, window_bounds = array<i64: 14, 32>}]} {
    %c0_i32 = arith.constant 0 : i32
    %0 = arith.cmpi eq, %arg0, %c0_i32 : i32
    %1 = arith.extui %0 : i1 to i32
    %c0_i32_0 = arith.constant 0 : i32
    %2 = arith.cmpi ne, %1, %c0_i32_0 : i32
    scf.if %2 {
      %cst_14 = arith.constant -1.000000e+30 : f32
      %37 = vector.broadcast %cst_14 : f32 to vector<14x32xf32>
      %c0_15 = arith.constant 0 : index
      %c0_16 = arith.constant 0 : index
      %38 = vector.load %arg7[%c0_15, %c0_16] : memref<14x32xf32, #tpu.memory_space<vmem>>, vector<14x32xf32>
      tpu.vector_store %arg7[%c0_15, %c0_16], %37 {strides = array<i32>} : memref<14x32xf32, #tpu.memory_space<vmem>>, vector<14x32xf32>,
      %cst_17 = arith.constant 0.000000e+00 : f32
      %39 = vector.broadcast %cst_17 : f32 to vector<14x32xf32>
      %c0_18 = arith.constant 0 : index
      %c0_19 = arith.constant 0 : index
      %40 = vector.load %arg5[%c0_18, %c0_19] : memref<14x32xf32, #tpu.memory_space<vmem>>, vector<14x32xf32>
      tpu.vector_store %arg5[%c0_18, %c0_19], %39 {strides = array<i32>} : memref<14x32xf32, #tpu.memory_space<vmem>>, vector<14x32xf32>,
      %cst_20 = arith.constant 0.000000e+00 : f32
      %41 = vector.broadcast %cst_20 : f32 to vector<14x32xf32>
      %c0_21 = arith.constant 0 : index
      %c0_22 = arith.constant 0 : index
      %42 = vector.load %arg6[%c0_21, %c0_22] : memref<14x32xf32, #tpu.memory_space<vmem>>, vector<14x32xf32>
      tpu.vector_store %arg6[%c0_21, %c0_22], %41 {strides = array<i32>} : memref<14x32xf32, #tpu.memory_space<vmem>>, vector<14x32xf32>,
    } else {
    }
    %c1 = arith.constant 1 : index
    %3 = arith.index_cast %arg0 : i32 to index
    %4 = memref.load %arg1[%c1, %3] : memref<2x14xi32, #tpu.memory_space<smem>>
    %c0 = arith.constant 0 : index
    %c0_1 = arith.constant 0 : index
    %c0_2 = arith.constant 0 : index
    %5 = vector.load %arg2[%c0, %c0_1, %c0_2] : memref<1x1x128xf32, #tpu.memory_space<vmem>>, vector<1x1x128xf32>
    %6 = vector.shape_cast %5 : vector<1x1x128xf32> to vector<1x128xf32>
    %c0_3 = arith.constant 0 : index
    %c0_4 = arith.constant 0 : index
    %c0_5 = arith.constant 0 : index
    %7 = vector.load %arg3[%c0_3, %c0_4, %c0_5] : memref<1x1x128xf32, #tpu.memory_space<vmem>>, vector<1x1x128xf32>
    %8 = vector.shape_cast %7 : vector<1x1x128xf32> to vector<1x128xf32>
    %9 = vector.extract_strided_slice %6 {offsets = [0, 0], sizes = [1, 32], strides = [1, 1]} : vector<1x128xf32> to vector<1x32xf32>
    %10 = vector.extract_strided_slice %8 {offsets = [0, 32], sizes = [1, 32], strides = [1, 1]} : vector<1x128xf32> to vector<1x32xf32>
    %11 = vector.extract_strided_slice %8 {offsets = [0, 64], sizes = [1, 32], strides = [1, 1]} : vector<1x128xf32> to vector<1x32xf32>
    %12 = arith.mulf %9, %10 : vector<1x32xf32>
    %c0_6 = arith.constant 0 : index
    %c0_7 = arith.constant 0 : index
    %13 = vector.load %arg4[%c0_6, %c0_7] : memref<32x32xf32, #tpu.memory_space<vmem>>, vector<32x32xf32>
    %cst = arith.constant dense<0.000000e+00> : vector<1x32xf32>
    %14 = tpu.matmul %12, %13, %cst {dimension_numbers = #tpu.dot_dimension_numbers<[1], [0], [0], [1], [0, 0, 1, 1], [], []>} : vector<1x32xf32>, vector<32x32xf32>, vector<1x32xf32> -> vector<1x32xf32>
    %15 = arith.index_cast %4 : i32 to index
    %c0_8 = arith.constant 0 : index
    %16 = vector.load %arg7[%15, %c0_8] : memref<14x32xf32, #tpu.memory_space<vmem>>, vector<1x32xf32>
    %17 = arith.maximumf %16, %14 : vector<1x32xf32>
    %18 = arith.subf %16, %17 : vector<1x32xf32>
    %19 = math.exp %18 : vector<1x32xf32>
    %20 = arith.subf %14, %17 : vector<1x32xf32>
    %21 = math.exp %20 : vector<1x32xf32>
    %22 = arith.index_cast %4 : i32 to index
    %c0_9 = arith.constant 0 : index
    %23 = vector.load %arg7[%22, %c0_9] : memref<14x32xf32, #tpu.memory_space<vmem>>, vector<1x32xf32>
    tpu.vector_store %arg7[%22, %c0_9], %17 {strides = array<i32>} : memref<14x32xf32, #tpu.memory_space<vmem>>, vector<1x32xf32>,
    %24 = arith.index_cast %4 : i32 to index
    %c0_10 = arith.constant 0 : index
    %25 = vector.load %arg5[%24, %c0_10] : memref<14x32xf32, #tpu.memory_space<vmem>>, vector<1x32xf32>
    %26 = arith.mulf %19, %25 : vector<1x32xf32>
    %27 = arith.addf %26, %21 : vector<1x32xf32>
    %28 = arith.index_cast %4 : i32 to index
    %c0_11 = arith.constant 0 : index
    %29 = vector.load %arg5[%28, %c0_11] : memref<14x32xf32, #tpu.memory_space<vmem>>, vector<1x32xf32>
    tpu.vector_store %arg5[%28, %c0_11], %27 {strides = array<i32>} : memref<14x32xf32, #tpu.memory_space<vmem>>, vector<1x32xf32>,
    %30 = arith.index_cast %4 : i32 to index
    %c0_12 = arith.constant 0 : index
    %31 = vector.load %arg6[%30, %c0_12] : memref<14x32xf32, #tpu.memory_space<vmem>>, vector<1x32xf32>
    %32 = arith.mulf %19, %31 : vector<1x32xf32>
    %33 = arith.mulf %21, %11 : vector<1x32xf32>
    %34 = arith.addf %32, %33 : vector<1x32xf32>
    %35 = arith.index_cast %4 : i32 to index
    %c0_13 = arith.constant 0 : index
    %36 = vector.load %arg6[%35, %c0_13] : memref<14x32xf32, #tpu.memory_space<vmem>>, vector<1x32xf32>
    tpu.vector_store %arg6[%35, %c0_13], %34 {strides = array<i32>} : memref<14x32xf32, #tpu.memory_space<vmem>>, vector<1x32xf32>,
    return
  }
  func.func @transform_0(%arg0: i32, %arg1: memref<2x14xi32, #tpu.memory_space<smem>>) -> (i32, i32, i32) {
    %c1 = arith.constant 1 : index
    %0 = arith.index_cast %arg0 : i32 to index
    %1 = memref.load %arg1[%c1, %0] : memref<2x14xi32, #tpu.memory_space<smem>>
    %c0_i32 = arith.constant 0 : i32
    %c0_i32_0 = arith.constant 0 : i32
    %c0_i32_1 = arith.constant 0 : i32
    return %1, %c0_i32, %c0_i32_0 : i32, i32, i32
  }
  func.func @transform_1(%arg0: i32, %arg1: memref<2x14xi32, #tpu.memory_space<smem>>) -> (i32, i32, i32) {
    %c0 = arith.constant 0 : index
    %0 = arith.index_cast %arg0 : i32 to index
    %1 = memref.load %arg1[%c0, %0] : memref<2x14xi32, #tpu.memory_space<smem>>
    %c0_i32 = arith.constant 0 : i32
    %c0_i32_0 = arith.constant 0 : i32
    %c0_i32_1 = arith.constant 0 : i32
    return %1, %c0_i32, %c0_i32_0 : i32, i32, i32
  }
  func.func @transform_2(%arg0: i32, %arg1: memref<2x14xi32, #tpu.memory_space<smem>>) -> (i32, i32) {
    %c0_i32 = arith.constant 0 : i32
    %c0_i32_0 = arith.constant 0 : i32
    %c0_i32_1 = arith.constant 0 : i32
    return %c0_i32, %c0_i32_0 : i32, i32
  }
  func.func @transform_3(%arg0: i32, %arg1: memref<2x14xi32, #tpu.memory_space<smem>>) -> (i32, i32) {
    %c0_i32 = arith.constant 0 : i32
    %c0_i32_0 = arith.constant 0 : i32
    %c0_i32_1 = arith.constant 0 : i32
    return %c0_i32, %c0_i32_0 : i32, i32
  }
  func.func @transform_4(%arg0: i32, %arg1: memref<2x14xi32, #tpu.memory_space<smem>>) -> (i32, i32) {
    %c0_i32 = arith.constant 0 : i32
    %c0_i32_0 = arith.constant 0 : i32
    %c0_i32_1 = arith.constant 0 : i32
    return %c0_i32, %c0_i32_0 : i32, i32
  }
}

module attributes {stable_mosaic.version = 11 : i64} {
  func.func @kernel(%arg0: memref<6x32xf32, #tpu.memory_space<vmem>>, %arg1: memref<3x128xf32, #tpu.memory_space<vmem>>, %arg2: memref<32x128xbf16, #tpu.memory_space<vmem>>, %arg3: memref<6x128xf32, #tpu.memory_space<vmem>>) attributes {dimension_semantics = [], scalar_prefetch = 0 : i64, scratch_operands = 0 : i64, tpu.core_type = #tpu.core_type<tc>} {
    %c0 = arith.constant 0 : index
    %c0_0 = arith.constant 0 : index
    %0 = vector.load %arg1[%c0, %c0_0] : memref<3x128xf32, #tpu.memory_space<vmem>>, vector<1x32xf32>
    %c1 = arith.constant 1 : index
    %c0_1 = arith.constant 0 : index
    %1 = vector.load %arg1[%c1, %c0_1] : memref<3x128xf32, #tpu.memory_space<vmem>>, vector<1x32xf32>
    %c2 = arith.constant 2 : index
    %c0_2 = arith.constant 0 : index
    %2 = vector.load %arg1[%c2, %c0_2] : memref<3x128xf32, #tpu.memory_space<vmem>>, vector<1x128xf32>
    %c0_3 = arith.constant 0 : index
    %c0_4 = arith.constant 0 : index
    %3 = vector.load %arg0[%c0_3, %c0_4] : memref<6x32xf32, #tpu.memory_space<vmem>>, vector<6x32xf32>
    %cst = arith.constant dense<0.000000e+00> : vector<6xf32>
    %4 = vector.multi_reduction <add>, %3, %cst [1] : vector<6x32xf32> to vector<6xf32>
    %5 = vector.shape_cast %4 : vector<6xf32> to vector<6x1xf32>
    %cst_5 = arith.constant 3.200000e+01 : f32
    %6 = vector.broadcast %cst_5 : f32 to vector<6x1xf32>
    %7 = arith.divf %5, %6 : vector<6x1xf32>
    %8 = vector.broadcast %7 : vector<6x1xf32> to vector<6x32xf32>
    %9 = arith.subf %3, %8 : vector<6x32xf32>
    %10 = arith.mulf %9, %9 : vector<6x32xf32>
    %cst_6 = arith.constant dense<0.000000e+00> : vector<6xf32>
    %11 = vector.multi_reduction <add>, %10, %cst_6 [1] : vector<6x32xf32> to vector<6xf32>
    %12 = vector.shape_cast %11 : vector<6xf32> to vector<6x1xf32>
    %cst_7 = arith.constant 3.200000e+01 : f32
    %13 = vector.broadcast %cst_7 : f32 to vector<6x1xf32>
    %14 = arith.divf %12, %13 : vector<6x1xf32>
    %cst_8 = arith.constant 9.99999974E-6 : f32
    %15 = vector.broadcast %cst_8 : f32 to vector<6x1xf32>
    %16 = arith.addf %14, %15 : vector<6x1xf32>
    %17 = math.rsqrt %16 : vector<6x1xf32>
    %18 = vector.broadcast %17 : vector<6x1xf32> to vector<6x32xf32>
    %19 = arith.mulf %9, %18 : vector<6x32xf32>
    %20 = vector.broadcast %0 : vector<1x32xf32> to vector<6x32xf32>
    %21 = arith.mulf %19, %20 : vector<6x32xf32>
    %22 = vector.broadcast %1 : vector<1x32xf32> to vector<6x32xf32>
    %23 = arith.addf %21, %22 : vector<6x32xf32>
    %24 = arith.truncf %23 : vector<6x32xf32> to vector<6x32xbf16>
    %c0_9 = arith.constant 0 : index
    %c0_10 = arith.constant 0 : index
    %25 = vector.load %arg2[%c0_9, %c0_10] : memref<32x128xbf16, #tpu.memory_space<vmem>>, vector<32x128xbf16>
    %cst_11 = arith.constant dense<0.000000e+00> : vector<6x128xf32>
    %26 = tpu.matmul %24, %25, %cst_11 {dimension_numbers = #tpu.dot_dimension_numbers<[1], [0], [0], [1], [0, 0, 1, 1], [], []>} : vector<6x32xbf16>, vector<32x128xbf16>, vector<6x128xf32> -> vector<6x128xf32>
    %27 = vector.broadcast %2 : vector<1x128xf32> to vector<6x128xf32>
    %28 = arith.addf %26, %27 : vector<6x128xf32>
    %c0_12 = arith.constant 0 : index
    %c0_13 = arith.constant 0 : index
    %29 = vector.load %arg3[%c0_12, %c0_13] : memref<6x128xf32, #tpu.memory_space<vmem>>, vector<6x128xf32>
    tpu.vector_store %arg3[%c0_12, %c0_13], %28 {strides = array<i32>} : memref<6x128xf32, #tpu.memory_space<vmem>>, vector<6x128xf32>,
    return
  }
}

module attributes {stable_mosaic.version = 11 : i64} {
  func.func @kernel(%arg0: i32, %arg1: memref<2x10xi32, #tpu.memory_space<smem>>, %arg2: memref<1x1x128xf32, #tpu.memory_space<vmem>>, %arg3: memref<1x1x128xf32, #tpu.memory_space<vmem>>, %arg4: memref<32x32xf32, #tpu.memory_space<vmem>>, %arg5: memref<6x32xf32, #tpu.memory_space<vmem>>, %arg6: memref<6x32xf32, #tpu.memory_space<vmem>>, %arg7: memref<6x32xf32, #tpu.memory_space<vmem>>) attributes {dimension_semantics = [#tpu.dimension_semantics<arbitrary>], iteration_bounds = array<i64: 10>, scalar_prefetch = 1 : i64, scratch_operands = 1 : i64, tpu.core_type = #tpu.core_type<tc>, window_params = [{transform_indices = @transform_0, window_bounds = array<i64: 1, 1, 128>}, {transform_indices = @transform_1, window_bounds = array<i64: 1, 1, 128>}, {pipeline_mode = #tpu.pipeline_mode<synchronous>, transform_indices = @transform_2, window_bounds = array<i64: 32, 32>}, {pipeline_mode = #tpu.pipeline_mode<synchronous>, transform_indices = @transform_3, window_bounds = array<i64: 6, 32>}, {pipeline_mode = #tpu.pipeline_mode<synchronous>, transform_indices = @transform_4, window_bounds = array<i64: 6, 32>}]} {
    %c0_i32 = arith.constant 0 : i32
    %0 = arith.cmpi eq, %arg0, %c0_i32 : i32
    %1 = arith.extui %0 : i1 to i32
    %c0_i32_0 = arith.constant 0 : i32
    %2 = arith.cmpi ne, %1, %c0_i32_0 : i32
    scf.if %2 {
      %cst_14 = arith.constant -1.000000e+30 : f32
      %37 = vector.broadcast %cst_14 : f32 to vector<6x32xf32>
      %c0_15 = arith.constant 0 : index
      %c0_16 = arith.constant 0 : index
      %38 = vector.load %arg7[%c0_15, %c0_16] : memref<6x32xf32, #tpu.memory_space<vmem>>, vector<6x32xf32>
      tpu.vector_store %arg7[%c0_15, %c0_16], %37 {strides = array<i32>} : memref<6x32xf32, #tpu.memory_space<vmem>>, vector<6x32xf32>,
      %cst_17 = arith.constant 0.000000e+00 : f32
      %39 = vector.broadcast %cst_17 : f32 to vector<6x32xf32>
      %c0_18 = arith.constant 0 : index
      %c0_19 = arith.constant 0 : index
      %40 = vector.load %arg5[%c0_18, %c0_19] : memref<6x32xf32, #tpu.memory_space<vmem>>, vector<6x32xf32>
      tpu.vector_store %arg5[%c0_18, %c0_19], %39 {strides = array<i32>} : memref<6x32xf32, #tpu.memory_space<vmem>>, vector<6x32xf32>,
      %cst_20 = arith.constant 0.000000e+00 : f32
      %41 = vector.broadcast %cst_20 : f32 to vector<6x32xf32>
      %c0_21 = arith.constant 0 : index
      %c0_22 = arith.constant 0 : index
      %42 = vector.load %arg6[%c0_21, %c0_22] : memref<6x32xf32, #tpu.memory_space<vmem>>, vector<6x32xf32>
      tpu.vector_store %arg6[%c0_21, %c0_22], %41 {strides = array<i32>} : memref<6x32xf32, #tpu.memory_space<vmem>>, vector<6x32xf32>,
    } else {
    }
    %c1 = arith.constant 1 : index
    %3 = arith.index_cast %arg0 : i32 to index
    %4 = memref.load %arg1[%c1, %3] : memref<2x10xi32, #tpu.memory_space<smem>>
    %c0 = arith.constant 0 : index
    %c0_1 = arith.constant 0 : index
    %c0_2 = arith.constant 0 : index
    %5 = vector.load %arg2[%c0, %c0_1, %c0_2] : memref<1x1x128xf32, #tpu.memory_space<vmem>>, vector<1x1x128xf32>
    %6 = vector.shape_cast %5 : vector<1x1x128xf32> to vector<1x128xf32>
    %c0_3 = arith.constant 0 : index
    %c0_4 = arith.constant 0 : index
    %c0_5 = arith.constant 0 : index
    %7 = vector.load %arg3[%c0_3, %c0_4, %c0_5] : memref<1x1x128xf32, #tpu.memory_space<vmem>>, vector<1x1x128xf32>
    %8 = vector.shape_cast %7 : vector<1x1x128xf32> to vector<1x128xf32>
    %9 = vector.extract_strided_slice %6 {offsets = [0, 0], sizes = [1, 32], strides = [1, 1]} : vector<1x128xf32> to vector<1x32xf32>
    %10 = vector.extract_strided_slice %8 {offsets = [0, 32], sizes = [1, 32], strides = [1, 1]} : vector<1x128xf32> to vector<1x32xf32>
    %11 = vector.extract_strided_slice %8 {offsets = [0, 64], sizes = [1, 32], strides = [1, 1]} : vector<1x128xf32> to vector<1x32xf32>
    %12 = arith.mulf %9, %10 : vector<1x32xf32>
    %c0_6 = arith.constant 0 : index
    %c0_7 = arith.constant 0 : index
    %13 = vector.load %arg4[%c0_6, %c0_7] : memref<32x32xf32, #tpu.memory_space<vmem>>, vector<32x32xf32>
    %cst = arith.constant dense<0.000000e+00> : vector<1x32xf32>
    %14 = tpu.matmul %12, %13, %cst {dimension_numbers = #tpu.dot_dimension_numbers<[1], [0], [0], [1], [0, 0, 1, 1], [], []>} : vector<1x32xf32>, vector<32x32xf32>, vector<1x32xf32> -> vector<1x32xf32>
    %15 = arith.index_cast %4 : i32 to index
    %c0_8 = arith.constant 0 : index
    %16 = vector.load %arg7[%15, %c0_8] : memref<6x32xf32, #tpu.memory_space<vmem>>, vector<1x32xf32>
    %17 = arith.maximumf %16, %14 : vector<1x32xf32>
    %18 = arith.subf %16, %17 : vector<1x32xf32>
    %19 = math.exp %18 : vector<1x32xf32>
    %20 = arith.subf %14, %17 : vector<1x32xf32>
    %21 = math.exp %20 : vector<1x32xf32>
    %22 = arith.index_cast %4 : i32 to index
    %c0_9 = arith.constant 0 : index
    %23 = vector.load %arg7[%22, %c0_9] : memref<6x32xf32, #tpu.memory_space<vmem>>, vector<1x32xf32>
    tpu.vector_store %arg7[%22, %c0_9], %17 {strides = array<i32>} : memref<6x32xf32, #tpu.memory_space<vmem>>, vector<1x32xf32>,
    %24 = arith.index_cast %4 : i32 to index
    %c0_10 = arith.constant 0 : index
    %25 = vector.load %arg5[%24, %c0_10] : memref<6x32xf32, #tpu.memory_space<vmem>>, vector<1x32xf32>
    %26 = arith.mulf %19, %25 : vector<1x32xf32>
    %27 = arith.addf %26, %21 : vector<1x32xf32>
    %28 = arith.index_cast %4 : i32 to index
    %c0_11 = arith.constant 0 : index
    %29 = vector.load %arg5[%28, %c0_11] : memref<6x32xf32, #tpu.memory_space<vmem>>, vector<1x32xf32>
    tpu.vector_store %arg5[%28, %c0_11], %27 {strides = array<i32>} : memref<6x32xf32, #tpu.memory_space<vmem>>, vector<1x32xf32>,
    %30 = arith.index_cast %4 : i32 to index
    %c0_12 = arith.constant 0 : index
    %31 = vector.load %arg6[%30, %c0_12] : memref<6x32xf32, #tpu.memory_space<vmem>>, vector<1x32xf32>
    %32 = arith.mulf %19, %31 : vector<1x32xf32>
    %33 = arith.mulf %21, %11 : vector<1x32xf32>
    %34 = arith.addf %32, %33 : vector<1x32xf32>
    %35 = arith.index_cast %4 : i32 to index
    %c0_13 = arith.constant 0 : index
    %36 = vector.load %arg6[%35, %c0_13] : memref<6x32xf32, #tpu.memory_space<vmem>>, vector<1x32xf32>
    tpu.vector_store %arg6[%35, %c0_13], %34 {strides = array<i32>} : memref<6x32xf32, #tpu.memory_space<vmem>>, vector<1x32xf32>,
    return
  }
  func.func @transform_0(%arg0: i32, %arg1: memref<2x10xi32, #tpu.memory_space<smem>>) -> (i32, i32, i32) {
    %c1 = arith.constant 1 : index
    %0 = arith.index_cast %arg0 : i32 to index
    %1 = memref.load %arg1[%c1, %0] : memref<2x10xi32, #tpu.memory_space<smem>>
    %c0_i32 = arith.constant 0 : i32
    %c0_i32_0 = arith.constant 0 : i32
    %c0_i32_1 = arith.constant 0 : i32
    return %1, %c0_i32, %c0_i32_0 : i32, i32, i32
  }
  func.func @transform_1(%arg0: i32, %arg1: memref<2x10xi32, #tpu.memory_space<smem>>) -> (i32, i32, i32) {
    %c0 = arith.constant 0 : index
    %0 = arith.index_cast %arg0 : i32 to index
    %1 = memref.load %arg1[%c0, %0] : memref<2x10xi32, #tpu.memory_space<smem>>
    %c0_i32 = arith.constant 0 : i32
    %c0_i32_0 = arith.constant 0 : i32
    %c0_i32_1 = arith.constant 0 : i32
    return %1, %c0_i32, %c0_i32_0 : i32, i32, i32
  }
  func.func @transform_2(%arg0: i32, %arg1: memref<2x10xi32, #tpu.memory_space<smem>>) -> (i32, i32) {
    %c0_i32 = arith.constant 0 : i32
    %c0_i32_0 = arith.constant 0 : i32
    %c0_i32_1 = arith.constant 0 : i32
    return %c0_i32, %c0_i32_0 : i32, i32
  }
  func.func @transform_3(%arg0: i32, %arg1: memref<2x10xi32, #tpu.memory_space<smem>>) -> (i32, i32) {
    %c0_i32 = arith.constant 0 : i32
    %c0_i32_0 = arith.constant 0 : i32
    %c0_i32_1 = arith.constant 0 : i32
    return %c0_i32, %c0_i32_0 : i32, i32
  }
  func.func @transform_4(%arg0: i32, %arg1: memref<2x10xi32, #tpu.memory_space<smem>>) -> (i32, i32) {
    %c0_i32 = arith.constant 0 : i32
    %c0_i32_0 = arith.constant 0 : i32
    %c0_i32_1 = arith.constant 0 : i32
    return %c0_i32, %c0_i32_0 : i32, i32
  }
}

module attributes {stable_mosaic.version = 11 : i64} {
  func.func @kernel(%arg0: memref<6x32xf32, #tpu.memory_space<vmem>>, %arg1: memref<6x128xf32, #tpu.memory_space<vmem>>, %arg2: memref<6x32xf32, #tpu.memory_space<vmem>>, %arg3: memref<6x32xf32, #tpu.memory_space<vmem>>, %arg4: memref<12x128xf32, #tpu.memory_space<vmem>>, %arg5: memref<32x32xbf16, #tpu.memory_space<vmem>>, %arg6: memref<32x32xbf16, #tpu.memory_space<vmem>>, %arg7: memref<32x32xbf16, #tpu.memory_space<vmem>>, %arg8: memref<32x64xbf16, #tpu.memory_space<vmem>>, %arg9: memref<64x32xbf16, #tpu.memory_space<vmem>>, %arg10: memref<6x32xf32, #tpu.memory_space<vmem>>) attributes {dimension_semantics = [], scalar_prefetch = 0 : i64, scratch_operands = 0 : i64, tpu.core_type = #tpu.core_type<tc>} {
    %c0 = arith.constant 0 : index
    %c0_0 = arith.constant 0 : index
    %0 = vector.load %arg4[%c0, %c0_0] : memref<12x128xf32, #tpu.memory_space<vmem>>, vector<1x32xf32>
    %c1 = arith.constant 1 : index
    %c0_1 = arith.constant 0 : index
    %1 = vector.load %arg4[%c1, %c0_1] : memref<12x128xf32, #tpu.memory_space<vmem>>, vector<1x32xf32>
    %c2 = arith.constant 2 : index
    %c0_2 = arith.constant 0 : index
    %2 = vector.load %arg4[%c2, %c0_2] : memref<12x128xf32, #tpu.memory_space<vmem>>, vector<1x32xf32>
    %c3 = arith.constant 3 : index
    %c0_3 = arith.constant 0 : index
    %3 = vector.load %arg4[%c3, %c0_3] : memref<12x128xf32, #tpu.memory_space<vmem>>, vector<1x32xf32>
    %c4 = arith.constant 4 : index
    %c0_4 = arith.constant 0 : index
    %4 = vector.load %arg4[%c4, %c0_4] : memref<12x128xf32, #tpu.memory_space<vmem>>, vector<1x32xf32>
    %c5 = arith.constant 5 : index
    %c0_5 = arith.constant 0 : index
    %5 = vector.load %arg4[%c5, %c0_5] : memref<12x128xf32, #tpu.memory_space<vmem>>, vector<1x32xf32>
    %c6 = arith.constant 6 : index
    %c0_6 = arith.constant 0 : index
    %6 = vector.load %arg4[%c6, %c0_6] : memref<12x128xf32, #tpu.memory_space<vmem>>, vector<1x32xf32>
    %c7 = arith.constant 7 : index
    %c0_7 = arith.constant 0 : index
    %7 = vector.load %arg4[%c7, %c0_7] : memref<12x128xf32, #tpu.memory_space<vmem>>, vector<1x32xf32>
    %c8 = arith.constant 8 : index
    %c0_8 = arith.constant 0 : index
    %8 = vector.load %arg4[%c8, %c0_8] : memref<12x128xf32, #tpu.memory_space<vmem>>, vector<1x64xf32>
    %c9 = arith.constant 9 : index
    %c0_9 = arith.constant 0 : index
    %9 = vector.load %arg4[%c9, %c0_9] : memref<12x128xf32, #tpu.memory_space<vmem>>, vector<1x32xf32>
    %c10 = arith.constant 10 : index
    %c0_10 = arith.constant 0 : index
    %10 = vector.load %arg4[%c10, %c0_10] : memref<12x128xf32, #tpu.memory_space<vmem>>, vector<1x32xf32>
    %c11 = arith.constant 11 : index
    %c0_11 = arith.constant 0 : index
    %11 = vector.load %arg4[%c11, %c0_11] : memref<12x128xf32, #tpu.memory_space<vmem>>, vector<1x32xf32>
    %c0_12 = arith.constant 0 : index
    %c0_13 = arith.constant 0 : index
    %12 = vector.load %arg0[%c0_12, %c0_13] : memref<6x32xf32, #tpu.memory_space<vmem>>, vector<6x32xf32>
    %cst = arith.constant dense<0.000000e+00> : vector<6xf32>
    %13 = vector.multi_reduction <add>, %12, %cst [1] : vector<6x32xf32> to vector<6xf32>
    %14 = vector.shape_cast %13 : vector<6xf32> to vector<6x1xf32>
    %cst_14 = arith.constant 3.200000e+01 : f32
    %15 = vector.broadcast %cst_14 : f32 to vector<6x1xf32>
    %16 = arith.divf %14, %15 : vector<6x1xf32>
    %17 = vector.broadcast %16 : vector<6x1xf32> to vector<6x32xf32>
    %18 = arith.subf %12, %17 : vector<6x32xf32>
    %19 = arith.mulf %18, %18 : vector<6x32xf32>
    %cst_15 = arith.constant dense<0.000000e+00> : vector<6xf32>
    %20 = vector.multi_reduction <add>, %19, %cst_15 [1] : vector<6x32xf32> to vector<6xf32>
    %21 = vector.shape_cast %20 : vector<6xf32> to vector<6x1xf32>
    %cst_16 = arith.constant 3.200000e+01 : f32
    %22 = vector.broadcast %cst_16 : f32 to vector<6x1xf32>
    %23 = arith.divf %21, %22 : vector<6x1xf32>
    %cst_17 = arith.constant 9.99999974E-6 : f32
    %24 = vector.broadcast %cst_17 : f32 to vector<6x1xf32>
    %25 = arith.addf %23, %24 : vector<6x1xf32>
    %26 = math.rsqrt %25 : vector<6x1xf32>
    %27 = vector.broadcast %26 : vector<6x1xf32> to vector<6x32xf32>
    %28 = arith.mulf %18, %27 : vector<6x32xf32>
    %29 = vector.broadcast %0 : vector<1x32xf32> to vector<6x32xf32>
    %30 = arith.mulf %28, %29 : vector<6x32xf32>
    %31 = vector.broadcast %1 : vector<1x32xf32> to vector<6x32xf32>
    %32 = arith.addf %30, %31 : vector<6x32xf32>
    %c0_18 = arith.constant 0 : index
    %c0_19 = arith.constant 0 : index
    %33 = vector.load %arg2[%c0_18, %c0_19] : memref<6x32xf32, #tpu.memory_space<vmem>>, vector<6x32xf32>
    %c0_20 = arith.constant 0 : index
    %c0_21 = arith.constant 0 : index
    %34 = vector.load %arg3[%c0_20, %c0_21] : memref<6x32xf32, #tpu.memory_space<vmem>>, vector<6x32xf32>
    %cst_22 = arith.constant 1.000000e-30 : f32
    %35 = vector.broadcast %cst_22 : f32 to vector<6x32xf32>
    %36 = arith.maximumf %33, %35 : vector<6x32xf32>
    %37 = tpu.reciprocal %36 {approx = true} : vector<6x32xf32> -> vector<6x32xf32>
    %cst_23 = arith.constant 0.000000e+00 : f32
    %38 = vector.broadcast %cst_23 : f32 to vector<6x32xf32>
    %39 = arith.cmpf ogt, %33, %38 : vector<6x32xf32>
    %40 = arith.mulf %34, %37 : vector<6x32xf32>
    %cst_24 = arith.constant 0.000000e+00 : f32
    %41 = vector.broadcast %cst_24 : f32 to vector<6x32xf32>
    %42 = arith.select %39, %40, %41 : vector<6x32xi1>, vector<6x32xf32>
    %c0_25 = arith.constant 0 : index
    %c96 = arith.constant 96 : index
    %43 = vector.load %arg1[%c0_25, %c96] : memref<6x128xf32, #tpu.memory_space<vmem>>, vector<6x32xf32>
    %44 = arith.truncf %42 : vector<6x32xf32> to vector<6x32xbf16>
    %c0_26 = arith.constant 0 : index
    %c0_27 = arith.constant 0 : index
    %45 = vector.load %arg5[%c0_26, %c0_27] : memref<32x32xbf16, #tpu.memory_space<vmem>>, vector<32x32xbf16>
    %cst_28 = arith.constant dense<0.000000e+00> : vector<6x32xf32>
    %46 = tpu.matmul %44, %45, %cst_28 {dimension_numbers = #tpu.dot_dimension_numbers<[1], [0], [0], [1], [0, 0, 1, 1], [], []>} : vector<6x32xbf16>, vector<32x32xbf16>, vector<6x32xf32> -> vector<6x32xf32>
    %47 = arith.truncf %32 : vector<6x32xf32> to vector<6x32xbf16>
    %c0_29 = arith.constant 0 : index
    %c0_30 = arith.constant 0 : index
    %48 = vector.load %arg6[%c0_29, %c0_30] : memref<32x32xbf16, #tpu.memory_space<vmem>>, vector<32x32xbf16>
    %cst_31 = arith.constant dense<0.000000e+00> : vector<6x32xf32>
    %49 = tpu.matmul %47, %48, %cst_31 {dimension_numbers = #tpu.dot_dimension_numbers<[1], [0], [0], [1], [0, 0, 1, 1], [], []>} : vector<6x32xbf16>, vector<32x32xbf16>, vector<6x32xf32> -> vector<6x32xf32>
    %50 = arith.addf %46, %49 : vector<6x32xf32>
    %51 = vector.broadcast %2 : vector<1x32xf32> to vector<6x32xf32>
    %52 = arith.addf %50, %51 : vector<6x32xf32>
    %53 = arith.negf %52 : vector<6x32xf32>
    %54 = math.exp %53 : vector<6x32xf32>
    %cst_32 = arith.constant 1.000000e+00 : f32
    %55 = vector.broadcast %cst_32 : f32 to vector<6x32xf32>
    %56 = arith.addf %55, %54 : vector<6x32xf32>
    %57 = arith.divf %55, %56 : vector<6x32xf32>
    %58 = arith.subf %43, %42 : vector<6x32xf32>
    %59 = arith.mulf %57, %58 : vector<6x32xf32>
    %60 = arith.addf %42, %59 : vector<6x32xf32>
    %61 = arith.truncf %60 : vector<6x32xf32> to vector<6x32xbf16>
    %c0_33 = arith.constant 0 : index
    %c0_34 = arith.constant 0 : index
    %62 = vector.load %arg7[%c0_33, %c0_34] : memref<32x32xbf16, #tpu.memory_space<vmem>>, vector<32x32xbf16>
    %cst_35 = arith.constant dense<0.000000e+00> : vector<6x32xf32>
    %63 = tpu.matmul %61, %62, %cst_35 {dimension_numbers = #tpu.dot_dimension_numbers<[1], [0], [0], [1], [0, 0, 1, 1], [], []>} : vector<6x32xbf16>, vector<32x32xbf16>, vector<6x32xf32> -> vector<6x32xf32>
    %64 = vector.broadcast %3 : vector<1x32xf32> to vector<6x32xf32>
    %65 = arith.addf %63, %64 : vector<6x32xf32>
    %cst_36 = arith.constant dense<0.000000e+00> : vector<6xf32>
    %66 = vector.multi_reduction <add>, %65, %cst_36 [1] : vector<6x32xf32> to vector<6xf32>
    %67 = vector.shape_cast %66 : vector<6xf32> to vector<6x1xf32>
    %cst_37 = arith.constant 3.200000e+01 : f32
    %68 = vector.broadcast %cst_37 : f32 to vector<6x1xf32>
    %69 = arith.divf %67, %68 : vector<6x1xf32>
    %70 = vector.broadcast %69 : vector<6x1xf32> to vector<6x32xf32>
    %71 = arith.subf %65, %70 : vector<6x32xf32>
    %72 = arith.mulf %71, %71 : vector<6x32xf32>
    %cst_38 = arith.constant dense<0.000000e+00> : vector<6xf32>
    %73 = vector.multi_reduction <add>, %72, %cst_38 [1] : vector<6x32xf32> to vector<6xf32>
    %74 = vector.shape_cast %73 : vector<6xf32> to vector<6x1xf32>
    %cst_39 = arith.constant 3.200000e+01 : f32
    %75 = vector.broadcast %cst_39 : f32 to vector<6x1xf32>
    %76 = arith.divf %74, %75 : vector<6x1xf32>
    %cst_40 = arith.constant 9.99999974E-6 : f32
    %77 = vector.broadcast %cst_40 : f32 to vector<6x1xf32>
    %78 = arith.addf %76, %77 : vector<6x1xf32>
    %79 = math.rsqrt %78 : vector<6x1xf32>
    %80 = vector.broadcast %79 : vector<6x1xf32> to vector<6x32xf32>
    %81 = arith.mulf %71, %80 : vector<6x32xf32>
    %82 = vector.broadcast %4 : vector<1x32xf32> to vector<6x32xf32>
    %83 = arith.mulf %81, %82 : vector<6x32xf32>
    %84 = vector.broadcast %5 : vector<1x32xf32> to vector<6x32xf32>
    %85 = arith.addf %83, %84 : vector<6x32xf32>
    %86 = arith.addf %12, %85 : vector<6x32xf32>
    %cst_41 = arith.constant dense<0.000000e+00> : vector<6xf32>
    %87 = vector.multi_reduction <add>, %86, %cst_41 [1] : vector<6x32xf32> to vector<6xf32>
    %88 = vector.shape_cast %87 : vector<6xf32> to vector<6x1xf32>
    %cst_42 = arith.constant 3.200000e+01 : f32
    %89 = vector.broadcast %cst_42 : f32 to vector<6x1xf32>
    %90 = arith.divf %88, %89 : vector<6x1xf32>
    %91 = vector.broadcast %90 : vector<6x1xf32> to vector<6x32xf32>
    %92 = arith.subf %86, %91 : vector<6x32xf32>
    %93 = arith.mulf %92, %92 : vector<6x32xf32>
    %cst_43 = arith.constant dense<0.000000e+00> : vector<6xf32>
    %94 = vector.multi_reduction <add>, %93, %cst_43 [1] : vector<6x32xf32> to vector<6xf32>
    %95 = vector.shape_cast %94 : vector<6xf32> to vector<6x1xf32>
    %cst_44 = arith.constant 3.200000e+01 : f32
    %96 = vector.broadcast %cst_44 : f32 to vector<6x1xf32>
    %97 = arith.divf %95, %96 : vector<6x1xf32>
    %cst_45 = arith.constant 9.99999974E-6 : f32
    %98 = vector.broadcast %cst_45 : f32 to vector<6x1xf32>
    %99 = arith.addf %97, %98 : vector<6x1xf32>
    %100 = math.rsqrt %99 : vector<6x1xf32>
    %101 = vector.broadcast %100 : vector<6x1xf32> to vector<6x32xf32>
    %102 = arith.mulf %92, %101 : vector<6x32xf32>
    %103 = vector.broadcast %6 : vector<1x32xf32> to vector<6x32xf32>
    %104 = arith.mulf %102, %103 : vector<6x32xf32>
    %105 = vector.broadcast %7 : vector<1x32xf32> to vector<6x32xf32>
    %106 = arith.addf %104, %105 : vector<6x32xf32>
    %107 = arith.truncf %106 : vector<6x32xf32> to vector<6x32xbf16>
    %c0_46 = arith.constant 0 : index
    %c0_47 = arith.constant 0 : index
    %108 = vector.load %arg8[%c0_46, %c0_47] : memref<32x64xbf16, #tpu.memory_space<vmem>>, vector<32x64xbf16>
    %cst_48 = arith.constant dense<0.000000e+00> : vector<6x64xf32>
    %109 = tpu.matmul %107, %108, %cst_48 {dimension_numbers = #tpu.dot_dimension_numbers<[1], [0], [0], [1], [0, 0, 1, 1], [], []>} : vector<6x32xbf16>, vector<32x64xbf16>, vector<6x64xf32> -> vector<6x64xf32>
    %110 = vector.broadcast %8 : vector<1x64xf32> to vector<6x64xf32>
    %111 = arith.addf %109, %110 : vector<6x64xf32>
    %cst_49 = arith.constant 0.000000e+00 : f32
    %112 = vector.broadcast %cst_49 : f32 to vector<6x64xf32>
    %113 = arith.maximumf %111, %112 : vector<6x64xf32>
    %114 = arith.truncf %113 : vector<6x64xf32> to vector<6x64xbf16>
    %c0_50 = arith.constant 0 : index
    %c0_51 = arith.constant 0 : index
    %115 = vector.load %arg9[%c0_50, %c0_51] : memref<64x32xbf16, #tpu.memory_space<vmem>>, vector<64x32xbf16>
    %cst_52 = arith.constant dense<0.000000e+00> : vector<6x32xf32>
    %116 = tpu.matmul %114, %115, %cst_52 {dimension_numbers = #tpu.dot_dimension_numbers<[1], [0], [0], [1], [0, 0, 1, 1], [], []>} : vector<6x64xbf16>, vector<64x32xbf16>, vector<6x32xf32> -> vector<6x32xf32>
    %117 = vector.broadcast %9 : vector<1x32xf32> to vector<6x32xf32>
    %118 = arith.addf %116, %117 : vector<6x32xf32>
    %cst_53 = arith.constant dense<0.000000e+00> : vector<6xf32>
    %119 = vector.multi_reduction <add>, %118, %cst_53 [1] : vector<6x32xf32> to vector<6xf32>
    %120 = vector.shape_cast %119 : vector<6xf32> to vector<6x1xf32>
    %cst_54 = arith.constant 3.200000e+01 : f32
    %121 = vector.broadcast %cst_54 : f32 to vector<6x1xf32>
    %122 = arith.divf %120, %121 : vector<6x1xf32>
    %123 = vector.broadcast %122 : vector<6x1xf32> to vector<6x32xf32>
    %124 = arith.subf %118, %123 : vector<6x32xf32>
    %125 = arith.mulf %124, %124 : vector<6x32xf32>
    %cst_55 = arith.constant dense<0.000000e+00> : vector<6xf32>
    %126 = vector.multi_reduction <add>, %125, %cst_55 [1] : vector<6x32xf32> to vector<6xf32>
    %127 = vector.shape_cast %126 : vector<6xf32> to vector<6x1xf32>
    %cst_56 = arith.constant 3.200000e+01 : f32
    %128 = vector.broadcast %cst_56 : f32 to vector<6x1xf32>
    %129 = arith.divf %127, %128 : vector<6x1xf32>
    %cst_57 = arith.constant 9.99999974E-6 : f32
    %130 = vector.broadcast %cst_57 : f32 to vector<6x1xf32>
    %131 = arith.addf %129, %130 : vector<6x1xf32>
    %132 = math.rsqrt %131 : vector<6x1xf32>
    %133 = vector.broadcast %132 : vector<6x1xf32> to vector<6x32xf32>
    %134 = arith.mulf %124, %133 : vector<6x32xf32>
    %135 = vector.broadcast %10 : vector<1x32xf32> to vector<6x32xf32>
    %136 = arith.mulf %134, %135 : vector<6x32xf32>
    %137 = vector.broadcast %11 : vector<1x32xf32> to vector<6x32xf32>
    %138 = arith.addf %136, %137 : vector<6x32xf32>
    %139 = arith.addf %86, %138 : vector<6x32xf32>
    %c0_58 = arith.constant 0 : index
    %c0_59 = arith.constant 0 : index
    %140 = vector.load %arg10[%c0_58, %c0_59] : memref<6x32xf32, #tpu.memory_space<vmem>>, vector<6x32xf32>
    tpu.vector_store %arg10[%c0_58, %c0_59], %139 {strides = array<i32>} : memref<6x32xf32, #tpu.memory_space<vmem>>, vector<6x32xf32>,
    return
  }
}

module attributes {stable_mosaic.version = 11 : i64} {
  func.func @_gather_pair_kernel(%arg0: i32, %arg1: memref<2x12xi32, #tpu.memory_space<smem>>, %arg2: memref<1x1x32xf32, #tpu.memory_space<vmem>>, %arg3: memref<1x1x32xf32, #tpu.memory_space<vmem>>, %arg4: memref<1x1x32xf32, #tpu.memory_space<vmem>>, %arg5: memref<1x1x32xf32, #tpu.memory_space<vmem>>) attributes {dimension_semantics = [#tpu.dimension_semantics<parallel>], iteration_bounds = array<i64: 12>, scalar_prefetch = 1 : i64, scratch_operands = 0 : i64, tpu.core_type = #tpu.core_type<tc>, window_params = [{transform_indices = @transform_0, window_bounds = array<i64: 1, 1, 32>}, {transform_indices = @transform_1, window_bounds = array<i64: 1, 1, 32>}, {transform_indices = @transform_2, window_bounds = array<i64: 1, 1, 32>}, {transform_indices = @transform_3, window_bounds = array<i64: 1, 1, 32>}]} {
    %c0 = arith.constant 0 : index
    %c0_0 = arith.constant 0 : index
    %c0_1 = arith.constant 0 : index
    %0 = vector.load %arg2[%c0, %c0_0, %c0_1] : memref<1x1x32xf32, #tpu.memory_space<vmem>>, vector<1x1x32xf32>
    %c0_2 = arith.constant 0 : index
    %c0_3 = arith.constant 0 : index
    %c0_4 = arith.constant 0 : index
    %1 = vector.load %arg4[%c0_2, %c0_3, %c0_4] : memref<1x1x32xf32, #tpu.memory_space<vmem>>, vector<1x1x32xf32>
    tpu.vector_store %arg4[%c0_2, %c0_3, %c0_4], %0 {strides = array<i32>} : memref<1x1x32xf32, #tpu.memory_space<vmem>>, vector<1x1x32xf32>,
    %c0_5 = arith.constant 0 : index
    %c0_6 = arith.constant 0 : index
    %c0_7 = arith.constant 0 : index
    %2 = vector.load %arg3[%c0_5, %c0_6, %c0_7] : memref<1x1x32xf32, #tpu.memory_space<vmem>>, vector<1x1x32xf32>
    %c0_8 = arith.constant 0 : index
    %c0_9 = arith.constant 0 : index
    %c0_10 = arith.constant 0 : index
    %3 = vector.load %arg5[%c0_8, %c0_9, %c0_10] : memref<1x1x32xf32, #tpu.memory_space<vmem>>, vector<1x1x32xf32>
    tpu.vector_store %arg5[%c0_8, %c0_9, %c0_10], %2 {strides = array<i32>} : memref<1x1x32xf32, #tpu.memory_space<vmem>>, vector<1x1x32xf32>,
    return
  }
  func.func @transform_0(%arg0: i32, %arg1: memref<2x12xi32, #tpu.memory_space<smem>>) -> (i32, i32, i32) {
    %c1 = arith.constant 1 : index
    %0 = arith.index_cast %arg0 : i32 to index
    %1 = memref.load %arg1[%c1, %0] : memref<2x12xi32, #tpu.memory_space<smem>>
    %c0_i32 = arith.constant 0 : i32
    %c0_i32_0 = arith.constant 0 : i32
    %c0_i32_1 = arith.constant 0 : i32
    return %1, %c0_i32, %c0_i32_0 : i32, i32, i32
  }
  func.func @transform_1(%arg0: i32, %arg1: memref<2x12xi32, #tpu.memory_space<smem>>) -> (i32, i32, i32) {
    %c0 = arith.constant 0 : index
    %0 = arith.index_cast %arg0 : i32 to index
    %1 = memref.load %arg1[%c0, %0] : memref<2x12xi32, #tpu.memory_space<smem>>
    %c0_i32 = arith.constant 0 : i32
    %c0_i32_0 = arith.constant 0 : i32
    %c0_i32_1 = arith.constant 0 : i32
    return %1, %c0_i32, %c0_i32_0 : i32, i32, i32
  }
  func.func @transform_2(%arg0: i32, %arg1: memref<2x12xi32, #tpu.memory_space<smem>>) -> (i32, i32, i32) {
    %c0_i32 = arith.constant 0 : i32
    %c0_i32_0 = arith.constant 0 : i32
    %c0_i32_1 = arith.constant 0 : i32
    return %arg0, %c0_i32, %c0_i32_0 : i32, i32, i32
  }
  func.func @transform_3(%arg0: i32, %arg1: memref<2x12xi32, #tpu.memory_space<smem>>) -> (i32, i32, i32) {
    %c0_i32 = arith.constant 0 : i32
    %c0_i32_0 = arith.constant 0 : i32
    %c0_i32_1 = arith.constant 0 : i32
    return %arg0, %c0_i32, %c0_i32_0 : i32, i32, i32
  }
}

module attributes {stable_mosaic.version = 11 : i64} {
  func.func @kernel(%arg0: memref<12x32xf32, #tpu.memory_space<vmem>>, %arg1: memref<12x32xf32, #tpu.memory_space<vmem>>, %arg2: memref<12x16xf32, #tpu.memory_space<vmem>>, %arg3: memref<18x128xf32, #tpu.memory_space<vmem>>, %arg4: memref<32x16xbf16, #tpu.memory_space<vmem>>, %arg5: memref<32x16xbf16, #tpu.memory_space<vmem>>, %arg6: memref<16x16xbf16, #tpu.memory_space<vmem>>, %arg7: memref<32x16xbf16, #tpu.memory_space<vmem>>, %arg8: memref<32x16xbf16, #tpu.memory_space<vmem>>, %arg9: memref<16x16xbf16, #tpu.memory_space<vmem>>, %arg10: memref<16x16xbf16, #tpu.memory_space<vmem>>, %arg11: memref<16x16xbf16, #tpu.memory_space<vmem>>, %arg12: memref<16x16xbf16, #tpu.memory_space<vmem>>, %arg13: memref<16x16xbf16, #tpu.memory_space<vmem>>, %arg14: memref<12x16xf32, #tpu.memory_space<vmem>>) attributes {dimension_semantics = [], scalar_prefetch = 0 : i64, scratch_operands = 0 : i64, tpu.core_type = #tpu.core_type<tc>} {
    %c0 = arith.constant 0 : index
    %c0_0 = arith.constant 0 : index
    %0 = vector.load %arg0[%c0, %c0_0] : memref<12x32xf32, #tpu.memory_space<vmem>>, vector<12x32xf32>
    %c0_1 = arith.constant 0 : index
    %c0_2 = arith.constant 0 : index
    %1 = vector.load %arg1[%c0_1, %c0_2] : memref<12x32xf32, #tpu.memory_space<vmem>>, vector<12x32xf32>
    %c0_3 = arith.constant 0 : index
    %c0_4 = arith.constant 0 : index
    %2 = vector.load %arg3[%c0_3, %c0_4] : memref<18x128xf32, #tpu.memory_space<vmem>>, vector<1x16xf32>
    %c1 = arith.constant 1 : index
    %c0_5 = arith.constant 0 : index
    %3 = vector.load %arg3[%c1, %c0_5] : memref<18x128xf32, #tpu.memory_space<vmem>>, vector<1x16xf32>
    %c2 = arith.constant 2 : index
    %c0_6 = arith.constant 0 : index
    %4 = vector.load %arg3[%c2, %c0_6] : memref<18x128xf32, #tpu.memory_space<vmem>>, vector<1x16xf32>
    %c3 = arith.constant 3 : index
    %c0_7 = arith.constant 0 : index
    %5 = vector.load %arg3[%c3, %c0_7] : memref<18x128xf32, #tpu.memory_space<vmem>>, vector<1x16xf32>
    %c4 = arith.constant 4 : index
    %c0_8 = arith.constant 0 : index
    %6 = vector.load %arg3[%c4, %c0_8] : memref<18x128xf32, #tpu.memory_space<vmem>>, vector<1x16xf32>
    %c5 = arith.constant 5 : index
    %c0_9 = arith.constant 0 : index
    %7 = vector.load %arg3[%c5, %c0_9] : memref<18x128xf32, #tpu.memory_space<vmem>>, vector<1x16xf32>
    %c6 = arith.constant 6 : index
    %c0_10 = arith.constant 0 : index
    %8 = vector.load %arg3[%c6, %c0_10] : memref<18x128xf32, #tpu.memory_space<vmem>>, vector<1x16xf32>
    %c7 = arith.constant 7 : index
    %c0_11 = arith.constant 0 : index
    %9 = vector.load %arg3[%c7, %c0_11] : memref<18x128xf32, #tpu.memory_space<vmem>>, vector<1x16xf32>
    %c8 = arith.constant 8 : index
    %c0_12 = arith.constant 0 : index
    %10 = vector.load %arg3[%c8, %c0_12] : memref<18x128xf32, #tpu.memory_space<vmem>>, vector<1x16xf32>
    %11 = arith.truncf %0 : vector<12x32xf32> to vector<12x32xbf16>
    %c0_13 = arith.constant 0 : index
    %c0_14 = arith.constant 0 : index
    %12 = vector.load %arg4[%c0_13, %c0_14] : memref<32x16xbf16, #tpu.memory_space<vmem>>, vector<32x16xbf16>
    %cst = arith.constant dense<0.000000e+00> : vector<12x16xf32>
    %13 = tpu.matmul %11, %12, %cst {dimension_numbers = #tpu.dot_dimension_numbers<[1], [0], [0], [1], [0, 0, 1, 1], [], []>} : vector<12x32xbf16>, vector<32x16xbf16>, vector<12x16xf32> -> vector<12x16xf32>
    %14 = arith.truncf %1 : vector<12x32xf32> to vector<12x32xbf16>
    %c0_15 = arith.constant 0 : index
    %c0_16 = arith.constant 0 : index
    %15 = vector.load %arg5[%c0_15, %c0_16] : memref<32x16xbf16, #tpu.memory_space<vmem>>, vector<32x16xbf16>
    %cst_17 = arith.constant dense<0.000000e+00> : vector<12x16xf32>
    %16 = tpu.matmul %14, %15, %cst_17 {dimension_numbers = #tpu.dot_dimension_numbers<[1], [0], [0], [1], [0, 0, 1, 1], [], []>} : vector<12x32xbf16>, vector<32x16xbf16>, vector<12x16xf32> -> vector<12x16xf32>
    %17 = arith.addf %13, %16 : vector<12x16xf32>
    %18 = vector.broadcast %2 : vector<1x16xf32> to vector<12x16xf32>
    %19 = arith.addf %17, %18 : vector<12x16xf32>
    %cst_18 = arith.constant dense<0.000000e+00> : vector<12xf32>
    %20 = vector.multi_reduction <add>, %19, %cst_18 [1] : vector<12x16xf32> to vector<12xf32>
    %21 = vector.shape_cast %20 : vector<12xf32> to vector<12x1xf32>
    %cst_19 = arith.constant 1.600000e+01 : f32
    %22 = vector.broadcast %cst_19 : f32 to vector<12x1xf32>
    %23 = arith.divf %21, %22 : vector<12x1xf32>
    %24 = vector.broadcast %23 : vector<12x1xf32> to vector<12x16xf32>
    %25 = arith.subf %19, %24 : vector<12x16xf32>
    %26 = arith.mulf %25, %25 : vector<12x16xf32>
    %cst_20 = arith.constant dense<0.000000e+00> : vector<12xf32>
    %27 = vector.multi_reduction <add>, %26, %cst_20 [1] : vector<12x16xf32> to vector<12xf32>
    %28 = vector.shape_cast %27 : vector<12xf32> to vector<12x1xf32>
    %cst_21 = arith.constant 1.600000e+01 : f32
    %29 = vector.broadcast %cst_21 : f32 to vector<12x1xf32>
    %30 = arith.divf %28, %29 : vector<12x1xf32>
    %cst_22 = arith.constant 9.99999974E-6 : f32
    %31 = vector.broadcast %cst_22 : f32 to vector<12x1xf32>
    %32 = arith.addf %30, %31 : vector<12x1xf32>
    %33 = math.rsqrt %32 : vector<12x1xf32>
    %34 = vector.broadcast %33 : vector<12x1xf32> to vector<12x16xf32>
    %35 = arith.mulf %25, %34 : vector<12x16xf32>
    %36 = vector.broadcast %3 : vector<1x16xf32> to vector<12x16xf32>
    %37 = arith.mulf %35, %36 : vector<12x16xf32>
    %38 = vector.broadcast %4 : vector<1x16xf32> to vector<12x16xf32>
    %39 = arith.addf %37, %38 : vector<12x16xf32>
    %cst_23 = arith.constant 0.000000e+00 : f32
    %40 = vector.broadcast %cst_23 : f32 to vector<12x16xf32>
    %41 = arith.maximumf %39, %40 : vector<12x16xf32>
    %42 = arith.truncf %41 : vector<12x16xf32> to vector<12x16xbf16>
    %c0_24 = arith.constant 0 : index
    %c0_25 = arith.constant 0 : index
    %43 = vector.load %arg6[%c0_24, %c0_25] : memref<16x16xbf16, #tpu.memory_space<vmem>>, vector<16x16xbf16>
    %cst_26 = arith.constant dense<0.000000e+00> : vector<12x16xf32>
    %44 = tpu.matmul %42, %43, %cst_26 {dimension_numbers = #tpu.dot_dimension_numbers<[1], [0], [0], [1], [0, 0, 1, 1], [], []>} : vector<12x16xbf16>, vector<16x16xbf16>, vector<12x16xf32> -> vector<12x16xf32>
    %45 = vector.broadcast %5 : vector<1x16xf32> to vector<12x16xf32>
    %46 = arith.addf %44, %45 : vector<12x16xf32>
    %cst_27 = arith.constant dense<0.000000e+00> : vector<12xf32>
    %47 = vector.multi_reduction <add>, %46, %cst_27 [1] : vector<12x16xf32> to vector<12xf32>
    %48 = vector.shape_cast %47 : vector<12xf32> to vector<12x1xf32>
    %cst_28 = arith.constant 1.600000e+01 : f32
    %49 = vector.broadcast %cst_28 : f32 to vector<12x1xf32>
    %50 = arith.divf %48, %49 : vector<12x1xf32>
    %51 = vector.broadcast %50 : vector<12x1xf32> to vector<12x16xf32>
    %52 = arith.subf %46, %51 : vector<12x16xf32>
    %53 = arith.mulf %52, %52 : vector<12x16xf32>
    %cst_29 = arith.constant dense<0.000000e+00> : vector<12xf32>
    %54 = vector.multi_reduction <add>, %53, %cst_29 [1] : vector<12x16xf32> to vector<12xf32>
    %55 = vector.shape_cast %54 : vector<12xf32> to vector<12x1xf32>
    %cst_30 = arith.constant 1.600000e+01 : f32
    %56 = vector.broadcast %cst_30 : f32 to vector<12x1xf32>
    %57 = arith.divf %55, %56 : vector<12x1xf32>
    %cst_31 = arith.constant 9.99999974E-6 : f32
    %58 = vector.broadcast %cst_31 : f32 to vector<12x1xf32>
    %59 = arith.addf %57, %58 : vector<12x1xf32>
    %60 = math.rsqrt %59 : vector<12x1xf32>
    %61 = vector.broadcast %60 : vector<12x1xf32> to vector<12x16xf32>
    %62 = arith.mulf %52, %61 : vector<12x16xf32>
    %63 = vector.broadcast %6 : vector<1x16xf32> to vector<12x16xf32>
    %64 = arith.mulf %62, %63 : vector<12x16xf32>
    %65 = vector.broadcast %7 : vector<1x16xf32> to vector<12x16xf32>
    %66 = arith.addf %64, %65 : vector<12x16xf32>
    %67 = arith.truncf %0 : vector<12x32xf32> to vector<12x32xbf16>
    %c0_32 = arith.constant 0 : index
    %c0_33 = arith.constant 0 : index
    %68 = vector.load %arg7[%c0_32, %c0_33] : memref<32x16xbf16, #tpu.memory_space<vmem>>, vector<32x16xbf16>
    %cst_34 = arith.constant dense<0.000000e+00> : vector<12x16xf32>
    %69 = tpu.matmul %67, %68, %cst_34 {dimension_numbers = #tpu.dot_dimension_numbers<[1], [0], [0], [1], [0, 0, 1, 1], [], []>} : vector<12x32xbf16>, vector<32x16xbf16>, vector<12x16xf32> -> vector<12x16xf32>
    %70 = arith.truncf %1 : vector<12x32xf32> to vector<12x32xbf16>
    %c0_35 = arith.constant 0 : index
    %c0_36 = arith.constant 0 : index
    %71 = vector.load %arg8[%c0_35, %c0_36] : memref<32x16xbf16, #tpu.memory_space<vmem>>, vector<32x16xbf16>
    %cst_37 = arith.constant dense<0.000000e+00> : vector<12x16xf32>
    %72 = tpu.matmul %70, %71, %cst_37 {dimension_numbers = #tpu.dot_dimension_numbers<[1], [0], [0], [1], [0, 0, 1, 1], [], []>} : vector<12x32xbf16>, vector<32x16xbf16>, vector<12x16xf32> -> vector<12x16xf32>
    %73 = arith.addf %69, %72 : vector<12x16xf32>
    %74 = vector.broadcast %8 : vector<1x16xf32> to vector<12x16xf32>
    %75 = arith.addf %73, %74 : vector<12x16xf32>
    %cst_38 = arith.constant dense<0.000000e+00> : vector<12xf32>
    %76 = vector.multi_reduction <add>, %75, %cst_38 [1] : vector<12x16xf32> to vector<12xf32>
    %77 = vector.shape_cast %76 : vector<12xf32> to vector<12x1xf32>
    %cst_39 = arith.constant 1.600000e+01 : f32
    %78 = vector.broadcast %cst_39 : f32 to vector<12x1xf32>
    %79 = arith.divf %77, %78 : vector<12x1xf32>
    %80 = vector.broadcast %79 : vector<12x1xf32> to vector<12x16xf32>
    %81 = arith.subf %75, %80 : vector<12x16xf32>
    %82 = arith.mulf %81, %81 : vector<12x16xf32>
    %cst_40 = arith.constant dense<0.000000e+00> : vector<12xf32>
    %83 = vector.multi_reduction <add>, %82, %cst_40 [1] : vector<12x16xf32> to vector<12xf32>
    %84 = vector.shape_cast %83 : vector<12xf32> to vector<12x1xf32>
    %cst_41 = arith.constant 1.600000e+01 : f32
    %85 = vector.broadcast %cst_41 : f32 to vector<12x1xf32>
    %86 = arith.divf %84, %85 : vector<12x1xf32>
    %cst_42 = arith.constant 9.99999974E-6 : f32
    %87 = vector.broadcast %cst_42 : f32 to vector<12x1xf32>
    %88 = arith.addf %86, %87 : vector<12x1xf32>
    %89 = math.rsqrt %88 : vector<12x1xf32>
    %90 = vector.broadcast %89 : vector<12x1xf32> to vector<12x16xf32>
    %91 = arith.mulf %81, %90 : vector<12x16xf32>
    %92 = vector.broadcast %9 : vector<1x16xf32> to vector<12x16xf32>
    %93 = arith.mulf %91, %92 : vector<12x16xf32>
    %94 = vector.broadcast %10 : vector<1x16xf32> to vector<12x16xf32>
    %95 = arith.addf %93, %94 : vector<12x16xf32>
    %96 = arith.addf %66, %95 : vector<12x16xf32>
    %cst_43 = arith.constant 0.000000e+00 : f32
    %97 = vector.broadcast %cst_43 : f32 to vector<12x16xf32>
    %98 = arith.maximumf %96, %97 : vector<12x16xf32>
    %c0_44 = arith.constant 0 : index
    %c0_45 = arith.constant 0 : index
    %99 = vector.load %arg2[%c0_44, %c0_45] : memref<12x16xf32, #tpu.memory_space<vmem>>, vector<12x16xf32>
    %c9 = arith.constant 9 : index
    %c0_46 = arith.constant 0 : index
    %100 = vector.load %arg3[%c9, %c0_46] : memref<18x128xf32, #tpu.memory_space<vmem>>, vector<1x16xf32>
    %c10 = arith.constant 10 : index
    %c0_47 = arith.constant 0 : index
    %101 = vector.load %arg3[%c10, %c0_47] : memref<18x128xf32, #tpu.memory_space<vmem>>, vector<1x16xf32>
    %c11 = arith.constant 11 : index
    %c0_48 = arith.constant 0 : index
    %102 = vector.load %arg3[%c11, %c0_48] : memref<18x128xf32, #tpu.memory_space<vmem>>, vector<1x16xf32>
    %c12 = arith.constant 12 : index
    %c0_49 = arith.constant 0 : index
    %103 = vector.load %arg3[%c12, %c0_49] : memref<18x128xf32, #tpu.memory_space<vmem>>, vector<1x16xf32>
    %c13 = arith.constant 13 : index
    %c0_50 = arith.constant 0 : index
    %104 = vector.load %arg3[%c13, %c0_50] : memref<18x128xf32, #tpu.memory_space<vmem>>, vector<1x16xf32>
    %c14 = arith.constant 14 : index
    %c0_51 = arith.constant 0 : index
    %105 = vector.load %arg3[%c14, %c0_51] : memref<18x128xf32, #tpu.memory_space<vmem>>, vector<1x16xf32>
    %c15 = arith.constant 15 : index
    %c0_52 = arith.constant 0 : index
    %106 = vector.load %arg3[%c15, %c0_52] : memref<18x128xf32, #tpu.memory_space<vmem>>, vector<1x16xf32>
    %c16 = arith.constant 16 : index
    %c0_53 = arith.constant 0 : index
    %107 = vector.load %arg3[%c16, %c0_53] : memref<18x128xf32, #tpu.memory_space<vmem>>, vector<1x16xf32>
    %c17 = arith.constant 17 : index
    %c0_54 = arith.constant 0 : index
    %108 = vector.load %arg3[%c17, %c0_54] : memref<18x128xf32, #tpu.memory_space<vmem>>, vector<1x16xf32>
    %109 = arith.truncf %98 : vector<12x16xf32> to vector<12x16xbf16>
    %c0_55 = arith.constant 0 : index
    %c0_56 = arith.constant 0 : index
    %110 = vector.load %arg9[%c0_55, %c0_56] : memref<16x16xbf16, #tpu.memory_space<vmem>>, vector<16x16xbf16>
    %cst_57 = arith.constant dense<0.000000e+00> : vector<12x16xf32>
    %111 = tpu.matmul %109, %110, %cst_57 {dimension_numbers = #tpu.dot_dimension_numbers<[1], [0], [0], [1], [0, 0, 1, 1], [], []>} : vector<12x16xbf16>, vector<16x16xbf16>, vector<12x16xf32> -> vector<12x16xf32>
    %112 = arith.truncf %99 : vector<12x16xf32> to vector<12x16xbf16>
    %c0_58 = arith.constant 0 : index
    %c0_59 = arith.constant 0 : index
    %113 = vector.load %arg10[%c0_58, %c0_59] : memref<16x16xbf16, #tpu.memory_space<vmem>>, vector<16x16xbf16>
    %cst_60 = arith.constant dense<0.000000e+00> : vector<12x16xf32>
    %114 = tpu.matmul %112, %113, %cst_60 {dimension_numbers = #tpu.dot_dimension_numbers<[1], [0], [0], [1], [0, 0, 1, 1], [], []>} : vector<12x16xbf16>, vector<16x16xbf16>, vector<12x16xf32> -> vector<12x16xf32>
    %115 = arith.addf %111, %114 : vector<12x16xf32>
    %116 = vector.broadcast %100 : vector<1x16xf32> to vector<12x16xf32>
    %117 = arith.addf %115, %116 : vector<12x16xf32>
    %cst_61 = arith.constant dense<0.000000e+00> : vector<12xf32>
    %118 = vector.multi_reduction <add>, %117, %cst_61 [1] : vector<12x16xf32> to vector<12xf32>
    %119 = vector.shape_cast %118 : vector<12xf32> to vector<12x1xf32>
    %cst_62 = arith.constant 1.600000e+01 : f32
    %120 = vector.broadcast %cst_62 : f32 to vector<12x1xf32>
    %121 = arith.divf %119, %120 : vector<12x1xf32>
    %122 = vector.broadcast %121 : vector<12x1xf32> to vector<12x16xf32>
    %123 = arith.subf %117, %122 : vector<12x16xf32>
    %124 = arith.mulf %123, %123 : vector<12x16xf32>
    %cst_63 = arith.constant dense<0.000000e+00> : vector<12xf32>
    %125 = vector.multi_reduction <add>, %124, %cst_63 [1] : vector<12x16xf32> to vector<12xf32>
    %126 = vector.shape_cast %125 : vector<12xf32> to vector<12x1xf32>
    %cst_64 = arith.constant 1.600000e+01 : f32
    %127 = vector.broadcast %cst_64 : f32 to vector<12x1xf32>
    %128 = arith.divf %126, %127 : vector<12x1xf32>
    %cst_65 = arith.constant 9.99999974E-6 : f32
    %129 = vector.broadcast %cst_65 : f32 to vector<12x1xf32>
    %130 = arith.addf %128, %129 : vector<12x1xf32>
    %131 = math.rsqrt %130 : vector<12x1xf32>
    %132 = vector.broadcast %131 : vector<12x1xf32> to vector<12x16xf32>
    %133 = arith.mulf %123, %132 : vector<12x16xf32>
    %134 = vector.broadcast %101 : vector<1x16xf32> to vector<12x16xf32>
    %135 = arith.mulf %133, %134 : vector<12x16xf32>
    %136 = vector.broadcast %102 : vector<1x16xf32> to vector<12x16xf32>
    %137 = arith.addf %135, %136 : vector<12x16xf32>
    %cst_66 = arith.constant 0.000000e+00 : f32
    %138 = vector.broadcast %cst_66 : f32 to vector<12x16xf32>
    %139 = arith.maximumf %137, %138 : vector<12x16xf32>
    %140 = arith.truncf %139 : vector<12x16xf32> to vector<12x16xbf16>
    %c0_67 = arith.constant 0 : index
    %c0_68 = arith.constant 0 : index
    %141 = vector.load %arg11[%c0_67, %c0_68] : memref<16x16xbf16, #tpu.memory_space<vmem>>, vector<16x16xbf16>
    %cst_69 = arith.constant dense<0.000000e+00> : vector<12x16xf32>
    %142 = tpu.matmul %140, %141, %cst_69 {dimension_numbers = #tpu.dot_dimension_numbers<[1], [0], [0], [1], [0, 0, 1, 1], [], []>} : vector<12x16xbf16>, vector<16x16xbf16>, vector<12x16xf32> -> vector<12x16xf32>
    %143 = vector.broadcast %103 : vector<1x16xf32> to vector<12x16xf32>
    %144 = arith.addf %142, %143 : vector<12x16xf32>
    %cst_70 = arith.constant dense<0.000000e+00> : vector<12xf32>
    %145 = vector.multi_reduction <add>, %144, %cst_70 [1] : vector<12x16xf32> to vector<12xf32>
    %146 = vector.shape_cast %145 : vector<12xf32> to vector<12x1xf32>
    %cst_71 = arith.constant 1.600000e+01 : f32
    %147 = vector.broadcast %cst_71 : f32 to vector<12x1xf32>
    %148 = arith.divf %146, %147 : vector<12x1xf32>
    %149 = vector.broadcast %148 : vector<12x1xf32> to vector<12x16xf32>
    %150 = arith.subf %144, %149 : vector<12x16xf32>
    %151 = arith.mulf %150, %150 : vector<12x16xf32>
    %cst_72 = arith.constant dense<0.000000e+00> : vector<12xf32>
    %152 = vector.multi_reduction <add>, %151, %cst_72 [1] : vector<12x16xf32> to vector<12xf32>
    %153 = vector.shape_cast %152 : vector<12xf32> to vector<12x1xf32>
    %cst_73 = arith.constant 1.600000e+01 : f32
    %154 = vector.broadcast %cst_73 : f32 to vector<12x1xf32>
    %155 = arith.divf %153, %154 : vector<12x1xf32>
    %cst_74 = arith.constant 9.99999974E-6 : f32
    %156 = vector.broadcast %cst_74 : f32 to vector<12x1xf32>
    %157 = arith.addf %155, %156 : vector<12x1xf32>
    %158 = math.rsqrt %157 : vector<12x1xf32>
    %159 = vector.broadcast %158 : vector<12x1xf32> to vector<12x16xf32>
    %160 = arith.mulf %150, %159 : vector<12x16xf32>
    %161 = vector.broadcast %104 : vector<1x16xf32> to vector<12x16xf32>
    %162 = arith.mulf %160, %161 : vector<12x16xf32>
    %163 = vector.broadcast %105 : vector<1x16xf32> to vector<12x16xf32>
    %164 = arith.addf %162, %163 : vector<12x16xf32>
    %165 = arith.truncf %98 : vector<12x16xf32> to vector<12x16xbf16>
    %c0_75 = arith.constant 0 : index
    %c0_76 = arith.constant 0 : index
    %166 = vector.load %arg12[%c0_75, %c0_76] : memref<16x16xbf16, #tpu.memory_space<vmem>>, vector<16x16xbf16>
    %cst_77 = arith.constant dense<0.000000e+00> : vector<12x16xf32>
    %167 = tpu.matmul %165, %166, %cst_77 {dimension_numbers = #tpu.dot_dimension_numbers<[1], [0], [0], [1], [0, 0, 1, 1], [], []>} : vector<12x16xbf16>, vector<16x16xbf16>, vector<12x16xf32> -> vector<12x16xf32>
    %168 = arith.truncf %99 : vector<12x16xf32> to vector<12x16xbf16>
    %c0_78 = arith.constant 0 : index
    %c0_79 = arith.constant 0 : index
    %169 = vector.load %arg13[%c0_78, %c0_79] : memref<16x16xbf16, #tpu.memory_space<vmem>>, vector<16x16xbf16>
    %cst_80 = arith.constant dense<0.000000e+00> : vector<12x16xf32>
    %170 = tpu.matmul %168, %169, %cst_80 {dimension_numbers = #tpu.dot_dimension_numbers<[1], [0], [0], [1], [0, 0, 1, 1], [], []>} : vector<12x16xbf16>, vector<16x16xbf16>, vector<12x16xf32> -> vector<12x16xf32>
    %171 = arith.addf %167, %170 : vector<12x16xf32>
    %172 = vector.broadcast %106 : vector<1x16xf32> to vector<12x16xf32>
    %173 = arith.addf %171, %172 : vector<12x16xf32>
    %cst_81 = arith.constant dense<0.000000e+00> : vector<12xf32>
    %174 = vector.multi_reduction <add>, %173, %cst_81 [1] : vector<12x16xf32> to vector<12xf32>
    %175 = vector.shape_cast %174 : vector<12xf32> to vector<12x1xf32>
    %cst_82 = arith.constant 1.600000e+01 : f32
    %176 = vector.broadcast %cst_82 : f32 to vector<12x1xf32>
    %177 = arith.divf %175, %176 : vector<12x1xf32>
    %178 = vector.broadcast %177 : vector<12x1xf32> to vector<12x16xf32>
    %179 = arith.subf %173, %178 : vector<12x16xf32>
    %180 = arith.mulf %179, %179 : vector<12x16xf32>
    %cst_83 = arith.constant dense<0.000000e+00> : vector<12xf32>
    %181 = vector.multi_reduction <add>, %180, %cst_83 [1] : vector<12x16xf32> to vector<12xf32>
    %182 = vector.shape_cast %181 : vector<12xf32> to vector<12x1xf32>
    %cst_84 = arith.constant 1.600000e+01 : f32
    %183 = vector.broadcast %cst_84 : f32 to vector<12x1xf32>
    %184 = arith.divf %182, %183 : vector<12x1xf32>
    %cst_85 = arith.constant 9.99999974E-6 : f32
    %185 = vector.broadcast %cst_85 : f32 to vector<12x1xf32>
    %186 = arith.addf %184, %185 : vector<12x1xf32>
    %187 = math.rsqrt %186 : vector<12x1xf32>
    %188 = vector.broadcast %187 : vector<12x1xf32> to vector<12x16xf32>
    %189 = arith.mulf %179, %188 : vector<12x16xf32>
    %190 = vector.broadcast %107 : vector<1x16xf32> to vector<12x16xf32>
    %191 = arith.mulf %189, %190 : vector<12x16xf32>
    %192 = vector.broadcast %108 : vector<1x16xf32> to vector<12x16xf32>
    %193 = arith.addf %191, %192 : vector<12x16xf32>
    %194 = arith.addf %164, %193 : vector<12x16xf32>
    %cst_86 = arith.constant 0.000000e+00 : f32
    %195 = vector.broadcast %cst_86 : f32 to vector<12x16xf32>
    %196 = arith.maximumf %194, %195 : vector<12x16xf32>
    %c0_87 = arith.constant 0 : index
    %c0_88 = arith.constant 0 : index
    %197 = vector.load %arg14[%c0_87, %c0_88] : memref<12x16xf32, #tpu.memory_space<vmem>>, vector<12x16xf32>
    tpu.vector_store %arg14[%c0_87, %c0_88], %196 {strides = array<i32>} : memref<12x16xf32, #tpu.memory_space<vmem>>, vector<12x16xf32>,
    return
  }
}

</mosaic_0001>

<bundles_post_ra>
// kernel: autoencoder_factorized_attention_block.11
= control target key start
LH: loop header
LB: loop body
LE: loop exit
PB: predicated region body
PF: predicated region fallthrough
CT: control target
= control target key end

     0   :  { %12 = vsyncpa [#allocation3], 0  ;;  %s440_s0 = inlined_call_operand.hbm [shape: f32[8,32], index: 0, kind: input, shape index: {}]   ;;  %s441_s1 = inlined_call_operand.hbm [shape: f32[12,16], index: 1, kind: input, shape index: {}]   ;;  %s442_s2 = inlined_call_operand.vmem [shape: f32[6,128], index: 2, kind: input, shape index: {}]   ;;  %s443_s3 = inlined_call_operand.vmem [shape: bf16[32,128], index: 3, kind: input, shape index: {}]   ;;  %s444_s4 = inlined_call_operand.vmem [shape: bf16[16,64], index: 4, kind: input, shape index: {}]   ;;  %s445_s5 = inlined_call_operand.vmem [shape: f32[8,128], index: 5, kind: output, shape index: {0}]   ;;  %s446_s6 = inlined_call_operand.vmem [shape: f32[12,64], index: 6, kind: output, shape index: {1}]  }
   0x1   :  { %13 = vsyncpa [#allocation5], 0  ;;  %s349_s21 = smov [#allocation2]   ;;  %s350_s23 = smov [#allocation4]  }
   0x2   :  { %s20_s22 = sshll.u32 %s349_s21, 4  ;;  %s29_s24 = sshll.u32 %s350_s23, 4  ;;  %s21_s22 = int_to_ptr.vmem [resolvable:$true] %s20_s22  ;;  %s30_s24 = int_to_ptr.vmem [resolvable:$true] %s29_s24 }
   0x3   :  { %s313_s25 = scalar_lea.vmem %s21_s22, 128  ;;  %p318_p1 = scmp.lt.s32.totalorder %s21_s22, %s21_s22 }
   0x4   :  { %p314_p0 = scmp.ne.s32.totalorder %s21_s22, %s313_s25  ;;  %p319_p2 = scmp.lt.s32.totalorder %s313_s25, %s313_s25 }
   0x6   :  { %p320_p3 = por %p319_p2, %p318_p1 }
   0x8   :  { %p321_p4 = pnand %p320_p3, %p314_p0 }
   0xa   :  { %324 = shalt.err (!%p321_p4)
}
   0xb   :  { %23 = dma.hbm_to_vmem [thread:$0]  %s440_s0, 128, %s21_s22, [#allocation3]  }
   0xc   :  { %s333_s28 = scalar_lea.vmem %s30_s24, 256  ;;  %p338_p6 = scmp.lt.s32.totalorder %s30_s24, %s30_s24 }
   0xd   :  { %p334_p5 = scmp.ne.s32.totalorder %s30_s24, %s333_s28  ;;  %p339_p7 = scmp.lt.s32.totalorder %s333_s28, %s333_s28 }
   0xf   :  { %p340_p8 = por %p339_p7, %p338_p6 }
  0x11   :  { %p341_p9 = pnand %p340_p8, %p334_p5 }
  0x13   :  { %344 = shalt.err (!%p341_p9)
}
  0x14   :  { %s351_s29 = smov 128   ;;  %s352_s30 = smov 8  }
  0x15   :  { %35 = dma.hbm_to_vmem [thread:$0]  %s441_s1, 256, %s30_s24, [#allocation5], %s351_s29, %s351_s29, %s352_s30  }
  0x16   :  { %345 = dma.done.wait [#allocation3], 128  }
  0x17   :  { %346 = vsyncadd [#allocation3], 4294967168 }
  0x18   :  { %347 = dma.done.wait [#allocation5], 256  }
  0x19   :  { %348 = vsyncadd [#allocation5], 4294967040  ;;  %vm148_vm0 = vcmask 130048   ;;  %vm53_vm1 = vcmask 261120   ;;  %v146_v0 = vld [vmem:[#allocation4] sm:$0xff]  ;;  %vm152_vm2 = vcmask 125952  }
  0x1a   :  { %v147_v1 = vld [vmem:[#allocation4 + $0x8] sm:$0xf]  ;;  %v52_v2 = vld [vmem:[#allocation2] sm:$0xff]  ;;  %v149_v3 = vsel %vm148_vm0, %v146_v0, 0.0  ;;  %v296_v21 = vld [vmem:[%s443_s3 + $0x8] sm:$0xff]   ;;  %v353_v23 = vmov 0.0  }
  0x1b   :  { %v54_v4 = vsel %vm53_vm1, %v52_v2, 0.0  ;;  %150 = vadd.xlane.f32.xlu0 %v149_v3  ;;  %v153_v5 = vsel %vm152_vm2, %v147_v1, 0.0  ;;  %v298_v22 = vld [vmem:[%s444_s4] sm:$0xff]   ;;  %276 = vmatprep.subr.bf16.mxu0 %v353_v23  ;;  %vm354_vm3 = vmmov 0   ;;  %vm246_vm4 = vcmask 523264  }
  0x1c   :  { %55 = vadd.xlane.f32.xlu1 %v54_v4  ;;  %284 = vmatprep.subr.bf16.mxu1 %v353_v23  ;;  %v297_v24 = vld [vmem:[%s443_s3] sm:$0xff]   ;;  %vm248_vm5 = vcmask 519168  }
  0x1d   :  { %277 = vmatpush3.bf16.msra.mxu0 %v296_v21  ;;  %285 = vmatpush3.bf16.msra.mxu1 %v298_v22  ;;  %v266_v36 = vld [vmem:[%s442_s2 + $0x3] ss:$0 sm:$0xff]  ;;  %v260_v39 = vld [vmem:[%s442_s2] ss:$0 sm:$0xff]  ;;  %v267_v43 = vld [vmem:[%s442_s2 + $0x4] ss:$0 sm:$0xff] }
  0x1e   :  { %278 = vmatprep.subr.bf16.mxu0 %v353_v23  ;;  %280 = vmatprep.mubr.msk.bf16.mxu0 %vm354_vm3, %v353_v23  ;;  %v261_v44 = vld [vmem:[%s442_s2 + $0x1] ss:$0 sm:$0xff]  ;;  %v268_v52 = vld [vmem:[%s442_s2 + $0x5] ss:$0 sm:$0xff]  ;;  %v262_v53 = vld [vmem:[%s442_s2 + $0x2] ss:$0 sm:$0xff] }
  0x1f   :  { %154 = vadd.xlane.f32.xlu0 %v153_v5  ;;  %286 = vmatprep.mubr.msk.bf16.mxu1 %vm354_vm3, %v353_v23 }
  0x21   :  { %279 = vmatpush3.bf16.msra.mxu0 %v297_v24 }
  0xa4   :  { %v151_v6 = vpop.xlane.xlu0 %150 }
  0xa5   :  { %v56_v7 = vpop.xlane.xlu1 %55  ;;  %v157_v8 = vmul.f32 0.0625, %v151_v6 }
  0xa6   :  { %v58_v9 = vmul.f32 0.03125, %v56_v7 }
  0xa7   :  { %v159_v10 = vsub.f32 %v146_v0, %v157_v8 }
  0xa8   :  { %v59_v11 = vsub.f32 %v52_v2, %v58_v9  ;;  %v155_v12 = vpop.xlane.xlu0 %154 }
  0xa9   :  { %v158_v13 = vmul.f32 0.0625, %v155_v12  ;;  %v161_v14 = vmul.f32 %v159_v10, %v159_v10 }
  0xaa   :  { %v60_v15 = vmul.f32 %v59_v11, %v59_v11 }
  0xab   :  { %v160_v16 = vsub.f32 %v147_v1, %v158_v13  ;;  %v163_v17 = vsel %vm148_vm0, %v161_v14, 0.0 }
  0xac   :  { %164 = vadd.xlane.f32.xlu1 %v163_v17  ;;  %v61_v19 = vsel %vm53_vm1, %v60_v15, 0.0 }
  0xad   :  { %v162_v18 = vmul.f32 %v160_v16, %v160_v16 }
  0xaf   :  { %v166_v20 = vsel %vm152_vm2, %v162_v18, 0.0 }
  0xb0   :  { %167 = vadd.xlane.f32.xlu0 %v166_v20  ;;  %62 = vadd.xlane.f32.xlu1 %v61_v19 }
 0x135   :  { %v165_v25 = vpop.xlane.xlu1 %164 }
 0x136   :  { %v169_v26 = vmul.f32 0.0625, %v165_v25 }
 0x138   :  { %v171_v27 = vadd.f32 1e-05, %v169_v26 }
 0x139   :  { %v168_v28 = vpop.xlane.xlu0 %167  ;;  %v63_v29 = vpop.xlane.xlu1 %62 }
 0x13a   :  { %299 = vrsqrt.f32 %v171_v27  ;;  %v170_v30 = vmul.f32 0.0625, %v168_v28  ;;  %v64_v31 = vmul.f32 0.03125, %v63_v29 }
 0x13c   :  { %v172_v32 = vadd.f32 1e-05, %v170_v30  ;;  %v65_v33 = vadd.f32 1e-05, %v64_v31 }
 0x13e   :  { %301 = vrsqrt.f32 %v172_v32 }
 0x13f   :  { %303 = vrsqrt.f32 %v65_v33 }
 0x147   :  { %v300_v34 = vpop.eup %299 }
 0x148   :  { %v175_v35 = vmul.f32 %v300_v34, %v159_v10 }
 0x14a   :  { %v181_v41 = vmul.f32 %v266_v36, %v175_v35 }
 0x14b   :  { %v302_v37 = vpop.eup %301 }
 0x14c   :  { %v304_v38 = vpop.eup %303  ;;  %v176_v40 = vmul.f32 %v302_v37, %v160_v16  ;;  %v187_v47 = vadd.f32 %v267_v43, %v181_v41 }
 0x14d   :  { %v67_v42 = vmul.f32 %v304_v38, %v59_v11 }
 0x14e   :  { %v182_v45 = vmul.f32 %v266_v36, %v176_v40 }
 0x14f   :  { %v72_v46 = vmul.f32 %v260_v39, %v67_v42 }
 0x150   :  { %v188_v48 = vadd.f32 %v267_v43, %v182_v45 }
 0x151   :  { %v77_v49 = vadd.f32 %v261_v44, %v72_v46 }
 0x152   :  { %v189_v50 = vpack.c.bf16 %v188_v48, %v187_v47 }
 0x153   :  { %v78_v51 = vpack.c.bf16 %v77_v49, %v77_v49 }
 0x154   :  { %287 = vmatmul.mubr.msk.bf16.vlgmr.msra.gmra.mxu1 %vm148_vm0, %v189_v50 }
 0x155   :  { %281 = vmatmul.mubr.msk.bf16.vlgmr.msra.gmra.mxu0 %vm53_vm1, %v78_v51 }
 0x214   :  { %v239_v54 = vpop.f32.mrf.mxu1 }
 0x215   :  { %v136_v55 = vpop.f32.mrf.mxu0  ;;  %v240_v56 = vadd.f32 %v268_v52, %v239_v54 }
 0x216   :  { %v137_v57 = vadd.f32 %v262_v53, %v136_v55  ;;  %v288_v58 = vpop.f32.mrf.mxu1 }
 0x217   :  { %247 = vst.msk [vmem:[%s446_s6] sm:$0xff] %vm246_vm4, %v240_v56  ;;  %v282_v59 = vpop.f32.mrf.mxu0 }
 0x218   :  { %142 = vst [vmem:[%s445_s5] sm:$0xff] %v137_v57  ;;  %v242_v60 = vpop.f32.mrf.mxu1 }
 0x219   :  { %v139_v61 = vpop.f32.mrf.mxu0  ;;  %v243_v62 = vadd.f32 %v268_v52, %v242_v60 }
 0x21a   :  { %v289_v63 = vpop.f32.mrf.mxu1 }
 0x21b   :  { %249 = vst.msk [vmem:[%s446_s6 + $0x8] sm:$0xf] %vm248_vm5, %v243_v62  ;;  %v283_v0 = vpop.f32.mrf.mxu0 }
 0x21c   :  { %258 = vsyncpa [#allocation3], 1 }
 0x21d   :  { %259 = vsyncpa [#allocation5], 1 }

// kernel: autoencoder_factorized_attention_block.12
= control target key start
LH: loop header
LB: loop body
LE: loop exit
PB: predicated region body
PF: predicated region fallthrough
CT: control target
= control target key end

     0   :  { %s560_s21 = smov [#allocation4]   ;;  %s673_s0 = inlined_call_operand.hbm [shape: s32[2,12], index: 0, kind: input, shape index: {}]   ;;  %s674_s1 = inlined_call_operand.vmem [shape: f32[8,1,128], index: 1, kind: input, shape index: {}, may-alias: {1,2}]   ;;  %s675_s2 = inlined_call_operand.vmem [shape: f32[8,1,128], index: 2, kind: input, shape index: {}, may-alias: {1,2}]   ;;  %s676_s3 = inlined_call_operand.vmem [shape: f32[12,1,64], index: 3, kind: input, shape index: {}]   ;;  %s677_s4 = inlined_call_operand.vmem [shape: f32[32,32], index: 4, kind: input, shape index: {}]   ;;  %s678_s5 = inlined_call_operand.vmem [shape: f32[8,32], index: 5, kind: output, shape index: {0}]   ;;  %s679_s6 = inlined_call_operand.vmem [shape: f32[8,32], index: 6, kind: output, shape index: {1}]  }
   0x1   :  { %13 = dma.hbm_to_smem %s673_s0, 32, %s560_s21, [#allocation3] }
   0x2   :  { %554 = dma.done.wait [#allocation3], 32 }
   0x3   :  { %555 = vsyncadd [#allocation3], 4294967264 }
   0x4   :  { %15 = sfence }
   0x5   :  { %s606_s24 = smov 0  }
   0x6 LB: > { %s486_s25 = sadd.s32 4294967295, %s558_s24   ;;  %p491_p0 = scmp.ge.s32.totalorder %s558_s24, 1  ;;  %s558_s24 = sphi %s606_s24, %s21_s24  }
   0x7   : > { %p235_p1 = scmp.lt.s32.totalorder %s558_s24, 13 }
   0x9   : > { %p236_p2 = pnand %p491_p0, %p235_p1 }
   0xa   : > { %s271_s26 = sshra.s32 (!%p236_p2), %s486_s25, 7  ;;  %s276_s0 = sand.u32 (!%p236_p2), 127, %s486_s25 }
   0xb   : > { %239 = sbr.rel (%p236_p2) target bundleno = 481 (0x1e1), region = 36  ;;  %s502_s27 = sshll.u32 (!%p236_p2), %s271_s26, 7 }
   0xc   : > { %s290_s28 = sld [smem:[#allocation4 + %s486_s25]] (!%p236_p2)  ;;  %s503_s29 = sadd.s32 (!%p236_p2), 128, %s502_s27 }
   0xd   : > { %p295_p3 = scmp.lt.s32.totalorder (!%p236_p2), %s486_s25, 11  ;;  %s614_s30 = sadd.s32 (!%p236_p2), %s503_s29, %s276_s0 }
   0xe   : > { %s278_s7 = sld [smem:[#allocation4 + %s614_s30]] (!%p236_p2)  ;;  %p493_p6 = scmp.ne.s32.totalorder (!%p236_p2), %s486_s25, 0 }
  0x10   : > { %s296_s8 = scalar_select %p295_p3, %s486_s25, 11 }
  0x12   : > { %p291_p4 = scmp.lt.s32.totalorder %s290_s28, 7  ;;  %s297_s11 = scalar_lea.vmem %s676_s3, %s296_s8 }
  0x13   : > { %301 = sbr.rel (%p493_p6) target bundleno = 27 (0x1b), region = 40 }
  0x14   : > { %s681_s28 = smov (!%p291_p4, %s290_s28), 7  ;;  %p279_p5 = scmp.lt.s32.totalorder %s278_s7, 7 }
  0x15   : > { %s293_s14 = scalar_lea.vmem %s675_s2, %s681_s28 }
  0x16   : > { %s683_s7 = smov (!%p279_p5, %s278_s7), 7 }
  0x17   : > { %s281_s17 = scalar_lea.vmem %s674_s1, %s683_s7 }
  0x18   : > { %vm302_vm0 = vcmask 261120   ;;  %v561_v0 = vmov -1e+30   ;;  %v562_v1 = vmov 0.0  }
  0x19   : > { %303 = vst.msk [vmem:[#allocation2] sm:$0xff] %vm302_vm0, %v561_v0  ;;  %304 = vst.msk [vmem:[%s678_s5] sm:$0xff] %vm302_vm0, %v562_v1 }
  0x1a   : > { %305 = vst.msk [vmem:[%s679_s6] sm:$0xff] %vm302_vm0, %v562_v1 }
  0x1b PF: > { %v316_v2 = vld [vmem:[%s297_s11] sm:$0x1]  ;;  %s563_s22 = smov 32   ;;  %v330_v3 = vld [vmem:[%s677_s4 + $0x18] sm:$0xff]  ;;  %v564_v4 = vmov 0.0   ;;  %v329_v5 = vld [vmem:[%s677_s4 + $0x10] sm:$0xff]  ;;  %v424_v8 = vlaneseq }
  0x1c   : > { %318 = vrot.lane.b32.xlu0 %v316_v2, %s563_s22  ;;  %511 = vmatprep.subr.mxu0 %v564_v4  ;;  %v328_v6 = vld [vmem:[%s677_s4 + $0x8] sm:$0xff]  ;;  %v327_v7 = vld [vmem:[%s677_s4] sm:$0xff]  ;;  %vm565_vm1 = vmmov 0   ;;  %s566_s12 = smov 96   ;;  %s567_s13 = smov 64   ;;  %vm331_vm2 = vcmask 261120  }
  0x1d   : > { %512 = vmatpush3.msra.mxu0 %v330_v3  ;;  %519 = vmatprep.mubr.msk.f32.mxu0 %vm565_vm1, %v564_v4  ;;  %v425_v9 = vshrl.u32 %v424_v8, 7  ;;  %v315_v10 = vld [vmem:[%s293_s14] sm:$0x1]  ;;  %s313_s18 = sld [smem:[#allocation4 + %s614_s30]]  ;;  %vm414_vm3 = vcmask 253952  }
  0x1e   : > { %513 = vmatprep.subr.mxu0 %v564_v4  ;;  %v314_v15 = vld [vmem:[%s281_s17] sm:$0x1] }
  0x1f   : > { %514 = vmatpush3.msra.mxu0 %v329_v5  ;;  %v426_v11 = vsub.s32 0, %v425_v9 }
  0x20   : > { %515 = vmatprep.subr.mxu0 %v564_v4 }
  0x21   : > { %516 = vmatpush3.msra.mxu0 %v328_v6 }
  0x22   : > { %517 = vmatprep.subr.mxu0 %v564_v4 }
  0x23   : > { %518 = vmatpush3.msra.mxu0 %v327_v7  ;;  %s405_s28 = scalar_lea.vmem [#allocation2], %s313_s18  ;;  %s416_s17 = scalar_lea.vmem %s678_s5, %s313_s18 }
  0x24   : > { %v406_v18 = vld [vmem:[%s405_s28] sm:$0x1]  ;;  %s421_s20 = scalar_lea.vmem %s679_s6, %s313_s18 }
  0x25   : > { %v417_v26 = vld [vmem:[%s416_s17] sm:$0x1] }
  0x26   : > { %v422_v27 = vld [vmem:[%s421_s20] sm:$0x1] }
  0x8e   : > { %v319_v12 = vpop.permute.xlu0 %318 }
  0x8f   : > { %v321_v13 = vadd.f32 %v319_v12, %v315_v10 }
  0x91   : > { %323 = vrot.lane.b32.xlu0 %v321_v13, %s566_s12  ;;  %v427_v14 = vrot.slane %v321_v13, %v426_v11 }
  0x93   : > { %428 = vrot.lane.b32.xlu1 %v427_v14, %s567_s13 }
 0x103   : > { %v324_v16 = vpop.permute.xlu0 %323 }
 0x104   : > { %v326_v17 = vmul.f32 %v324_v16, %v314_v15 }
 0x105   : > { %v429_v30 = vpop.permute.xlu1 %428 }
 0x106   : > { %520 = vmatmul.mubr.msk.f32.vlgmr.msra.gmra.mxu0 %vm331_vm2, %v326_v17 }
 0x1c6   : > { %v401_v19 = vpop.f32.mrf.mxu0 }
 0x1c7   : > { %v407_v20 = vmax.f32 %v406_v18, %v401_v19 }
 0x1c8   : > { %v521_v21 = vpop.f32.mrf.mxu0 }
 0x1c9   : > { %v408_v22 = vsub.f32 %v406_v18, %v407_v20  ;;  %v411_v23 = vsub.f32 %v401_v19, %v407_v20  ;;  %415 = vst.msk [vmem:[%s405_s28] sm:$0x1] %vm414_vm3, %v407_v20 }
 0x1cb   : > { %v409_v24 = vmul.f32 1.442695, %v408_v22  ;;  %v412_v25 = vmul.f32 1.442695, %v411_v23 }
 0x1cd   : > { %538 = vpow2.f32 %v409_v24 }
 0x1ce   : > { %540 = vpow2.f32 %v412_v25 }
 0x1da   : > { %v539_v28 = vpop.eup %538 }
 0x1db   : > { %v541_v29 = vpop.eup %540  ;;  %v418_v31 = vmul.f32 %v539_v28, %v417_v26  ;;  %v423_v32 = vmul.f32 %v539_v28, %v422_v27 }
 0x1dc   : > { %v431_v33 = vmul.f32 %v541_v29, %v429_v30 }
 0x1dd   : > { %v419_v34 = vadd.f32 %v541_v29, %v418_v31 }
 0x1de   : > { %v432_v35 = vadd.f32 %v431_v33, %v423_v32 }
 0x1df   : > { %420 = vst.msk [vmem:[%s416_s17] sm:$0x1] %vm414_vm3, %v419_v34 }
 0x1e0   : > { %433 = vst.msk [vmem:[%s421_s20] sm:$0x1] %vm414_vm3, %v432_v35 }
 0x1e1 PF: > { %s21_s24 = sadd.s32 1, %s558_s24  }
 0x1e2   : > { %p18_p7 = scmp.ge.s32.totalorder %s21_s24, 14  }
 0x1e4   :  { %20 = sbr.rel (!%p18_p7) target bundleno = 6 (0x6), region = 83 }

// kernel: autoencoder_factorized_attention_block.13
= control target key start
LH: loop header
LB: loop body
LE: loop exit
PB: predicated region body
PF: predicated region fallthrough
CT: control target
= control target key end

     0   :  { %vm56_vm0 = vcmask 261120   ;;  %s977_s0 = inlined_call_operand.vmem [shape: f32[8,32], index: 0, kind: input, shape index: {}]   ;;  %s978_s1 = inlined_call_operand.vmem [shape: f32[8,128], index: 1, kind: input, shape index: {}]   ;;  %s979_s2 = inlined_call_operand.vmem [shape: f32[8,32], index: 2, kind: input, shape index: {}]   ;;  %s980_s3 = inlined_call_operand.vmem [shape: f32[8,32], index: 3, kind: input, shape index: {}]   ;;  %s981_s4 = inlined_call_operand.vmem [shape: f32[13,128], index: 4, kind: input, shape index: {}]   ;;  %s982_s5 = inlined_call_operand.vmem [shape: bf16[32,32], index: 5, kind: input, shape index: {}]   ;;  %s983_s6 = inlined_call_operand.vmem [shape: bf16[32,32], index: 6, kind: input, shape index: {}]   ;;  %s984_s7 = inlined_call_operand.vmem [shape: bf16[32,32], index: 7, kind: input, shape index: {}]   ;;  %s985_s8 = inlined_call_operand.vmem [shape: bf16[32,64], index: 8, kind: input, shape index: {}]   ;;  %s986_s9 = inlined_call_operand.vmem [shape: bf16[64,32], index: 9, kind: input, shape index: {}]   ;;  %s987_s10 = inlined_call_operand.vmem [shape: bf16[32,32], index: 10, kind: input, shape index: {}]   ;;  %s988_s11 = inlined_call_operand.hbm [shape: f32[8,32], index: 11, kind: output, shape index: {0}]   ;;  %s989_s12 = inlined_call_operand.vmem [shape: f32[8,32], index: 12, kind: output, shape index: {1}]  }
   0x1   :  { %v830_v0 = vld [vmem:[%s977_s0] sm:$0xff] }
   0x2   :  { %v57_v1 = vsel %vm56_vm0, %v830_v0, 0.0 }
   0x3   :  { %58 = vadd.xlane.f32.xlu0 %v57_v1 }
   0x4   :  { %18 = vsyncpa [#allocation3], 0  ;;  %v81_v7 = vld [vmem:[%s979_s2] sm:$0xff]  ;;  %v707_v9 = vld [vmem:[%s982_s5 + $0x8] sm:$0xff]   ;;  %v757_v11 = vmov 0.0   ;;  %vm758_vm1 = vmmov 0  }
   0x5   :  { %v83_v8 = vmax.f32 %v81_v7, 1e-30  ;;  %v709_v10 = vld [vmem:[%s983_s6 + $0x8] sm:$0xff]   ;;  %658 = vmatprep.subr.bf16.mxu1 %v757_v11  ;;  %650 = vmatprep.subr.bf16.mxu0 %v757_v11  ;;  %v708_v12 = vld [vmem:[%s982_s5] sm:$0xff]   ;;  %vm85_vm2 = vcmp.gt.f32.partialorder %v81_v7, 0.0  ;;  %vm444_vm3 = vcmask 523264  }
   0x6   :  { %659 = vmatpush3.bf16.msra.mxu1 %v707_v9  ;;  %651 = vmatpush3.bf16.msra.mxu0 %v709_v10  ;;  %v710_v13 = vld [vmem:[%s983_s6] sm:$0xff]   ;;  %s759_s6 = smov 96   ;;  %v711_v36 = vld [vmem:[%s984_s7 + $0x8] sm:$0xff]  }
   0x7   :  { %721 = vrcp.f32 %v83_v8  ;;  %660 = vmatprep.subr.bf16.mxu1 %v757_v11  ;;  %662 = vmatprep.mubr.msk.bf16.mxu1 %vm758_vm1, %v757_v11  ;;  %v82_v14 = vld [vmem:[%s980_s3] sm:$0xff]  ;;  %s760_s3 = smov 32  }
   0x8   :  { %652 = vmatprep.subr.bf16.mxu0 %v757_v11  ;;  %654 = vmatprep.mubr.msk.bf16.mxu0 %vm758_vm1, %v757_v11  ;;  %v88_v22 = vld [vmem:[%s978_s1] sm:$0xff] }
   0x9   :  { %v596_v26 = vld [vmem:[%s981_s4] ss:$0 sm:$0xff]  ;;  %v597_v28 = vld [vmem:[%s981_s4 + $0x1] ss:$0 sm:$0xff]  ;;  %v604_v38 = vld [vmem:[%s981_s4 + $0x2] ss:$0 sm:$0xff] }
   0xa   :  { %661 = vmatpush3.bf16.msra.mxu1 %v708_v12  ;;  %653 = vmatpush3.bf16.msra.mxu0 %v710_v13  ;;  %v712_v37 = vld [vmem:[%s984_s7] sm:$0xff]  }
   0xb   :  { %666 = vmatprep.subr.bf16.mxu0 %v757_v11  ;;  %674 = vmatprep.subr.bf16.mxu1 %v757_v11  ;;  %v606_v53 = vld [vmem:[%s981_s4 + $0x3] ss:$0 sm:$0xff]  ;;  %v611_v8 = vld [vmem:[%s981_s4 + $0x5] ss:$0 sm:$0xff] }
  0x14   :  { %v722_v15 = vpop.eup %721 }
  0x15   :  { %v86_v16 = vmul.f32 %v722_v15, %v82_v14 }
  0x17   :  { %v87_v17 = vsel %vm85_vm2, %v86_v16, 0.0 }
  0x18   :  { %v89_v18 = vpack.c.bf16 %v87_v17, %v87_v17  ;;  %221 = vrot.lane.b32.xlu1 %v87_v17, %s759_s6 }
  0x1a   :  { %663 = vmatmul.mubr.msk.bf16.vlgmr.msra.gmra.mxu1 %vm56_vm0, %v89_v18 }
  0x1b   :  { %678 = vmatprep.mubr.msk.bf16.mxu1 %vm758_vm1, %v757_v11 }
  0x8a   :  { %v222_v23 = vpop.permute.xlu1 %221 }
  0x8b   :  { %v224_v24 = vsub.f32 %v88_v22, %v222_v23 }
  0x8c   :  { %v59_v2 = vpop.xlane.xlu0 %58 }
  0x8d   :  { %v61_v3 = vmul.f32 0.03125, %v59_v2  ;;  %226 = vrot.lane.b32.xlu1 %v224_v24, %s760_s3 }
  0x8f   :  { %v62_v4 = vsub.f32 %v830_v0, %v61_v3 }
  0x91   :  { %v63_v5 = vmul.f32 %v62_v4, %v62_v4 }
  0x93   :  { %v64_v6 = vsel %vm56_vm0, %v63_v5, 0.0 }
  0x94   :  { %65 = vadd.xlane.f32.xlu0 %v64_v6  ;;  %v610_v6 = vld [vmem:[%s981_s4 + $0x4] ss:$0 sm:$0xff] }
  0xda   :  { %v203_v32 = vpop.f32.mrf.mxu1 }
  0xdc   :  { %v664_v33 = vpop.f32.mrf.mxu1 }
  0xdd   :  { %v718_v33 = vld [vmem:[%s986_s9] sm:$0xff]  }
  0xde   :  { %v206_v34 = vpop.f32.mrf.mxu1 }
  0xdf   :  { %v614_v34 = vld [vmem:[%s981_s4 + $0x8] ss:$0 sm:$0xff] }
  0xe0   :  { %v665_v35 = vpop.f32.mrf.mxu1 }
  0xff   :  { %v227_v48 = vpop.permute.xlu1 %226 }
 0x11d   :  { %v66_v19 = vpop.xlane.xlu0 %65 }
 0x11e   :  { %v67_v20 = vmul.f32 0.03125, %v66_v19  ;;  %v713_v19 = vld [vmem:[%s985_s8 + $0x8] sm:$0xff]  }
 0x11f   :  { %675 = vmatpush3.bf16.msra.mxu1 %v713_v19 }
 0x120   :  { %v68_v21 = vadd.f32 1e-05, %v67_v20  ;;  %676 = vmatprep.subr.bf16.mxu1 %v757_v11  ;;  %v715_v20 = vld [vmem:[%s986_s9 + $0x18] sm:$0xff]  }
 0x122   :  { %723 = vrsqrt.f32 %v68_v21  ;;  %v716_v21 = vld [vmem:[%s986_s9 + $0x10] sm:$0xff]  }
 0x12f   :  { %v724_v25 = vpop.eup %723 }
 0x130   :  { %v70_v27 = vmul.f32 %v724_v25, %v62_v4 }
 0x132   :  { %v75_v29 = vmul.f32 %v596_v26, %v70_v27  ;;  %v612_v26 = vld [vmem:[%s981_s4 + $0x6] ss:$0 sm:$0xff] }
 0x134   :  { %v80_v30 = vadd.f32 %v597_v28, %v75_v29  ;;  %v613_v28 = vld [vmem:[%s981_s4 + $0x7] ss:$0 sm:$0xff] }
 0x136   :  { %v94_v31 = vpack.c.bf16 %v80_v30, %v80_v30 }
 0x138   :  { %655 = vmatmul.mubr.msk.bf16.vlgmr.msra.gmra.mxu0 %vm56_vm0, %v94_v31 }
 0x139   :  { %670 = vmatprep.mubr.msk.bf16.mxu0 %vm758_vm1, %v757_v11  ;;  %667 = vmatpush3.bf16.msra.mxu0 %v711_v36 }
 0x13a   :  { %668 = vmatprep.subr.bf16.mxu0 %v757_v11 }
 0x13d   :  { %669 = vmatpush3.bf16.msra.mxu0 %v712_v37 }
 0x13e   :  { %682 = vmatprep.subr.bf16.mxu0 %v757_v11 }
 0x1f8   :  { %v148_v39 = vpop.f32.mrf.mxu0 }
 0x1f9   :  { %v204_v40 = vadd.f32 %v203_v32, %v148_v39  ;;  %v717_v32 = vld [vmem:[%s986_s9 + $0x8] sm:$0xff]  }
 0x1fa   :  { %v656_v41 = vpop.f32.mrf.mxu0 }
 0x1fb   :  { %v213_v42 = vadd.f32 %v604_v38, %v204_v40 }
 0x1fc   :  { %v151_v43 = vpop.f32.mrf.mxu0 }
 0x1fd   :  { %v605_v44 = vmul.f32 -1.442695, %v213_v42  ;;  %v618_v42 = vld [vmem:[%s981_s4 + $0x9] ss:$0 sm:$0xff] }
 0x1fe   :  { %v657_v45 = vpop.f32.mrf.mxu0 }
 0x1ff   :  { %725 = vpow2.f32 %v605_v44 }
 0x20c   :  { %v726_v46 = vpop.eup %725 }
 0x20d   :  { %v217_v47 = vadd.f32 1.0, %v726_v46 }
 0x20f   :  { %727 = vrcp.f32 %v217_v47 }
 0x21c   :  { %v728_v49 = vpop.eup %727 }
 0x21d   :  { %v229_v50 = vmul.f32 %v728_v49, %v227_v48 }
 0x21f   :  { %v230_v51 = vadd.f32 %v229_v50, %v87_v17 }
 0x221   :  { %v231_v52 = vpack.c.bf16 %v230_v51, %v230_v51 }
 0x223   :  { %671 = vmatmul.mubr.msk.bf16.vlgmr.msra.gmra.mxu0 %vm56_vm0, %v231_v52 }
 0x224   :  { %690 = vmatprep.mubr.msk.bf16.mxu0 %vm758_vm1, %v757_v11  ;;  %683 = vmatpush3.bf16.msra.mxu0 %v715_v20 }
 0x225   :  { %684 = vmatprep.subr.bf16.mxu0 %v757_v11 }
 0x228   :  { %685 = vmatpush3.bf16.msra.mxu0 %v716_v21 }
 0x229   :  { %686 = vmatprep.subr.bf16.mxu0 %v757_v11 }
 0x22c   :  { %687 = vmatpush3.bf16.msra.mxu0 %v717_v32 }
 0x22d   :  { %688 = vmatprep.subr.bf16.mxu0 %v757_v11 }
 0x230   :  { %689 = vmatpush3.bf16.msra.mxu0 %v718_v33 }
 0x2e3   :  { %v289_v54 = vpop.f32.mrf.mxu0 }
 0x2e4   :  { %v290_v55 = vadd.f32 %v606_v53, %v289_v54  ;;  %v719_v54 = vld [vmem:[%s987_s10 + $0x8] sm:$0xff]  }
 0x2e5   :  { %v672_v56 = vpop.f32.mrf.mxu0 }
 0x2e6   :  { %v295_v57 = vsel %vm56_vm0, %v290_v55, 0.0 }
 0x2e7   :  { %296 = vadd.xlane.f32.xlu0 %v295_v57  ;;  %v292_v58 = vpop.f32.mrf.mxu0 }
 0x2e9   :  { %v673_v59 = vpop.f32.mrf.mxu0 }
 0x370   :  { %v297_v60 = vpop.xlane.xlu0 %296 }
 0x371   :  { %v298_v61 = vmul.f32 0.03125, %v297_v60  ;;  %v624_v60 = vld [vmem:[%s981_s4 + $0xa] ss:$0 sm:$0xff] }
 0x373   :  { %v299_v62 = vsub.f32 %v290_v55, %v298_v61  ;;  %v720_v55 = vld [vmem:[%s987_s10] sm:$0xff]   ;;  %s761_s10 = smov [#allocation2]  }
 0x374   :  { %s584_s2 = sshll.u32 %s761_s10, 4  ;;  %s585_s2 = int_to_ptr.vmem [resolvable:$true] %s584_s2 }
 0x375   :  { %v300_v63 = vmul.f32 %v299_v62, %v299_v62  ;;  %s735_s30 = scalar_lea.vmem %s585_s2, 128  ;;  %p740_p1 = scmp.lt.s32.totalorder %s585_s2, %s585_s2 }
 0x376   :  { %p736_p0 = scmp.ne.s32.totalorder %s585_s2, %s735_s30  ;;  %p741_p2 = scmp.lt.s32.totalorder %s735_s30, %s735_s30 }
 0x377   :  { %v301_v1 = vsel %vm56_vm0, %v300_v63, 0.0 }
 0x378   :  { %302 = vadd.xlane.f32.xlu1 %v301_v1  ;;  %p742_p3 = por %p741_p2, %p740_p1 }
 0x37a   :  { %p743_p4 = pnand %p742_p3, %p736_p0 }
 0x401   :  { %v303_v2 = vpop.xlane.xlu1 %302 }
 0x402   :  { %v304_v3 = vmul.f32 0.03125, %v303_v2 }
 0x404   :  { %v305_v4 = vadd.f32 1e-05, %v304_v3 }
 0x406   :  { %729 = vrsqrt.f32 %v305_v4 }
 0x413   :  { %v730_v5 = vpop.eup %729 }
 0x414   :  { %v307_v7 = vmul.f32 %v730_v5, %v299_v62  ;;  %v625_v62 = vld [vmem:[%s981_s4 + $0xb] ss:$0 sm:$0xff] }
 0x416   :  { %v312_v9 = vmul.f32 %v610_v6, %v307_v7 }
 0x418   :  { %v317_v10 = vadd.f32 %v611_v8, %v312_v9 }
 0x41a   :  { %v905_v12 = vadd.f32 %v317_v10, %v830_v0  ;;  %v714_v0 = vld [vmem:[%s985_s8] sm:$0xff]  }
 0x41b   :  { %677 = vmatpush3.bf16.msra.mxu1 %v714_v0 }
 0x41c   :  { %v319_v13 = vsel %vm56_vm0, %v905_v12, 0.0  ;;  %694 = vmatprep.subr.bf16.mxu1 %v757_v11 }
 0x41d   :  { %320 = vadd.xlane.f32.xlu0 %v319_v13 }
 0x4a6   :  { %v321_v14 = vpop.xlane.xlu0 %320 }
 0x4a7   :  { %v322_v15 = vmul.f32 0.03125, %v321_v14 }
 0x4a9   :  { %v323_v16 = vsub.f32 %v905_v12, %v322_v15 }
 0x4ab   :  { %v324_v17 = vmul.f32 %v323_v16, %v323_v16 }
 0x4ad   :  { %v325_v18 = vsel %vm56_vm0, %v324_v17, 0.0 }
 0x4ae   :  { %326 = vadd.xlane.f32.xlu0 %v325_v18 }
 0x537   :  { %v327_v22 = vpop.xlane.xlu0 %326 }
 0x538   :  { %v328_v23 = vmul.f32 0.03125, %v327_v22 }
 0x53a   :  { %v329_v24 = vadd.f32 1e-05, %v328_v23 }
 0x53c   :  { %731 = vrsqrt.f32 %v329_v24 }
 0x549   :  { %v732_v25 = vpop.eup %731 }
 0x54a   :  { %v331_v27 = vmul.f32 %v732_v25, %v323_v16 }
 0x54c   :  { %v336_v29 = vmul.f32 %v612_v26, %v331_v27 }
 0x54e   :  { %v341_v30 = vadd.f32 %v613_v28, %v336_v29 }
 0x550   :  { %v342_v31 = vpack.c.bf16 %v341_v30, %v341_v30 }
 0x552   :  { %679 = vmatmul.mubr.msk.bf16.vlgmr.msra.gmra.mxu1 %vm56_vm0, %v342_v31 }
 0x553   :  { %698 = vmatprep.mubr.msk.bf16.mxu1 %vm758_vm1, %v757_v11  ;;  %695 = vmatpush3.bf16.msra.mxu1 %v719_v54 }
 0x554   :  { %696 = vmatprep.subr.bf16.mxu1 %v757_v11 }
 0x557   :  { %697 = vmatpush3.bf16.msra.mxu1 %v720_v55 }
 0x612   :  { %v400_v35 = vpop.f32.mrf.mxu1 }
 0x613   :  { %v401_v36 = vadd.f32 %v614_v34, %v400_v35 }
 0x614   :  { %v680_v37 = vpop.f32.mrf.mxu1 }
 0x615   :  { %v406_v38 = vmax.f32 %v401_v36, 0.0 }
 0x616   :  { %v403_v39 = vpop.f32.mrf.mxu1 }
 0x617   :  { %v407_v40 = vpack.c.bf16 %v406_v38, %v406_v38 }
 0x618   :  { %v681_v41 = vpop.f32.mrf.mxu1 }
 0x619   :  { %691 = vmatmul.mubr.msk.bf16.vlgmr.msra.gmra.mxu0 %vm444_vm3, %v407_v40 }
 0x6d9   :  { %v482_v43 = vpop.f32.mrf.mxu0 }
 0x6da   :  { %v483_v44 = vadd.f32 %v618_v42, %v482_v43 }
 0x6db   :  { %v692_v45 = vpop.f32.mrf.mxu0 }
 0x6dc   :  { %v488_v46 = vsel %vm56_vm0, %v483_v44, 0.0 }
 0x6dd   :  { %489 = vadd.xlane.f32.xlu0 %v488_v46  ;;  %v485_v47 = vpop.f32.mrf.mxu0 }
 0x6df   :  { %v693_v48 = vpop.f32.mrf.mxu0 }
 0x766   :  { %v490_v49 = vpop.xlane.xlu0 %489 }
 0x767   :  { %v491_v50 = vmul.f32 0.03125, %v490_v49 }
 0x769   :  { %v492_v51 = vsub.f32 %v483_v44, %v491_v50 }
 0x76b   :  { %v493_v52 = vmul.f32 %v492_v51, %v492_v51 }
 0x76d   :  { %v494_v53 = vsel %vm56_vm0, %v493_v52, 0.0 }
 0x76e   :  { %495 = vadd.xlane.f32.xlu0 %v494_v53 }
 0x7f7   :  { %v496_v56 = vpop.xlane.xlu0 %495 }
 0x7f8   :  { %v497_v57 = vmul.f32 0.03125, %v496_v56 }
 0x7fa   :  { %v498_v58 = vadd.f32 1e-05, %v497_v57 }
 0x7fc   :  { %733 = vrsqrt.f32 %v498_v58 }
 0x809   :  { %v734_v59 = vpop.eup %733 }
 0x80a   :  { %v500_v61 = vmul.f32 %v734_v59, %v492_v51 }
 0x80c   :  { %v505_v63 = vmul.f32 %v624_v60, %v500_v61 }
 0x80e   :  { %v510_v1 = vadd.f32 %v625_v62, %v505_v63 }
 0x810   :  { %v511_v2 = vadd.f32 %v510_v1, %v905_v12 }
 0x812   :  { %v513_v11 = vpack.c.bf16 %v511_v2, %v511_v2  ;;  %512 = vst.msk [vmem:[#allocation2] sm:$0xff] %vm56_vm0, %v511_v2 }
 0x814   :  { %699 = vmatmul.mubr.msk.bf16.vlgmr.msra.gmra.mxu1 %vm56_vm0, %v513_v11 }
 0x815   :  { %746 = shalt.err (!%p743_p4)
}
 0x816   :  { %587 = dma.vmem_to_hbm [thread:$0]  %s585_s2, 128, %s988_s11, [#allocation3]   ;;  %v626_v3 = vld [vmem:[%s981_s4 + $0xc] ss:$0 sm:$0xff] }
 0x8d4   :  { %v571_v4 = vpop.f32.mrf.mxu1 }
 0x8d5   :  { %v572_v5 = vadd.f32 %v626_v3, %v571_v4 }
 0x8d6   :  { %v700_v6 = vpop.f32.mrf.mxu1 }
 0x8d7   :  { %577 = vst.msk [vmem:[%s989_s12] sm:$0xff] %vm56_vm0, %v572_v5 }
 0x8d8   :  { %v574_v7 = vpop.f32.mrf.mxu1 }
 0x8da   :  { %v701_v8 = vpop.f32.mrf.mxu1 }
 0x8db   :  { %755 = dma.done.wait [#allocation3], 128  }
 0x8dc   :  { %756 = vsyncadd [#allocation3], 4294967168 }
 0x8dd   :  { %595 = vsyncpa [#allocation3], 1 }

// kernel: autoencoder_factorized_attention_block.14
= control target key start
LH: loop header
LB: loop body
LE: loop exit
PB: predicated region body
PF: predicated region fallthrough
CT: control target
= control target key end

     0   :  { %vm20_vm0 = vcmask 261120   ;;  %vm24_vm1 = vcmask 259072   ;;  %v157_v14 = vmov 0.0   ;;  %vm158_vm2 = vmmov 0   ;;  %s209_s0 = inlined_call_operand.vmem [shape: f32[14,32], index: 0, kind: input, shape index: {}]   ;;  %s210_s2 = inlined_call_operand.vmem [shape: bf16[32,128], index: 2, kind: input, shape index: {}]   ;;  %s211_s1 = inlined_call_operand.vmem [shape: f32[3,128], index: 1, kind: input, shape index: {}]   ;;  %s212_s3 = inlined_call_operand.vmem [shape: f32[14,128], index: 3, kind: output, shape index: {}]  }
   0x1   :  { %v18_v0 = vld [vmem:[%s209_s0] sm:$0xff]  ;;  %v19_v1 = vld [vmem:[%s209_s0 + $0x8] sm:$0x3f]  ;;  %141 = vmatprep.subr.bf16.mxu0 %v157_v14  ;;  %145 = vmatprep.mubr.msk.bf16.mxu0 %vm158_vm2, %v157_v14 }
   0x2   :  { %v21_v2 = vsel %vm20_vm0, %v18_v0, 0.0  ;;  %v25_v3 = vsel %vm24_vm1, %v19_v1, 0.0  ;;  %v151_v15 = vld [vmem:[%s210_s2 + $0x8] sm:$0xff]   ;;  %v152_v16 = vld [vmem:[%s210_s2] sm:$0xff]  }
   0x3   :  { %22 = vadd.xlane.f32.xlu0 %v21_v2  ;;  %142 = vmatpush3.bf16.msra.mxu0 %v151_v15  ;;  %v132_v25 = vld [vmem:[%s211_s1] ss:$0 sm:$0xff]  ;;  %v133_v29 = vld [vmem:[%s211_s1 + $0x1] ss:$0 sm:$0xff]  ;;  %v134_v34 = vld [vmem:[%s211_s1 + $0x2] ss:$0 sm:$0xff] }
   0x4   :  { %143 = vmatprep.subr.bf16.mxu0 %v157_v14 }
   0x7   :  { %26 = vadd.xlane.f32.xlu0 %v25_v3  ;;  %144 = vmatpush3.bf16.msra.mxu0 %v152_v16 }
  0x8c   :  { %v23_v4 = vpop.xlane.xlu0 %22 }
  0x8d   :  { %v29_v5 = vmul.f32 0.03125, %v23_v4 }
  0x8f   :  { %v31_v6 = vsub.f32 %v18_v0, %v29_v5 }
  0x90   :  { %v27_v7 = vpop.xlane.xlu0 %26 }
  0x91   :  { %v30_v8 = vmul.f32 0.03125, %v27_v7  ;;  %v33_v9 = vmul.f32 %v31_v6, %v31_v6 }
  0x93   :  { %v32_v10 = vsub.f32 %v19_v1, %v30_v8  ;;  %v35_v11 = vsel %vm20_vm0, %v33_v9, 0.0 }
  0x94   :  { %36 = vadd.xlane.f32.xlu1 %v35_v11 }
  0x95   :  { %v34_v12 = vmul.f32 %v32_v10, %v32_v10 }
  0x97   :  { %v38_v13 = vsel %vm24_vm1, %v34_v12, 0.0 }
  0x98   :  { %39 = vadd.xlane.f32.xlu1 %v38_v13 }
 0x11d   :  { %v37_v17 = vpop.xlane.xlu1 %36 }
 0x11e   :  { %v41_v18 = vmul.f32 0.03125, %v37_v17 }
 0x120   :  { %v43_v19 = vadd.f32 1e-05, %v41_v18 }
 0x121   :  { %v40_v20 = vpop.xlane.xlu1 %39 }
 0x122   :  { %153 = vrsqrt.f32 %v43_v19  ;;  %v42_v21 = vmul.f32 0.03125, %v40_v20 }
 0x124   :  { %v44_v22 = vadd.f32 1e-05, %v42_v21 }
 0x126   :  { %155 = vrsqrt.f32 %v44_v22 }
 0x12f   :  { %v154_v23 = vpop.eup %153 }
 0x130   :  { %v47_v24 = vmul.f32 %v154_v23, %v31_v6 }
 0x132   :  { %v53_v28 = vmul.f32 %v132_v25, %v47_v24 }
 0x133   :  { %v156_v26 = vpop.eup %155 }
 0x134   :  { %v48_v27 = vmul.f32 %v156_v26, %v32_v10  ;;  %v59_v31 = vadd.f32 %v133_v29, %v53_v28 }
 0x136   :  { %v54_v30 = vmul.f32 %v132_v25, %v48_v27 }
 0x138   :  { %v60_v32 = vadd.f32 %v133_v29, %v54_v30 }
 0x13a   :  { %v61_v33 = vpack.c.bf16 %v60_v32, %v59_v31 }
 0x13c   :  { %146 = vmatmul.mubr.msk.bf16.vlgmr.msra.gmra.mxu0 %vm20_vm0, %v61_v33 }
 0x1fc   :  { %v119_v35 = vpop.f32.mrf.mxu0 }
 0x1fd   :  { %v120_v36 = vadd.f32 %v134_v34, %v119_v35 }
 0x1fe   :  { %v147_v37 = vpop.f32.mrf.mxu0 }
 0x1ff   :  { %126 = vst [vmem:[%s212_s3] sm:$0xff] %v120_v36 }
 0x200   :  { %v122_v38 = vpop.f32.mrf.mxu0 }
 0x201   :  { %v123_v39 = vadd.f32 %v134_v34, %v122_v38 }
 0x202   :  { %v148_v40 = vpop.f32.mrf.mxu0 }
 0x203   :  { %127 = vst [vmem:[%s212_s3 + $0x8] sm:$0x3f] %v123_v39 }

// kernel: autoencoder_factorized_attention_block.17
= control target key start
LH: loop header
LB: loop body
LE: loop exit
PB: predicated region body
PF: predicated region fallthrough
CT: control target
= control target key end

     0   :  { %vm19_vm0 = vcmask 259072   ;;  %v137_v7 = vmov 0.0   ;;  %vm138_vm1 = vmmov 0   ;;  %vm65_vm2 = vcmask 261120   ;;  %s180_s0 = inlined_call_operand.vmem [shape: f32[6,32], index: 0, kind: input, shape index: {}]   ;;  %s181_s2 = inlined_call_operand.vmem [shape: bf16[32,128], index: 2, kind: input, shape index: {}]   ;;  %s182_s1 = inlined_call_operand.vmem [shape: f32[3,128], index: 1, kind: input, shape index: {}]   ;;  %s183_s3 = inlined_call_operand.vmem [shape: f32[6,128], index: 3, kind: output, shape index: {}]  }
   0x1   :  { %v18_v0 = vld [vmem:[%s180_s0] sm:$0x3f]  ;;  %123 = vmatprep.subr.bf16.mxu0 %v137_v7  ;;  %v133_v8 = vld [vmem:[%s181_s2 + $0x8] sm:$0xff]   ;;  %127 = vmatprep.mubr.msk.bf16.mxu0 %vm138_vm1, %v137_v7 }
   0x2   :  { %v20_v1 = vsel %vm19_vm0, %v18_v0, 0.0  ;;  %124 = vmatpush3.bf16.msra.mxu0 %v133_v8  ;;  %v134_v9 = vld [vmem:[%s181_s2] sm:$0xff]  }
   0x3   :  { %21 = vadd.xlane.f32.xlu0 %v20_v1  ;;  %125 = vmatprep.subr.bf16.mxu0 %v137_v7  ;;  %v114_v14 = vld [vmem:[%s182_s1] ss:$0 sm:$0xff]  ;;  %v115_v16 = vld [vmem:[%s182_s1 + $0x1] ss:$0 sm:$0xff]  ;;  %v116_v20 = vld [vmem:[%s182_s1 + $0x2] ss:$0 sm:$0xff] }
   0x6   :  { %126 = vmatpush3.bf16.msra.mxu0 %v134_v9 }
  0x8c   :  { %v22_v2 = vpop.xlane.xlu0 %21 }
  0x8d   :  { %v24_v3 = vmul.f32 0.03125, %v22_v2 }
  0x8f   :  { %v25_v4 = vsub.f32 %v18_v0, %v24_v3 }
  0x91   :  { %v26_v5 = vmul.f32 %v25_v4, %v25_v4 }
  0x93   :  { %v27_v6 = vsel %vm19_vm0, %v26_v5, 0.0 }
  0x94   :  { %28 = vadd.xlane.f32.xlu0 %v27_v6 }
 0x11d   :  { %v29_v10 = vpop.xlane.xlu0 %28 }
 0x11e   :  { %v30_v11 = vmul.f32 0.03125, %v29_v10 }
 0x120   :  { %v31_v12 = vadd.f32 1e-05, %v30_v11 }
 0x122   :  { %135 = vrsqrt.f32 %v31_v12 }
 0x12f   :  { %v136_v13 = vpop.eup %135 }
 0x130   :  { %v33_v15 = vmul.f32 %v136_v13, %v25_v4 }
 0x132   :  { %v38_v17 = vmul.f32 %v114_v14, %v33_v15 }
 0x134   :  { %v43_v18 = vadd.f32 %v115_v16, %v38_v17 }
 0x136   :  { %v44_v19 = vpack.c.bf16 %v43_v18, %v43_v18 }
 0x138   :  { %128 = vmatmul.mubr.msk.bf16.vlgmr.msra.gmra.mxu0 %vm65_vm2, %v44_v19 }
 0x1f8   :  { %v103_v21 = vpop.f32.mrf.mxu0 }
 0x1f9   :  { %v104_v22 = vadd.f32 %v116_v20, %v103_v21 }
 0x1fa   :  { %v129_v23 = vpop.f32.mrf.mxu0 }
 0x1fb   :  { %109 = vst [vmem:[%s183_s3] sm:$0x3f] %v104_v22 }
 0x1fc   :  { %v106_v24 = vpop.f32.mrf.mxu0 }
 0x1fe   :  { %v130_v25 = vpop.f32.mrf.mxu0 }

// kernel: autoencoder_factorized_attention_block.15
= control target key start
LH: loop header
LB: loop body
LE: loop exit
PB: predicated region body
PF: predicated region fallthrough
CT: control target
= control target key end

     0   :  { %s615_s0 = inlined_call_operand.vmem [shape: s32[2,14], index: 0, kind: input, shape index: {}]   ;;  %s616_s1 = inlined_call_operand.vmem [shape: f32[14,1,128], index: 1, kind: input, shape index: {}, may-alias: {1,2}]   ;;  %s617_s2 = inlined_call_operand.vmem [shape: f32[14,1,128], index: 2, kind: input, shape index: {}, may-alias: {1,2}]   ;;  %s618_s3 = inlined_call_operand.vmem [shape: f32[32,32], index: 3, kind: input, shape index: {}]   ;;  %s619_s4 = inlined_call_operand.vmem [shape: f32[14,32], index: 4, kind: output, shape index: {0}]   ;;  %s620_s5 = inlined_call_operand.vmem [shape: f32[14,32], index: 5, kind: output, shape index: {1}]  }
   0x1   :  { %s11_s20 = sshll.u32 %s615_s0, 4  ;;  %s12_s20 = int_to_ptr.vmem [resolvable:$true] %s11_s20 }
   0x2   :  { %s491_s21 = scalar_lea.vmem %s12_s20, 32  ;;  %p496_p1 = scmp.lt.s32.totalorder %s12_s20, %s12_s20 }
   0x3   :  { %p492_p0 = scmp.ne.s32.totalorder %s12_s20, %s491_s21  ;;  %p497_p2 = scmp.lt.s32.totalorder %s491_s21, %s491_s21 }
   0x5   :  { %p498_p3 = por %p497_p2, %p496_p1 }
   0x7   :  { %p499_p4 = pnand %p498_p3, %p492_p0 }
   0x9   :  { %502 = shalt.err (!%p499_p4)  }
   0xa   :  { %s513_s22 = smov [#allocation4]  }
   0xb   :  { %14 = dma.vmem_to_smem %s12_s20, 32, %s513_s22, [#allocation3] }
   0xc   :  { %507 = dma.done.wait [#allocation3], 32 }
   0xd   :  { %508 = vsyncadd [#allocation3], 4294967264 }
   0xe   :  { %16 = sfence }
   0xf   :  { %s553_s23 = smov 0  }
  0x10 LB: > { %s436_s0 = sadd.s32 4294967295, %s511_s23   ;;  %p441_p5 = scmp.ge.s32.totalorder %s511_s23, 1  ;;  %s511_s23 = sphi %s553_s23, %s22_s23  }
  0x11   : > { %p204_p6 = scmp.lt.s32.totalorder %s511_s23, 15 }
  0x13   : > { %p205_p7 = pnand %p441_p5, %p204_p6 }
  0x14   : > { %s235_s24 = sshra.s32 (!%p205_p7), %s436_s0, 7  ;;  %s240_s25 = sand.u32 (!%p205_p7), 127, %s436_s0 }
  0x15   : > { %208 = sbr.rel (%p205_p7) target bundleno = 376 (0x178), region = 32  ;;  %s452_s26 = sshll.u32 (!%p205_p7), %s235_s24, 7 }
  0x16   : > { %s254_s27 = sld [smem:[#allocation4 + %s436_s0]] (!%p205_p7)  ;;  %s453_s28 = sadd.s32 (!%p205_p7), 128, %s452_s26 }
  0x17   : > { %s561_s29 = sadd.s32 (!%p205_p7), %s453_s28, %s240_s25  ;;  %p443_p10 = scmp.ne.s32.totalorder (!%p205_p7), %s436_s0, 0 }
  0x18   : > { %s242_s30 = sld [smem:[#allocation4 + %s561_s29]] (!%p205_p7) }
  0x1c   : > { %p255_p8 = scmp.lt.s32.totalorder %s254_s27, 13 }
  0x1d   : > { %262 = sbr.rel (%p443_p10) target bundleno = 39 (0x27), region = 36 }
  0x1e   : > { %s622_s27 = smov (!%p255_p8, %s254_s27), 13  ;;  %p243_p9 = scmp.lt.s32.totalorder %s242_s30, 13 }
  0x1f   : > { %s257_s8 = scalar_lea.vmem %s617_s2, %s622_s27 }
  0x20   : > { %s624_s30 = smov (!%p243_p9, %s242_s30), 13 }
  0x21   : > { %s245_s11 = scalar_lea.vmem %s616_s1, %s624_s30 }
  0x22   : > { %vm263_vm0 = vcmask 261120   ;;  %vm265_vm1 = vcmask 259072   ;;  %v514_v0 = vmov -1e+30   ;;  %v515_v1 = vmov 0.0  }
  0x23   : > { %264 = vst.msk [vmem:[#allocation2] sm:$0xff] %vm263_vm0, %v514_v0  ;;  %267 = vst.msk [vmem:[%s619_s4] sm:$0xff] %vm263_vm0, %v515_v1 }
  0x24   : > { %266 = vst.msk [vmem:[#allocation2 + $0x8] sm:$0x3f] %vm265_vm1, %v514_v0  ;;  %268 = vst.msk [vmem:[%s619_s4 + $0x8] sm:$0x3f] %vm265_vm1, %v515_v1 }
  0x25   : > { %269 = vst.msk [vmem:[%s620_s5] sm:$0xff] %vm263_vm0, %v515_v1 }
  0x26   : > { %270 = vst.msk [vmem:[%s620_s5 + $0x8] sm:$0x3f] %vm265_vm1, %v515_v1 }
  0x27 PF: > { %v280_v2 = vld [vmem:[%s257_s8] sm:$0x1]  ;;  %v383_v3 = vlaneseq  ;;  %v289_v4 = vld [vmem:[%s618_s3 + $0x18] sm:$0xff]  ;;  %s516_s22 = smov 96   ;;  %v517_v5 = vmov 0.0   ;;  %v288_v6 = vld [vmem:[%s618_s3 + $0x10] sm:$0xff] }
  0x28   : > { %282 = vrot.lane.b32.xlu0 %v280_v2, %s516_s22  ;;  %461 = vmatprep.subr.mxu0 %v517_v5  ;;  %vm518_vm2 = vmmov 0   ;;  %v287_v8 = vld [vmem:[%s618_s3 + $0x8] sm:$0xff]  ;;  %v286_v10 = vld [vmem:[%s618_s3] sm:$0xff]  ;;  %s519_s6 = smov 64   ;;  %vm290_vm3 = vcmask 261120   ;;  %s278_s9 = sld [smem:[#allocation4 + %s561_s29]] }
  0x29   : > { %v384_v7 = vshrl.u32 %v383_v3, 7  ;;  %462 = vmatpush3.msra.mxu0 %v289_v4  ;;  %469 = vmatprep.mubr.msk.f32.mxu0 %vm518_vm2, %v517_v5  ;;  %v279_v12 = vld [vmem:[%s245_s11] sm:$0x1]  ;;  %vm373_vm4 = vcmask 253952  }
  0x2a   : > { %463 = vmatprep.subr.mxu0 %v517_v5 }
  0x2b   : > { %v385_v9 = vsub.s32 0, %v384_v7  ;;  %464 = vmatpush3.msra.mxu0 %v288_v6 }
  0x2c   : > { %465 = vmatprep.subr.mxu0 %v517_v5 }
  0x2d   : > { %v386_v11 = vrot.slane %v280_v2, %v385_v9  ;;  %466 = vmatpush3.msra.mxu0 %v287_v8 }
  0x2e   : > { %467 = vmatprep.subr.mxu0 %v517_v5  ;;  %s364_s10 = scalar_lea.vmem [#allocation2], %s278_s9  ;;  %s375_s12 = scalar_lea.vmem %s619_s4, %s278_s9 }
  0x2f   : > { %468 = vmatpush3.msra.mxu0 %v286_v10  ;;  %387 = vrot.lane.b32.xlu0 %v386_v11, %s519_s6  ;;  %v365_v15 = vld [vmem:[%s364_s10] sm:$0x1]  ;;  %s380_s14 = scalar_lea.vmem %s620_s5, %s278_s9 }
  0x30   : > { %v376_v23 = vld [vmem:[%s375_s12] sm:$0x1] }
  0x31   : > { %v381_v24 = vld [vmem:[%s380_s14] sm:$0x1] }
  0x9a   : > { %v283_v13 = vpop.permute.xlu0 %282 }
  0x9b   : > { %v285_v14 = vmul.f32 %v283_v13, %v279_v12 }
  0x9d   : > { %470 = vmatmul.mubr.msk.f32.vlgmr.msra.gmra.mxu0 %vm290_vm3, %v285_v14 }
  0xa1   : > { %v388_v25 = vpop.permute.xlu0 %387 }
 0x15d   : > { %v360_v16 = vpop.f32.mrf.mxu0 }
 0x15e   : > { %v366_v17 = vmax.f32 %v365_v15, %v360_v16 }
 0x15f   : > { %v471_v18 = vpop.f32.mrf.mxu0 }
 0x160   : > { %v367_v19 = vsub.f32 %v365_v15, %v366_v17  ;;  %v370_v20 = vsub.f32 %v360_v16, %v366_v17  ;;  %374 = vst.msk [vmem:[%s364_s10] sm:$0x1] %vm373_vm4, %v366_v17 }
 0x162   : > { %v368_v21 = vmul.f32 1.442695, %v367_v19  ;;  %v371_v22 = vmul.f32 1.442695, %v370_v20 }
 0x164   : > { %487 = vpow2.f32 %v368_v21 }
 0x165   : > { %489 = vpow2.f32 %v371_v22 }
 0x171   : > { %v488_v26 = vpop.eup %487 }
 0x172   : > { %v490_v27 = vpop.eup %489  ;;  %v377_v28 = vmul.f32 %v488_v26, %v376_v23  ;;  %v382_v29 = vmul.f32 %v488_v26, %v381_v24 }
 0x173   : > { %v390_v30 = vmul.f32 %v490_v27, %v388_v25 }
 0x174   : > { %v378_v31 = vadd.f32 %v490_v27, %v377_v28 }
 0x175   : > { %v391_v32 = vadd.f32 %v390_v30, %v382_v29 }
 0x176   : > { %379 = vst.msk [vmem:[%s375_s12] sm:$0x1] %vm373_vm4, %v378_v31 }
 0x177   : > { %392 = vst.msk [vmem:[%s380_s14] sm:$0x1] %vm373_vm4, %v391_v32 }
 0x178 PF: > { %s22_s23 = sadd.s32 1, %s511_s23  }
 0x179   : > { %p19_p11 = scmp.ge.s32.totalorder %s22_s23, 16  }
 0x17b   :  { %21 = sbr.rel (!%p19_p11) target bundleno = 16 (0x10), region = 76 }

// kernel: autoencoder_factorized_attention_block.16
= control target key start
LH: loop header
LB: loop body
LE: loop exit
PB: predicated region body
PF: predicated region fallthrough
CT: control target
= control target key end

     0   :  { %vm50_vm0 = vcmask 261120   ;;  %vm54_vm1 = vcmask 259072   ;;  %v743_v14 = vmov 0.0   ;;  %vm744_vm2 = vmmov 0   ;;  %s746_s14 = smov 32   ;;  %s978_s0 = inlined_call_operand.vmem [shape: f32[14,32], index: 0, kind: input, shape index: {}]   ;;  %s979_s6 = inlined_call_operand.vmem [shape: bf16[32,32], index: 6, kind: input, shape index: {}]   ;;  %s980_s2 = inlined_call_operand.vmem [shape: f32[14,32], index: 2, kind: input, shape index: {}]   ;;  %s981_s5 = inlined_call_operand.vmem [shape: bf16[32,32], index: 5, kind: input, shape index: {}]   ;;  %s982_s3 = inlined_call_operand.vmem [shape: f32[14,32], index: 3, kind: input, shape index: {}]   ;;  %s983_s4 = inlined_call_operand.vmem [shape: f32[12,128], index: 4, kind: input, shape index: {}]   ;;  %s984_s1 = inlined_call_operand.vmem [shape: f32[14,128], index: 1, kind: input, shape index: {}]   ;;  %s985_s7 = inlined_call_operand.vmem [shape: bf16[32,32], index: 7, kind: input, shape index: {}]   ;;  %s986_s8 = inlined_call_operand.vmem [shape: bf16[32,64], index: 8, kind: input, shape index: {}]   ;;  %s987_s9 = inlined_call_operand.vmem [shape: bf16[64,32], index: 9, kind: input, shape index: {}]   ;;  %s988_s10 = inlined_call_operand.vmem [shape: f32[14,32], index: 10, kind: output, shape index: {}]  }
   0x1   :  { %v805_v0 = vld [vmem:[%s978_s0] sm:$0xff]  ;;  %v810_v1 = vld [vmem:[%s978_s0 + $0x8] sm:$0x3f]  ;;  %655 = vmatprep.subr.bf16.mxu1 %v743_v14  ;;  %659 = vmatprep.mubr.msk.bf16.mxu1 %vm744_vm2, %v743_v14  ;;  %vm516_vm5 = vcmask 523264  }
   0x2   :  { %v51_v2 = vsel %vm50_vm0, %v805_v0, 0.0  ;;  %v55_v3 = vsel %vm54_vm1, %v810_v1, 0.0  ;;  %v703_v15 = vld [vmem:[%s979_s6 + $0x8] sm:$0xff]   ;;  %671 = vmatprep.subr.bf16.mxu0 %v743_v14  ;;  %675 = vmatprep.mubr.msk.bf16.mxu0 %vm744_vm2, %v743_v14  ;;  %v704_v16 = vld [vmem:[%s979_s6] sm:$0xff]  }
   0x3   :  { %52 = vadd.xlane.f32.xlu0 %v51_v2  ;;  %656 = vmatpush3.bf16.msra.mxu1 %v703_v15  ;;  %v91_v17 = vld [vmem:[%s980_s2] sm:$0xff]  ;;  %v92_v18 = vld [vmem:[%s980_s2 + $0x8] sm:$0x3f]  ;;  %s745_s2 = smov 96  }
   0x4   :  { %657 = vmatprep.subr.bf16.mxu1 %v743_v14  ;;  %v95_v19 = vmax.f32 %v91_v17, 1e-30  ;;  %v96_v20 = vmax.f32 %v92_v18, 1e-30  ;;  %v93_v22 = vld [vmem:[%s982_s3] sm:$0xff]  ;;  %vm99_vm3 = vcmp.gt.f32.partialorder %v91_v17, 0.0 }
   0x5   :  { %v94_v24 = vld [vmem:[%s982_s3 + $0x8] sm:$0x3f]  ;;  %vm100_vm4 = vcmp.gt.f32.partialorder %v92_v18, 0.0  ;;  %v607_v37 = vld [vmem:[%s983_s4] ss:$0 sm:$0xff] }
   0x6   :  { %715 = vrcp.f32 %v95_v19  ;;  %v105_v38 = vld [vmem:[%s984_s1] sm:$0xff]  ;;  %v106_v41 = vld [vmem:[%s984_s1 + $0x8] sm:$0x3f] }
   0x7   :  { %56 = vadd.xlane.f32.xlu0 %v55_v3  ;;  %658 = vmatpush3.bf16.msra.mxu1 %v704_v16  ;;  %717 = vrcp.f32 %v96_v20  ;;  %v608_v46 = vld [vmem:[%s983_s4 + $0x1] ss:$0 sm:$0xff]  ;;  %v705_v51 = vld [vmem:[%s981_s5 + $0x8] sm:$0xff]   ;;  %v615_v61 = vld [vmem:[%s983_s4 + $0x2] ss:$0 sm:$0xff] }
   0x8   :  { %663 = vmatprep.subr.bf16.mxu1 %v743_v14  ;;  %v706_v53 = vld [vmem:[%s981_s5] sm:$0xff]   ;;  %v707_v55 = vld [vmem:[%s985_s7 + $0x8] sm:$0xff]  }
   0x9   :  { %672 = vmatpush3.bf16.msra.mxu0 %v707_v55  ;;  %v708_v56 = vld [vmem:[%s985_s7] sm:$0xff]  }
   0xa   :  { %673 = vmatprep.subr.bf16.mxu0 %v743_v14 }
   0xd   :  { %674 = vmatpush3.bf16.msra.mxu0 %v708_v56 }
   0xe   :  { %687 = vmatprep.subr.bf16.mxu0 %v743_v14 }
  0x13   :  { %v716_v21 = vpop.eup %715 }
  0x14   :  { %v718_v23 = vpop.eup %717  ;;  %v101_v25 = vmul.f32 %v716_v21, %v93_v22 }
  0x15   :  { %v102_v26 = vmul.f32 %v718_v23, %v94_v24  ;;  %v618_v24 = vld [vmem:[%s983_s4 + $0x3] ss:$0 sm:$0xff] }
  0x16   :  { %v846_v27 = vsel %vm99_vm3, %v101_v25, 0.0 }
  0x17   :  { %v848_v28 = vsel %vm100_vm4, %v102_v26, 0.0 }
  0x18   :  { %v107_v54 = vpack.c.bf16 %v848_v28, %v846_v27 }
  0x1d   :  { %249 = vrot.lane.b32.xlu0 %v846_v27, %s745_s2 }
  0x8c   :  { %v53_v4 = vpop.xlane.xlu0 %52 }
  0x8d   :  { %v59_v5 = vmul.f32 0.03125, %v53_v4 }
  0x8f   :  { %v61_v6 = vsub.f32 %v805_v0, %v59_v5 }
  0x90   :  { %v57_v7 = vpop.xlane.xlu0 %56 }
  0x91   :  { %v60_v8 = vmul.f32 0.03125, %v57_v7  ;;  %v63_v9 = vmul.f32 %v61_v6, %v61_v6 }
  0x93   :  { %v62_v10 = vsub.f32 %v810_v1, %v60_v8  ;;  %v65_v11 = vsel %vm50_vm0, %v63_v9, 0.0 }
  0x94   :  { %66 = vadd.xlane.f32.xlu1 %v65_v11  ;;  %v250_v40 = vpop.permute.xlu0 %249 }
  0x95   :  { %v64_v12 = vmul.f32 %v62_v10, %v62_v10  ;;  %v255_v44 = vsub.f32 %v105_v38, %v250_v40 }
  0x97   :  { %v68_v13 = vsel %vm54_vm1, %v64_v12, 0.0 }
  0x98   :  { %69 = vadd.xlane.f32.xlu1 %v68_v13 }
  0xa9   :  { %251 = vrot.lane.b32.xlu1 %v848_v28, %s745_s2 }
  0xad   :  { %259 = vrot.lane.b32.xlu1 %v255_v44, %s746_s14 }
 0x11d   :  { %v67_v29 = vpop.xlane.xlu1 %66 }
 0x11e   :  { %v71_v30 = vmul.f32 0.03125, %v67_v29 }
 0x120   :  { %v73_v31 = vadd.f32 1e-05, %v71_v30 }
 0x121   :  { %v70_v32 = vpop.xlane.xlu1 %69 }
 0x122   :  { %719 = vrsqrt.f32 %v73_v31  ;;  %v72_v33 = vmul.f32 0.03125, %v70_v32 }
 0x124   :  { %v74_v34 = vadd.f32 1e-05, %v72_v33 }
 0x125   :  { %v252_v45 = vpop.permute.xlu1 %251 }
 0x126   :  { %721 = vrsqrt.f32 %v74_v34  ;;  %v256_v48 = vsub.f32 %v106_v41, %v252_v45 }
 0x128   :  { %261 = vrot.lane.b32.xlu1 %v256_v48, %s746_s14 }
 0x129   :  { %v260_v15 = vpop.permute.xlu1 %259 }
 0x12f   :  { %v720_v35 = vpop.eup %719 }
 0x130   :  { %v77_v36 = vmul.f32 %v720_v35, %v61_v6 }
 0x132   :  { %v83_v43 = vmul.f32 %v607_v37, %v77_v36 }
 0x133   :  { %v722_v39 = vpop.eup %721 }
 0x134   :  { %v78_v42 = vmul.f32 %v722_v39, %v62_v10  ;;  %v89_v49 = vadd.f32 %v608_v46, %v83_v43 }
 0x136   :  { %v84_v47 = vmul.f32 %v607_v37, %v78_v42 }
 0x138   :  { %v90_v50 = vadd.f32 %v608_v46, %v84_v47 }
 0x13a   :  { %v112_v52 = vpack.c.bf16 %v90_v50, %v89_v49  ;;  %v622_v50 = vld [vmem:[%s983_s4 + $0x4] ss:$0 sm:$0xff] }
 0x13c   :  { %660 = vmatmul.mubr.msk.bf16.vlgmr.msra.gmra.mxu1 %vm50_vm0, %v112_v52  ;;  %v623_v52 = vld [vmem:[%s983_s4 + $0x5] ss:$0 sm:$0xff] }
 0x13d   :  { %664 = vmatpush3.bf16.msra.mxu1 %v705_v51  ;;  %667 = vmatprep.mubr.msk.bf16.mxu1 %vm744_vm2, %v743_v14 }
 0x13e   :  { %665 = vmatprep.subr.bf16.mxu1 %v743_v14 }
 0x141   :  { %666 = vmatpush3.bf16.msra.mxu1 %v706_v53 }
 0x142   :  { %679 = vmatprep.subr.bf16.mxu1 %v743_v14 }
 0x144   :  { %668 = vmatmul.mubr.msk.bf16.vlgmr.msra.gmra.mxu1 %vm50_vm0, %v107_v54 }
 0x145   :  { %683 = vmatprep.mubr.msk.bf16.mxu1 %vm744_vm2, %v743_v14 }
 0x19a   :  { %v262_v17 = vpop.permute.xlu1 %261 }
 0x1fc   :  { %v166_v57 = vpop.f32.mrf.mxu1 }
 0x1fe   :  { %v661_v58 = vpop.f32.mrf.mxu1 }
 0x200   :  { %v169_v59 = vpop.f32.mrf.mxu1 }
 0x202   :  { %v662_v60 = vpop.f32.mrf.mxu1 }
 0x204   :  { %v222_v62 = vpop.f32.mrf.mxu1 }
 0x205   :  { %v223_v63 = vadd.f32 %v222_v62, %v166_v57 }
 0x206   :  { %v669_v2 = vpop.f32.mrf.mxu1 }
 0x207   :  { %v233_v3 = vadd.f32 %v615_v61, %v223_v63 }
 0x208   :  { %v225_v4 = vpop.f32.mrf.mxu1 }
 0x209   :  { %v616_v5 = vmul.f32 -1.442695, %v233_v3  ;;  %v226_v6 = vadd.f32 %v225_v4, %v169_v59 }
 0x20a   :  { %v670_v7 = vpop.f32.mrf.mxu1 }
 0x20b   :  { %723 = vpow2.f32 %v616_v5  ;;  %v234_v8 = vadd.f32 %v615_v61, %v226_v6 }
 0x20d   :  { %v617_v9 = vmul.f32 -1.442695, %v234_v8 }
 0x20f   :  { %725 = vpow2.f32 %v617_v9  ;;  %v709_v9 = vld [vmem:[%s986_s8 + $0x8] sm:$0xff]  }
 0x210   :  { %680 = vmatpush3.bf16.msra.mxu1 %v709_v9 }
 0x211   :  { %681 = vmatprep.subr.bf16.mxu1 %v743_v14 }
 0x218   :  { %v724_v10 = vpop.eup %723 }
 0x219   :  { %v241_v11 = vadd.f32 1.0, %v724_v10  ;;  %v710_v10 = vld [vmem:[%s986_s8] sm:$0xff]  }
 0x21a   :  { %682 = vmatpush3.bf16.msra.mxu1 %v710_v10 }
 0x21b   :  { %727 = vrcp.f32 %v241_v11  ;;  %v711_v11 = vld [vmem:[%s987_s9 + $0x18] sm:$0xff]  }
 0x21c   :  { %v726_v12 = vpop.eup %725 }
 0x21d   :  { %v242_v13 = vadd.f32 1.0, %v726_v12 }
 0x21f   :  { %729 = vrcp.f32 %v242_v13 }
 0x228   :  { %v728_v16 = vpop.eup %727 }
 0x229   :  { %v265_v18 = vmul.f32 %v728_v16, %v260_v15 }
 0x22b   :  { %v267_v21 = vadd.f32 %v265_v18, %v846_v27 }
 0x22c   :  { %v730_v19 = vpop.eup %729 }
 0x22d   :  { %v266_v20 = vmul.f32 %v730_v19, %v262_v17 }
 0x22f   :  { %v268_v22 = vadd.f32 %v266_v20, %v848_v28 }
 0x231   :  { %v269_v23 = vpack.c.bf16 %v268_v22, %v267_v21  ;;  %v624_v21 = vld [vmem:[%s983_s4 + $0x6] ss:$0 sm:$0xff] }
 0x233   :  { %676 = vmatmul.mubr.msk.bf16.vlgmr.msra.gmra.mxu0 %vm50_vm0, %v269_v23 }
 0x234   :  { %695 = vmatprep.mubr.msk.bf16.mxu0 %vm744_vm2, %v743_v14  ;;  %688 = vmatpush3.bf16.msra.mxu0 %v711_v11 }
 0x235   :  { %689 = vmatprep.subr.bf16.mxu0 %v743_v14 }
 0x2f3   :  { %v327_v25 = vpop.f32.mrf.mxu0 }
 0x2f4   :  { %v328_v26 = vadd.f32 %v618_v24, %v327_v25  ;;  %v625_v25 = vld [vmem:[%s983_s4 + $0x7] ss:$0 sm:$0xff] }
 0x2f5   :  { %v677_v29 = vpop.f32.mrf.mxu0 }
 0x2f6   :  { %v334_v30 = vsel %vm50_vm0, %v328_v26, 0.0 }
 0x2f7   :  { %335 = vadd.xlane.f32.xlu0 %v334_v30  ;;  %v330_v31 = vpop.f32.mrf.mxu0 }
 0x2f8   :  { %v331_v27 = vadd.f32 %v618_v24, %v330_v31 }
 0x2f9   :  { %v678_v32 = vpop.f32.mrf.mxu0 }
 0x2fa   :  { %v337_v28 = vsel %vm54_vm1, %v331_v27, 0.0  ;;  %v713_v32 = vld [vmem:[%s987_s9 + $0x8] sm:$0xff]  }
 0x2fb   :  { %338 = vadd.xlane.f32.xlu1 %v337_v28  ;;  %v714_v28 = vld [vmem:[%s987_s9] sm:$0xff]  }
 0x380   :  { %v336_v33 = vpop.xlane.xlu0 %335 }
 0x381   :  { %v340_v34 = vmul.f32 0.03125, %v336_v33  ;;  %v626_v33 = vld [vmem:[%s983_s4 + $0x8] ss:$0 sm:$0xff] }
 0x383   :  { %v342_v35 = vsub.f32 %v328_v26, %v340_v34 }
 0x384   :  { %v339_v36 = vpop.xlane.xlu1 %338 }
 0x385   :  { %v341_v37 = vmul.f32 0.03125, %v339_v36  ;;  %v344_v38 = vmul.f32 %v342_v35, %v342_v35 }
 0x387   :  { %v343_v39 = vsub.f32 %v331_v27, %v341_v37  ;;  %v346_v40 = vsel %vm50_vm0, %v344_v38, 0.0  ;;  %v712_v27 = vld [vmem:[%s987_s9 + $0x10] sm:$0xff]  }
 0x388   :  { %347 = vadd.xlane.f32.xlu0 %v346_v40  ;;  %690 = vmatpush3.bf16.msra.mxu0 %v712_v27 }
 0x389   :  { %v345_v41 = vmul.f32 %v343_v39, %v343_v39  ;;  %691 = vmatprep.subr.bf16.mxu0 %v743_v14 }
 0x38b   :  { %v349_v42 = vsel %vm54_vm1, %v345_v41, 0.0 }
 0x38c   :  { %350 = vadd.xlane.f32.xlu0 %v349_v42  ;;  %692 = vmatpush3.bf16.msra.mxu0 %v713_v32 }
 0x38d   :  { %693 = vmatprep.subr.bf16.mxu0 %v743_v14  ;;  %v630_v14 = vld [vmem:[%s983_s4 + $0x9] ss:$0 sm:$0xff] }
 0x390   :  { %694 = vmatpush3.bf16.msra.mxu0 %v714_v28 }
 0x411   :  { %v348_v43 = vpop.xlane.xlu0 %347 }
 0x412   :  { %v352_v44 = vmul.f32 0.03125, %v348_v43 }
 0x414   :  { %v354_v45 = vadd.f32 1e-05, %v352_v44 }
 0x415   :  { %v351_v46 = vpop.xlane.xlu0 %350 }
 0x416   :  { %731 = vrsqrt.f32 %v354_v45  ;;  %v353_v47 = vmul.f32 0.03125, %v351_v46 }
 0x418   :  { %v355_v48 = vadd.f32 1e-05, %v353_v47 }
 0x41a   :  { %733 = vrsqrt.f32 %v355_v48 }
 0x423   :  { %v732_v49 = vpop.eup %731 }
 0x424   :  { %v358_v51 = vmul.f32 %v732_v49, %v342_v35 }
 0x426   :  { %v364_v53 = vmul.f32 %v622_v50, %v358_v51 }
 0x427   :  { %v734_v54 = vpop.eup %733 }
 0x428   :  { %v370_v55 = vadd.f32 %v623_v52, %v364_v53  ;;  %v359_v56 = vmul.f32 %v734_v54, %v343_v39 }
 0x42a   :  { %v910_v57 = vadd.f32 %v370_v55, %v805_v0  ;;  %v365_v58 = vmul.f32 %v622_v50, %v359_v56 }
 0x42c   :  { %v374_v59 = vsel %vm50_vm0, %v910_v57, 0.0  ;;  %v371_v60 = vadd.f32 %v623_v52, %v365_v58 }
 0x42d   :  { %375 = vadd.xlane.f32.xlu0 %v374_v59 }
 0x42e   :  { %v915_v61 = vadd.f32 %v371_v60, %v810_v1 }
 0x430   :  { %v377_v62 = vsel %vm54_vm1, %v915_v61, 0.0 }
 0x431   :  { %378 = vadd.xlane.f32.xlu1 %v377_v62 }
 0x4b6   :  { %v376_v63 = vpop.xlane.xlu0 %375 }
 0x4b7   :  { %v380_v2 = vmul.f32 0.03125, %v376_v63 }
 0x4b9   :  { %v382_v3 = vsub.f32 %v910_v57, %v380_v2 }
 0x4ba   :  { %v379_v4 = vpop.xlane.xlu1 %378 }
 0x4bb   :  { %v381_v0 = vmul.f32 0.03125, %v379_v4  ;;  %v384_v5 = vmul.f32 %v382_v3, %v382_v3 }
 0x4bd   :  { %v383_v6 = vsub.f32 %v915_v61, %v381_v0  ;;  %v386_v7 = vsel %vm50_vm0, %v384_v5, 0.0 }
 0x4be   :  { %387 = vadd.xlane.f32.xlu0 %v386_v7  ;;  %v636_v7 = vld [vmem:[%s983_s4 + $0xa] ss:$0 sm:$0xff] }
 0x4bf   :  { %v385_v8 = vmul.f32 %v383_v6, %v383_v6 }
 0x4c1   :  { %v389_v1 = vsel %vm54_vm1, %v385_v8, 0.0 }
 0x4c2   :  { %390 = vadd.xlane.f32.xlu1 %v389_v1  ;;  %v637_v1 = vld [vmem:[%s983_s4 + $0xb] ss:$0 sm:$0xff] }
 0x547   :  { %v388_v12 = vpop.xlane.xlu0 %387 }
 0x548   :  { %v392_v13 = vmul.f32 0.03125, %v388_v12 }
 0x54a   :  { %v394_v15 = vadd.f32 1e-05, %v392_v13 }
 0x54b   :  { %v391_v16 = vpop.xlane.xlu1 %390 }
 0x54c   :  { %735 = vrsqrt.f32 %v394_v15  ;;  %v393_v17 = vmul.f32 0.03125, %v391_v16 }
 0x54e   :  { %v395_v18 = vadd.f32 1e-05, %v393_v17 }
 0x550   :  { %737 = vrsqrt.f32 %v395_v18 }
 0x559   :  { %v736_v19 = vpop.eup %735 }
 0x55a   :  { %v398_v20 = vmul.f32 %v736_v19, %v382_v3 }
 0x55c   :  { %v404_v24 = vmul.f32 %v624_v21, %v398_v20 }
 0x55d   :  { %v738_v22 = vpop.eup %737 }
 0x55e   :  { %v399_v23 = vmul.f32 %v738_v22, %v383_v6  ;;  %v410_v29 = vadd.f32 %v625_v25, %v404_v24 }
 0x560   :  { %v405_v26 = vmul.f32 %v624_v21, %v399_v23 }
 0x562   :  { %v411_v30 = vadd.f32 %v625_v25, %v405_v26 }
 0x564   :  { %v412_v31 = vpack.c.bf16 %v411_v30, %v410_v29 }
 0x566   :  { %684 = vmatmul.mubr.msk.bf16.vlgmr.msra.gmra.mxu1 %vm50_vm0, %v412_v31 }
 0x626   :  { %v470_v34 = vpop.f32.mrf.mxu1 }
 0x627   :  { %v471_v36 = vadd.f32 %v626_v33, %v470_v34 }
 0x628   :  { %v685_v35 = vpop.f32.mrf.mxu1 }
 0x629   :  { %v477_v40 = vmax.f32 %v471_v36, 0.0 }
 0x62a   :  { %v473_v37 = vpop.f32.mrf.mxu1 }
 0x62b   :  { %v474_v38 = vadd.f32 %v626_v33, %v473_v37 }
 0x62c   :  { %v686_v39 = vpop.f32.mrf.mxu1 }
 0x62d   :  { %v478_v41 = vmax.f32 %v474_v38, 0.0 }
 0x62f   :  { %v479_v42 = vpack.c.bf16 %v478_v41, %v477_v40 }
 0x631   :  { %696 = vmatmul.mubr.msk.bf16.vlgmr.msra.gmra.mxu0 %vm516_vm5, %v479_v42 }
 0x6f1   :  { %v554_v43 = vpop.f32.mrf.mxu0 }
 0x6f2   :  { %v555_v44 = vadd.f32 %v630_v14, %v554_v43 }
 0x6f3   :  { %v697_v45 = vpop.f32.mrf.mxu0 }
 0x6f4   :  { %v561_v46 = vsel %vm50_vm0, %v555_v44, 0.0 }
 0x6f5   :  { %562 = vadd.xlane.f32.xlu0 %v561_v46  ;;  %v557_v47 = vpop.f32.mrf.mxu0 }
 0x6f6   :  { %v558_v48 = vadd.f32 %v630_v14, %v557_v47 }
 0x6f7   :  { %v698_v49 = vpop.f32.mrf.mxu0 }
 0x6f8   :  { %v564_v50 = vsel %vm54_vm1, %v558_v48, 0.0 }
 0x6f9   :  { %565 = vadd.xlane.f32.xlu1 %v564_v50 }
 0x77e   :  { %v563_v51 = vpop.xlane.xlu0 %562 }
 0x77f   :  { %v567_v52 = vmul.f32 0.03125, %v563_v51 }
 0x781   :  { %v569_v53 = vsub.f32 %v555_v44, %v567_v52 }
 0x782   :  { %v566_v54 = vpop.xlane.xlu1 %565 }
 0x783   :  { %v568_v55 = vmul.f32 0.03125, %v566_v54  ;;  %v571_v56 = vmul.f32 %v569_v53, %v569_v53 }
 0x785   :  { %v570_v58 = vsub.f32 %v558_v48, %v568_v55  ;;  %v573_v59 = vsel %vm50_vm0, %v571_v56, 0.0 }
 0x786   :  { %574 = vadd.xlane.f32.xlu0 %v573_v59 }
 0x787   :  { %v572_v60 = vmul.f32 %v570_v58, %v570_v58 }
 0x789   :  { %v576_v62 = vsel %vm54_vm1, %v572_v60, 0.0 }
 0x78a   :  { %577 = vadd.xlane.f32.xlu1 %v576_v62 }
 0x80f   :  { %v575_v63 = vpop.xlane.xlu0 %574 }
 0x810   :  { %v579_v2 = vmul.f32 0.03125, %v575_v63 }
 0x812   :  { %v581_v3 = vadd.f32 1e-05, %v579_v2 }
 0x813   :  { %v578_v4 = vpop.xlane.xlu1 %577 }
 0x814   :  { %739 = vrsqrt.f32 %v581_v3  ;;  %v580_v0 = vmul.f32 0.03125, %v578_v4 }
 0x816   :  { %v582_v5 = vadd.f32 1e-05, %v580_v0 }
 0x818   :  { %741 = vrsqrt.f32 %v582_v5 }
 0x821   :  { %v740_v6 = vpop.eup %739 }
 0x822   :  { %v585_v8 = vmul.f32 %v740_v6, %v569_v53 }
 0x824   :  { %v591_v9 = vmul.f32 %v636_v7, %v585_v8 }
 0x825   :  { %v742_v10 = vpop.eup %741 }
 0x826   :  { %v597_v11 = vadd.f32 %v637_v1, %v591_v9  ;;  %v586_v12 = vmul.f32 %v742_v10, %v570_v58 }
 0x828   :  { %v599_v13 = vadd.f32 %v597_v11, %v910_v57  ;;  %v592_v15 = vmul.f32 %v636_v7, %v586_v12 }
 0x82a   :  { %601 = vst.msk [vmem:[%s988_s10] sm:$0xff] %vm50_vm0, %v599_v13  ;;  %v598_v16 = vadd.f32 %v637_v1, %v592_v15 }
 0x82c   :  { %v600_v17 = vadd.f32 %v598_v16, %v915_v61 }
 0x82e   :  { %602 = vst.msk [vmem:[%s988_s10 + $0x8] sm:$0x3f] %vm54_vm1, %v600_v17 }

// kernel: autoencoder_factorized_attention_block.18
= control target key start
LH: loop header
LB: loop body
LE: loop exit
PB: predicated region body
PF: predicated region fallthrough
CT: control target
= control target key end

     0   :  { %s605_s0 = inlined_call_operand.vmem [shape: s32[2,10], index: 0, kind: input, shape index: {}]   ;;  %s606_s1 = inlined_call_operand.vmem [shape: f32[6,1,128], index: 1, kind: input, shape index: {}, may-alias: {1,2}]   ;;  %s607_s2 = inlined_call_operand.vmem [shape: f32[6,1,128], index: 2, kind: input, shape index: {}, may-alias: {1,2}]   ;;  %s608_s3 = inlined_call_operand.vmem [shape: f32[32,32], index: 3, kind: input, shape index: {}]   ;;  %s609_s4 = inlined_call_operand.vmem [shape: f32[6,32], index: 4, kind: output, shape index: {0}]   ;;  %s610_s5 = inlined_call_operand.vmem [shape: f32[6,32], index: 5, kind: output, shape index: {1}]  }
   0x1   :  { %s11_s20 = sshll.u32 %s605_s0, 4  ;;  %s12_s20 = int_to_ptr.vmem [resolvable:$true] %s11_s20 }
   0x2   :  { %s487_s21 = scalar_lea.vmem %s12_s20, 32  ;;  %p492_p1 = scmp.lt.s32.totalorder %s12_s20, %s12_s20 }
   0x3   :  { %p488_p0 = scmp.ne.s32.totalorder %s12_s20, %s487_s21  ;;  %p493_p2 = scmp.lt.s32.totalorder %s487_s21, %s487_s21 }
   0x5   :  { %p494_p3 = por %p493_p2, %p492_p1 }
   0x7   :  { %p495_p4 = pnand %p494_p3, %p488_p0 }
   0x9   :  { %498 = shalt.err (!%p495_p4)  }
   0xa   :  { %s509_s22 = smov [#allocation4]  }
   0xb   :  { %14 = dma.vmem_to_smem %s12_s20, 32, %s509_s22, [#allocation3] }
   0xc   :  { %503 = dma.done.wait [#allocation3], 32 }
   0xd   :  { %504 = vsyncadd [#allocation3], 4294967264 }
   0xe   :  { %16 = sfence }
   0xf   :  { %s549_s23 = smov 0  }
  0x10 LB: > { %s432_s0 = sadd.s32 4294967295, %s507_s23   ;;  %p437_p5 = scmp.ge.s32.totalorder %s507_s23, 1  ;;  %s507_s23 = sphi %s549_s23, %s22_s23  }
  0x11   : > { %p204_p6 = scmp.lt.s32.totalorder %s507_s23, 11 }
  0x13   : > { %p205_p7 = pnand %p437_p5, %p204_p6 }
  0x14   : > { %s235_s24 = sshra.s32 (!%p205_p7), %s432_s0, 7  ;;  %s240_s25 = sand.u32 (!%p205_p7), 127, %s432_s0 }
  0x15   : > { %208 = sbr.rel (%p205_p7) target bundleno = 374 (0x176), region = 32  ;;  %s448_s26 = sshll.u32 (!%p205_p7), %s235_s24, 7 }
  0x16   : > { %s254_s27 = sld [smem:[#allocation4 + %s432_s0]] (!%p205_p7)  ;;  %s449_s28 = sadd.s32 (!%p205_p7), 128, %s448_s26 }
  0x17   : > { %s557_s29 = sadd.s32 (!%p205_p7), %s449_s28, %s240_s25  ;;  %p439_p10 = scmp.ne.s32.totalorder (!%p205_p7), %s432_s0, 0 }
  0x18   : > { %s242_s30 = sld [smem:[#allocation4 + %s557_s29]] (!%p205_p7) }
  0x1c   : > { %p255_p8 = scmp.lt.s32.totalorder %s254_s27, 5 }
  0x1d   : > { %262 = sbr.rel (%p439_p10) target bundleno = 37 (0x25), region = 36 }
  0x1e   : > { %s612_s27 = smov (!%p255_p8, %s254_s27), 5  ;;  %p243_p9 = scmp.lt.s32.totalorder %s242_s30, 5 }
  0x1f   : > { %s257_s8 = scalar_lea.vmem %s607_s2, %s612_s27 }
  0x20   : > { %s614_s30 = smov (!%p243_p9, %s242_s30), 5 }
  0x21   : > { %s245_s11 = scalar_lea.vmem %s606_s1, %s614_s30 }
  0x22   : > { %vm263_vm0 = vcmask 259072   ;;  %v510_v0 = vmov -1e+30   ;;  %v511_v1 = vmov 0.0  }
  0x23   : > { %264 = vst.msk [vmem:[#allocation2] sm:$0x3f] %vm263_vm0, %v510_v0  ;;  %265 = vst.msk [vmem:[%s609_s4] sm:$0x3f] %vm263_vm0, %v511_v1 }
  0x24   : > { %266 = vst.msk [vmem:[%s610_s5] sm:$0x3f] %vm263_vm0, %v511_v1 }
  0x25 PF: > { %v276_v2 = vld [vmem:[%s257_s8] sm:$0x1]  ;;  %v379_v3 = vlaneseq  ;;  %v285_v4 = vld [vmem:[%s608_s3 + $0x18] sm:$0xff]  ;;  %s512_s18 = smov 96   ;;  %v513_v5 = vmov 0.0   ;;  %v284_v6 = vld [vmem:[%s608_s3 + $0x10] sm:$0xff] }
  0x26   : > { %278 = vrot.lane.b32.xlu0 %v276_v2, %s512_s18  ;;  %457 = vmatprep.subr.mxu0 %v513_v5  ;;  %vm514_vm1 = vmmov 0   ;;  %v283_v8 = vld [vmem:[%s608_s3 + $0x8] sm:$0xff]  ;;  %v282_v10 = vld [vmem:[%s608_s3] sm:$0xff]  ;;  %s515_s25 = smov 64   ;;  %vm286_vm2 = vcmask 261120   ;;  %s274_s28 = sld [smem:[#allocation4 + %s557_s29]] }
  0x27   : > { %v380_v7 = vshrl.u32 %v379_v3, 7  ;;  %458 = vmatpush3.msra.mxu0 %v285_v4  ;;  %465 = vmatprep.mubr.msk.f32.mxu0 %vm514_vm1, %v513_v5  ;;  %v275_v12 = vld [vmem:[%s245_s11] sm:$0x1]  ;;  %vm369_vm3 = vcmask 253952  }
  0x28   : > { %459 = vmatprep.subr.mxu0 %v513_v5 }
  0x29   : > { %v381_v9 = vsub.s32 0, %v380_v7  ;;  %460 = vmatpush3.msra.mxu0 %v284_v6 }
  0x2a   : > { %461 = vmatprep.subr.mxu0 %v513_v5 }
  0x2b   : > { %v382_v11 = vrot.slane %v276_v2, %v381_v9  ;;  %462 = vmatpush3.msra.mxu0 %v283_v8 }
  0x2c   : > { %463 = vmatprep.subr.mxu0 %v513_v5  ;;  %s360_s6 = scalar_lea.vmem [#allocation2], %s274_s28  ;;  %s371_s8 = scalar_lea.vmem %s609_s4, %s274_s28 }
  0x2d   : > { %464 = vmatpush3.msra.mxu0 %v282_v10  ;;  %383 = vrot.lane.b32.xlu0 %v382_v11, %s515_s25  ;;  %v361_v15 = vld [vmem:[%s360_s6] sm:$0x1]  ;;  %s376_s10 = scalar_lea.vmem %s610_s5, %s274_s28 }
  0x2e   : > { %v372_v23 = vld [vmem:[%s371_s8] sm:$0x1] }
  0x2f   : > { %v377_v24 = vld [vmem:[%s376_s10] sm:$0x1] }
  0x98   : > { %v279_v13 = vpop.permute.xlu0 %278 }
  0x99   : > { %v281_v14 = vmul.f32 %v279_v13, %v275_v12 }
  0x9b   : > { %466 = vmatmul.mubr.msk.f32.vlgmr.msra.gmra.mxu0 %vm286_vm2, %v281_v14 }
  0x9f   : > { %v384_v25 = vpop.permute.xlu0 %383 }
 0x15b   : > { %v356_v16 = vpop.f32.mrf.mxu0 }
 0x15c   : > { %v362_v17 = vmax.f32 %v361_v15, %v356_v16 }
 0x15d   : > { %v467_v18 = vpop.f32.mrf.mxu0 }
 0x15e   : > { %v363_v19 = vsub.f32 %v361_v15, %v362_v17  ;;  %v366_v20 = vsub.f32 %v356_v16, %v362_v17  ;;  %370 = vst.msk [vmem:[%s360_s6] sm:$0x1] %vm369_vm3, %v362_v17 }
 0x160   : > { %v364_v21 = vmul.f32 1.442695, %v363_v19  ;;  %v367_v22 = vmul.f32 1.442695, %v366_v20 }
 0x162   : > { %483 = vpow2.f32 %v364_v21 }
 0x163   : > { %485 = vpow2.f32 %v367_v22 }
 0x16f   : > { %v484_v26 = vpop.eup %483 }
 0x170   : > { %v486_v27 = vpop.eup %485  ;;  %v373_v28 = vmul.f32 %v484_v26, %v372_v23  ;;  %v378_v29 = vmul.f32 %v484_v26, %v377_v24 }
 0x171   : > { %v386_v30 = vmul.f32 %v486_v27, %v384_v25 }
 0x172   : > { %v374_v31 = vadd.f32 %v486_v27, %v373_v28 }
 0x173   : > { %v387_v32 = vadd.f32 %v386_v30, %v378_v29 }
 0x174   : > { %375 = vst.msk [vmem:[%s371_s8] sm:$0x1] %vm369_vm3, %v374_v31 }
 0x175   : > { %388 = vst.msk [vmem:[%s376_s10] sm:$0x1] %vm369_vm3, %v387_v32 }
 0x176 PF: > { %s22_s23 = sadd.s32 1, %s507_s23  }
 0x177   : > { %p19_p11 = scmp.ge.s32.totalorder %s22_s23, 12  }
 0x179   :  { %21 = sbr.rel (!%p19_p11) target bundleno = 16 (0x10), region = 76 }

// kernel: autoencoder_factorized_attention_block.20
= control target key start
LH: loop header
LB: loop body
LE: loop exit
PB: predicated region body
PF: predicated region fallthrough
CT: control target
= control target key end

     0   :  { %s436_s0 = inlined_call_operand.vmem [shape: s32[2,12], index: 0, kind: input, shape index: {}]   ;;  %s437_s1 = inlined_call_operand.vmem [shape: f32[8,1,32], index: 1, kind: input, shape index: {}, may-alias: {1,2}]   ;;  %s438_s2 = inlined_call_operand.vmem [shape: f32[8,1,32], index: 2, kind: input, shape index: {}, may-alias: {1,2}]   ;;  %s439_s3 = inlined_call_operand.vmem [shape: f32[12,1,32], index: 3, kind: output, shape index: {0}]   ;;  %s440_s4 = inlined_call_operand.vmem [shape: f32[12,1,32], index: 4, kind: output, shape index: {1}]  }
   0x1   :  { %s10_s17 = sshll.u32 %s436_s0, 4  ;;  %s11_s17 = int_to_ptr.vmem [resolvable:$true] %s10_s17 }
   0x2   :  { %s362_s18 = scalar_lea.vmem %s11_s17, 32  ;;  %p367_p1 = scmp.lt.s32.totalorder %s11_s17, %s11_s17 }
   0x3   :  { %p363_p0 = scmp.ne.s32.totalorder %s11_s17, %s362_s18  ;;  %p368_p2 = scmp.lt.s32.totalorder %s362_s18, %s362_s18 }
   0x5   :  { %p369_p3 = por %p368_p2, %p367_p1 }
   0x7   :  { %p370_p4 = pnand %p369_p3, %p363_p0 }
   0x9   :  { %373 = shalt.err (!%p370_p4)  }
   0xa   :  { %s384_s19 = smov [#allocation3]  }
   0xb   :  { %13 = dma.vmem_to_smem %s11_s17, 32, %s384_s19, [#allocation2] }
   0xc   :  { %378 = dma.done.wait [#allocation2], 32 }
   0xd   :  { %379 = vsyncadd [#allocation2], 4294967264 }
   0xe   :  { %15 = sfence }
   0xf   :  { %s413_s20 = smov 0  }
  0x10 LB: > { %s337_s0 = sadd.s32 4294967295, %s382_s20   ;;  %p343_p5 = scmp.ge.s32.totalorder %s382_s20, 1  ;;  %s382_s20 = sphi %s413_s20, %s21_s20  }
  0x11   : > { %p189_p6 = scmp.lt.s32.totalorder %s382_s20, 13 }
  0x13   : > { %p190_p7 = pnand %p343_p5, %p189_p6 }
  0x14   : > { %s224_s21 = sshra.s32 (!%p190_p7), %s337_s0, 7  ;;  %s229_s22 = sand.u32 (!%p190_p7), 127, %s337_s0 }
  0x15   : > { %193 = sbr.rel (%p190_p7) target bundleno = 36 (0x24), region = 28  ;;  %s351_s23 = sshll.u32 (!%p190_p7), %s224_s21, 7 }
  0x16   : > { %p248_p8 = scmp.lt.s32.totalorder (!%p190_p7), %s337_s0, 11  ;;  %s352_s24 = sadd.s32 (!%p190_p7), 128, %s351_s23 }
  0x17   : > { %s243_s25 = sld [smem:[#allocation3 + %s337_s0]] (!%p190_p7)  ;;  %s230_s26 = sadd.s32 (!%p190_p7), %s352_s24, %s229_s22 }
  0x18   : > { %s231_s27 = sld [smem:[#allocation3 + %s230_s26]] (!%p190_p7) }
  0x1a   : > { %s442_s0 = smov (!%p248_p8, %s337_s0), 11  ;;  %vm255_vm0 = vcmask 253952  }
  0x1b   : > { %s253_s30 = scalar_lea.vmem %s440_s4, %s442_s0  ;;  %s250_s7 = scalar_lea.vmem %s439_s3, %s442_s0 }
  0x1d   : > { %p244_p9 = scmp.lt.s32.totalorder %s243_s25, 7 }
  0x1e   : > { %p232_p10 = scmp.lt.s32.totalorder %s231_s27, 7 }
  0x1f   : > { %s444_s25 = smov (!%p244_p9, %s243_s25), 7 }
  0x20   : > { %s446_s27 = smov (!%p232_p10, %s231_s27), 7  ;;  %s246_s10 = scalar_lea.vmem %s438_s2, %s444_s25 }
  0x21   : > { %s234_s13 = scalar_lea.vmem %s437_s1, %s446_s27  ;;  %v257_v0 = vld [vmem:[%s246_s10] sm:$0x1] }
  0x22   : > { %v254_v1 = vld [vmem:[%s234_s13] sm:$0x1]  ;;  %258 = vst.msk [vmem:[%s253_s30] sm:$0x1] %vm255_vm0, %v257_v0 }
  0x23   : > { %256 = vst.msk [vmem:[%s250_s7] sm:$0x1] %vm255_vm0, %v254_v1 }
  0x24 PF: > { %s21_s20 = sadd.s32 1, %s382_s20  }
  0x25   : > { %p18_p11 = scmp.ge.s32.totalorder %s21_s20, 14  }
  0x27   :  { %20 = sbr.rel (!%p18_p11) target bundleno = 16 (0x10), region = 73 }

// kernel: autoencoder_factorized_attention_block.19
= control target key start
LH: loop header
LB: loop body
LE: loop exit
PB: predicated region body
PF: predicated region fallthrough
CT: control target
= control target key end

     0   :  { %vm50_vm0 = vcmask 259072   ;;  %s858_s0 = inlined_call_operand.vmem [shape: f32[6,32], index: 0, kind: input, shape index: {}]   ;;  %s859_s1 = inlined_call_operand.vmem [shape: f32[6,128], index: 1, kind: input, shape index: {}]   ;;  %s860_s2 = inlined_call_operand.vmem [shape: f32[6,32], index: 2, kind: input, shape index: {}]   ;;  %s861_s3 = inlined_call_operand.vmem [shape: f32[6,32], index: 3, kind: input, shape index: {}]   ;;  %s862_s4 = inlined_call_operand.vmem [shape: f32[12,128], index: 4, kind: input, shape index: {}]   ;;  %s863_s5 = inlined_call_operand.vmem [shape: bf16[32,32], index: 5, kind: input, shape index: {}]   ;;  %s864_s6 = inlined_call_operand.vmem [shape: bf16[32,32], index: 6, kind: input, shape index: {}]   ;;  %s865_s7 = inlined_call_operand.vmem [shape: bf16[32,32], index: 7, kind: input, shape index: {}]   ;;  %s866_s8 = inlined_call_operand.vmem [shape: bf16[32,64], index: 8, kind: input, shape index: {}]   ;;  %s867_s9 = inlined_call_operand.vmem [shape: bf16[64,32], index: 9, kind: input, shape index: {}]   ;;  %s868_s10 = inlined_call_operand.hbm [shape: f32[6,32], index: 10, kind: output, shape index: {}]  }
   0x1   :  { %v729_v0 = vld [vmem:[%s858_s0] sm:$0x3f] }
   0x2   :  { %v51_v1 = vsel %vm50_vm0, %v729_v0, 0.0 }
   0x3   :  { %52 = vadd.xlane.f32.xlu0 %v51_v1 }
   0x4   :  { %15 = vsyncpa [#allocation3], 0  ;;  %v618_v7 = vld [vmem:[%s864_s6 + $0x8] sm:$0xff]   ;;  %v666_v8 = vmov 0.0   ;;  %vm667_vm1 = vmmov 0   ;;  %v619_v9 = vld [vmem:[%s864_s6] sm:$0xff]  }
   0x5   :  { %569 = vmatprep.subr.bf16.mxu1 %v666_v8  ;;  %573 = vmatprep.mubr.msk.bf16.mxu1 %vm667_vm1, %v666_v8  ;;  %v75_v10 = vld [vmem:[%s860_s2] sm:$0x3f]  ;;  %s668_s6 = smov 96   ;;  %s669_s26 = smov 32   ;;  %vm105_vm3 = vcmask 261120   ;;  %v620_v28 = vld [vmem:[%s863_s5 + $0x8] sm:$0xff]  }
   0x6   :  { %570 = vmatpush3.bf16.msra.mxu1 %v618_v7  ;;  %585 = vmatprep.subr.bf16.mxu0 %v666_v8  ;;  %v77_v11 = vmax.f32 %v75_v10, 1e-30  ;;  %v76_v13 = vld [vmem:[%s861_s3] sm:$0x3f]  ;;  %vm79_vm2 = vcmp.gt.f32.partialorder %v75_v10, 0.0  ;;  %v622_v32 = vld [vmem:[%s865_s7 + $0x8] sm:$0xff]  }
   0x7   :  { %571 = vmatprep.subr.bf16.mxu1 %v666_v8  ;;  %589 = vmatprep.mubr.msk.bf16.mxu0 %vm667_vm1, %v666_v8  ;;  %v82_v19 = vld [vmem:[%s859_s1] sm:$0x3f]  ;;  %vm439_vm4 = vcmask 523264   ;;  %s670_s15 = smov [#allocation2]  }
   0x8   :  { %630 = vrcp.f32 %v77_v11  ;;  %v522_v21 = vld [vmem:[%s862_s4] ss:$0 sm:$0xff]  ;;  %v523_v25 = vld [vmem:[%s862_s4 + $0x1] ss:$0 sm:$0xff]  ;;  %586 = vmatpush3.bf16.msra.mxu0 %v622_v32  ;;  %v530_v38 = vld [vmem:[%s862_s4 + $0x2] ss:$0 sm:$0xff] }
   0x9   :  { %v621_v30 = vld [vmem:[%s863_s5] sm:$0xff]   ;;  %587 = vmatprep.subr.bf16.mxu0 %v666_v8  ;;  %v628_v32 = vld [vmem:[%s867_s9 + $0x8] sm:$0xff]   ;;  %s514_s16 = sshll.u32 %s670_s15, 4  ;;  %s515_s16 = int_to_ptr.vmem [resolvable:$true] %s514_s16 }
   0xa   :  { %572 = vmatpush3.bf16.msra.mxu1 %v619_v9  ;;  %v623_v33 = vld [vmem:[%s865_s7] sm:$0xff]   ;;  %s644_s0 = scalar_lea.vmem %s515_s16, 128  ;;  %p649_p1 = scmp.lt.s32.totalorder %s515_s16, %s515_s16 }
   0xb   :  { %577 = vmatprep.subr.bf16.mxu1 %v666_v8  ;;  %v532_v53 = vld [vmem:[%s862_s4 + $0x3] ss:$0 sm:$0xff]  ;;  %v537_v9 = vld [vmem:[%s862_s4 + $0x5] ss:$0 sm:$0xff]  ;;  %p645_p0 = scmp.ne.s32.totalorder %s515_s16, %s644_s0  ;;  %p650_p2 = scmp.lt.s32.totalorder %s644_s0, %s644_s0 }
   0xc   :  { %588 = vmatpush3.bf16.msra.mxu0 %v623_v33  ;;  %v629_v33 = vld [vmem:[%s867_s9] sm:$0xff]  }
   0xd   :  { %601 = vmatprep.subr.bf16.mxu0 %v666_v8  ;;  %p651_p3 = por %p650_p2, %p649_p1 }
   0xf   :  { %p652_p4 = pnand %p651_p3, %p645_p0 }
  0x15   :  { %v631_v12 = vpop.eup %630 }
  0x16   :  { %v80_v14 = vmul.f32 %v631_v12, %v76_v13 }
  0x18   :  { %v81_v15 = vsel %vm79_vm2, %v80_v14, 0.0 }
  0x19   :  { %216 = vrot.lane.b32.xlu1 %v81_v15, %s668_s6  ;;  %v83_v31 = vpack.c.bf16 %v81_v15, %v81_v15 }
  0x8b   :  { %v217_v22 = vpop.permute.xlu1 %216 }
  0x8c   :  { %v53_v2 = vpop.xlane.xlu0 %52  ;;  %v219_v24 = vsub.f32 %v82_v19, %v217_v22  ;;  %v624_v19 = vld [vmem:[%s866_s8 + $0x8] sm:$0xff]  }
  0x8d   :  { %v55_v3 = vmul.f32 0.03125, %v53_v2 }
  0x8e   :  { %221 = vrot.lane.b32.xlu1 %v219_v24, %s669_s26 }
  0x8f   :  { %v56_v4 = vsub.f32 %v729_v0, %v55_v3 }
  0x91   :  { %v57_v5 = vmul.f32 %v56_v4, %v56_v4 }
  0x93   :  { %v58_v6 = vsel %vm50_vm0, %v57_v5, 0.0 }
  0x94   :  { %59 = vadd.xlane.f32.xlu0 %v58_v6  ;;  %v536_v6 = vld [vmem:[%s862_s4 + $0x4] ss:$0 sm:$0xff] }
 0x100   :  { %v222_v48 = vpop.permute.xlu1 %221 }
 0x11d   :  { %v60_v16 = vpop.xlane.xlu0 %59 }
 0x11e   :  { %v61_v17 = vmul.f32 0.03125, %v60_v16 }
 0x120   :  { %v62_v18 = vadd.f32 1e-05, %v61_v17 }
 0x122   :  { %632 = vrsqrt.f32 %v62_v18 }
 0x12f   :  { %v633_v20 = vpop.eup %632 }
 0x130   :  { %v64_v23 = vmul.f32 %v633_v20, %v56_v4  ;;  %v626_v20 = vld [vmem:[%s867_s9 + $0x18] sm:$0xff]  }
 0x132   :  { %v69_v26 = vmul.f32 %v522_v21, %v64_v23  ;;  %v627_v21 = vld [vmem:[%s867_s9 + $0x10] sm:$0xff]  }
 0x134   :  { %v74_v27 = vadd.f32 %v523_v25, %v69_v26  ;;  %v538_v26 = vld [vmem:[%s862_s4 + $0x6] ss:$0 sm:$0xff] }
 0x136   :  { %v88_v29 = vpack.c.bf16 %v74_v27, %v74_v27 }
 0x138   :  { %574 = vmatmul.mubr.msk.bf16.vlgmr.msra.gmra.mxu1 %vm105_vm3, %v88_v29 }
 0x139   :  { %578 = vmatpush3.bf16.msra.mxu1 %v620_v28  ;;  %581 = vmatprep.mubr.msk.bf16.mxu1 %vm667_vm1, %v666_v8  ;;  %v539_v28 = vld [vmem:[%s862_s4 + $0x7] ss:$0 sm:$0xff] }
 0x13a   :  { %579 = vmatprep.subr.bf16.mxu1 %v666_v8 }
 0x13d   :  { %580 = vmatpush3.bf16.msra.mxu1 %v621_v30 }
 0x13e   :  { %593 = vmatprep.subr.bf16.mxu1 %v666_v8 }
 0x140   :  { %582 = vmatmul.mubr.msk.bf16.vlgmr.msra.gmra.mxu1 %vm105_vm3, %v83_v31 }
 0x141   :  { %597 = vmatprep.mubr.msk.bf16.mxu1 %vm667_vm1, %v666_v8  ;;  %594 = vmatpush3.bf16.msra.mxu1 %v624_v19 }
 0x142   :  { %595 = vmatprep.subr.bf16.mxu1 %v666_v8 }
 0x1f8   :  { %v143_v34 = vpop.f32.mrf.mxu1 }
 0x1fa   :  { %v575_v35 = vpop.f32.mrf.mxu1 }
 0x1fc   :  { %v146_v36 = vpop.f32.mrf.mxu1 }
 0x1fe   :  { %v576_v37 = vpop.f32.mrf.mxu1 }
 0x200   :  { %v198_v39 = vpop.f32.mrf.mxu1 }
 0x201   :  { %v199_v40 = vadd.f32 %v198_v39, %v143_v34  ;;  %v540_v34 = vld [vmem:[%s862_s4 + $0x8] ss:$0 sm:$0xff] }
 0x202   :  { %v583_v41 = vpop.f32.mrf.mxu1 }
 0x203   :  { %v208_v42 = vadd.f32 %v530_v38, %v199_v40 }
 0x204   :  { %v201_v43 = vpop.f32.mrf.mxu1 }
 0x205   :  { %v531_v44 = vmul.f32 -1.442695, %v208_v42 }
 0x206   :  { %v584_v45 = vpop.f32.mrf.mxu1 }
 0x207   :  { %634 = vpow2.f32 %v531_v44 }
 0x214   :  { %v635_v46 = vpop.eup %634 }
 0x215   :  { %v212_v47 = vadd.f32 1.0, %v635_v46 }
 0x217   :  { %636 = vrcp.f32 %v212_v47 }
 0x224   :  { %v637_v49 = vpop.eup %636 }
 0x225   :  { %v224_v50 = vmul.f32 %v637_v49, %v222_v48 }
 0x227   :  { %v225_v51 = vadd.f32 %v224_v50, %v81_v15 }
 0x229   :  { %v226_v52 = vpack.c.bf16 %v225_v51, %v225_v51 }
 0x22b   :  { %590 = vmatmul.mubr.msk.bf16.vlgmr.msra.gmra.mxu0 %vm105_vm3, %v226_v52 }
 0x22c   :  { %609 = vmatprep.mubr.msk.bf16.mxu0 %vm667_vm1, %v666_v8  ;;  %602 = vmatpush3.bf16.msra.mxu0 %v626_v20 }
 0x22d   :  { %603 = vmatprep.subr.bf16.mxu0 %v666_v8 }
 0x230   :  { %604 = vmatpush3.bf16.msra.mxu0 %v627_v21 }
 0x231   :  { %605 = vmatprep.subr.bf16.mxu0 %v666_v8 }
 0x234   :  { %606 = vmatpush3.bf16.msra.mxu0 %v628_v32 }
 0x235   :  { %607 = vmatprep.subr.bf16.mxu0 %v666_v8  ;;  %v544_v8 = vld [vmem:[%s862_s4 + $0x9] ss:$0 sm:$0xff] }
 0x238   :  { %608 = vmatpush3.bf16.msra.mxu0 %v629_v33 }
 0x2eb   :  { %v284_v54 = vpop.f32.mrf.mxu0 }
 0x2ec   :  { %v285_v55 = vadd.f32 %v532_v53, %v284_v54 }
 0x2ed   :  { %v591_v56 = vpop.f32.mrf.mxu0 }
 0x2ee   :  { %v290_v57 = vsel %vm50_vm0, %v285_v55, 0.0 }
 0x2ef   :  { %291 = vadd.xlane.f32.xlu0 %v290_v57  ;;  %v287_v58 = vpop.f32.mrf.mxu0  ;;  %v550_v57 = vld [vmem:[%s862_s4 + $0xa] ss:$0 sm:$0xff] }
 0x2f1   :  { %v592_v59 = vpop.f32.mrf.mxu0 }
 0x2f2   :  { %v551_v59 = vld [vmem:[%s862_s4 + $0xb] ss:$0 sm:$0xff] }
 0x378   :  { %v292_v60 = vpop.xlane.xlu0 %291 }
 0x379   :  { %v293_v61 = vmul.f32 0.03125, %v292_v60 }
 0x37b   :  { %v294_v62 = vsub.f32 %v285_v55, %v293_v61 }
 0x37d   :  { %v295_v63 = vmul.f32 %v294_v62, %v294_v62 }
 0x37f   :  { %v296_v1 = vsel %vm50_vm0, %v295_v63, 0.0 }
 0x380   :  { %297 = vadd.xlane.f32.xlu1 %v296_v1 }
 0x409   :  { %v298_v2 = vpop.xlane.xlu1 %297 }
 0x40a   :  { %v299_v3 = vmul.f32 0.03125, %v298_v2 }
 0x40c   :  { %v300_v4 = vadd.f32 1e-05, %v299_v3 }
 0x40e   :  { %638 = vrsqrt.f32 %v300_v4 }
 0x41b   :  { %v639_v5 = vpop.eup %638 }
 0x41c   :  { %v302_v7 = vmul.f32 %v639_v5, %v294_v62 }
 0x41e   :  { %v307_v10 = vmul.f32 %v536_v6, %v302_v7 }
 0x420   :  { %v312_v11 = vadd.f32 %v537_v9, %v307_v10 }
 0x422   :  { %v804_v12 = vadd.f32 %v312_v11, %v729_v0  ;;  %v625_v0 = vld [vmem:[%s866_s8] sm:$0xff]  }
 0x423   :  { %596 = vmatpush3.bf16.msra.mxu1 %v625_v0 }
 0x424   :  { %v314_v13 = vsel %vm50_vm0, %v804_v12, 0.0 }
 0x425   :  { %315 = vadd.xlane.f32.xlu0 %v314_v13 }
 0x4ae   :  { %v316_v14 = vpop.xlane.xlu0 %315 }
 0x4af   :  { %v317_v15 = vmul.f32 0.03125, %v316_v14 }
 0x4b1   :  { %v318_v16 = vsub.f32 %v804_v12, %v317_v15 }
 0x4b3   :  { %v319_v17 = vmul.f32 %v318_v16, %v318_v16 }
 0x4b5   :  { %v320_v18 = vsel %vm50_vm0, %v319_v17, 0.0 }
 0x4b6   :  { %321 = vadd.xlane.f32.xlu0 %v320_v18 }
 0x53f   :  { %v322_v22 = vpop.xlane.xlu0 %321 }
 0x540   :  { %v323_v23 = vmul.f32 0.03125, %v322_v22 }
 0x542   :  { %v324_v24 = vadd.f32 1e-05, %v323_v23 }
 0x544   :  { %640 = vrsqrt.f32 %v324_v24 }
 0x551   :  { %v641_v25 = vpop.eup %640 }
 0x552   :  { %v326_v27 = vmul.f32 %v641_v25, %v318_v16 }
 0x554   :  { %v331_v29 = vmul.f32 %v538_v26, %v326_v27 }
 0x556   :  { %v336_v30 = vadd.f32 %v539_v28, %v331_v29 }
 0x558   :  { %v337_v31 = vpack.c.bf16 %v336_v30, %v336_v30 }
 0x55a   :  { %598 = vmatmul.mubr.msk.bf16.vlgmr.msra.gmra.mxu1 %vm105_vm3, %v337_v31 }
 0x61a   :  { %v395_v35 = vpop.f32.mrf.mxu1 }
 0x61b   :  { %v396_v36 = vadd.f32 %v540_v34, %v395_v35 }
 0x61c   :  { %v599_v37 = vpop.f32.mrf.mxu1 }
 0x61d   :  { %v401_v38 = vmax.f32 %v396_v36, 0.0 }
 0x61e   :  { %v398_v39 = vpop.f32.mrf.mxu1 }
 0x61f   :  { %v402_v40 = vpack.c.bf16 %v401_v38, %v401_v38 }
 0x620   :  { %v600_v41 = vpop.f32.mrf.mxu1 }
 0x621   :  { %610 = vmatmul.mubr.msk.bf16.vlgmr.msra.gmra.mxu0 %vm439_vm4, %v402_v40 }
 0x6e1   :  { %v477_v42 = vpop.f32.mrf.mxu0 }
 0x6e2   :  { %v478_v43 = vadd.f32 %v544_v8, %v477_v42 }
 0x6e3   :  { %v611_v44 = vpop.f32.mrf.mxu0 }
 0x6e4   :  { %v483_v45 = vsel %vm50_vm0, %v478_v43, 0.0 }
 0x6e5   :  { %484 = vadd.xlane.f32.xlu0 %v483_v45  ;;  %v480_v46 = vpop.f32.mrf.mxu0 }
 0x6e7   :  { %v612_v47 = vpop.f32.mrf.mxu0 }
 0x76e   :  { %v485_v48 = vpop.xlane.xlu0 %484 }
 0x76f   :  { %v486_v49 = vmul.f32 0.03125, %v485_v48 }
 0x771   :  { %v487_v50 = vsub.f32 %v478_v43, %v486_v49 }
 0x773   :  { %v488_v51 = vmul.f32 %v487_v50, %v487_v50 }
 0x775   :  { %v489_v52 = vsel %vm50_vm0, %v488_v51, 0.0 }
 0x776   :  { %490 = vadd.xlane.f32.xlu0 %v489_v52 }
 0x7ff   :  { %v491_v53 = vpop.xlane.xlu0 %490 }
 0x800   :  { %v492_v54 = vmul.f32 0.03125, %v491_v53 }
 0x802   :  { %v493_v55 = vadd.f32 1e-05, %v492_v54 }
 0x804   :  { %642 = vrsqrt.f32 %v493_v55 }
 0x811   :  { %v643_v56 = vpop.eup %642 }
 0x812   :  { %v495_v58 = vmul.f32 %v643_v56, %v487_v50 }
 0x814   :  { %v500_v60 = vmul.f32 %v550_v57, %v495_v58 }
 0x816   :  { %v505_v61 = vadd.f32 %v551_v59, %v500_v60 }
 0x818   :  { %v506_v62 = vadd.f32 %v505_v61, %v804_v12 }
 0x81a   :  { %507 = vst.msk [vmem:[#allocation2] sm:$0x3f] %vm50_vm0, %v506_v62 }
 0x81b   :  { %655 = shalt.err (!%p652_p4)
}
 0x81c   :  { %517 = dma.vmem_to_hbm [thread:$0]  %s515_s16, 128, %s868_s10, [#allocation3]  }
 0x81d   :  { %664 = dma.done.wait [#allocation3], 128  }
 0x81e   :  { %665 = vsyncadd [#allocation3], 4294967168 }
 0x81f   :  { %521 = vsyncpa [#allocation3], 1 }

// kernel: autoencoder_factorized_attention_block.21
= control target key start
LH: loop header
LB: loop body
LE: loop exit
PB: predicated region body
PF: predicated region fallthrough
CT: control target
= control target key end

     0   :  { %v1112_v1 = vmov 0.0   ;;  %vm1113_vm0 = vmmov 0   ;;  %vm84_vm1 = vcmask 261120   ;;  %s1391_s0 = inlined_call_operand.vmem [shape: f32[12,32], index: 0, kind: input, shape index: {}]   ;;  %s1392_s1 = inlined_call_operand.vmem [shape: f32[12,32], index: 1, kind: input, shape index: {}]   ;;  %s1393_s2 = inlined_call_operand.vmem [shape: f32[12,16], index: 2, kind: input, shape index: {}]   ;;  %s1394_s3 = inlined_call_operand.vmem [shape: f32[18,128], index: 3, kind: input, shape index: {}]   ;;  %s1395_s4 = inlined_call_operand.vmem [shape: bf16[32,16], index: 4, kind: input, shape index: {}]   ;;  %s1396_s5 = inlined_call_operand.vmem [shape: bf16[32,16], index: 5, kind: input, shape index: {}]   ;;  %s1397_s6 = inlined_call_operand.vmem [shape: bf16[16,16], index: 6, kind: input, shape index: {}]   ;;  %s1398_s7 = inlined_call_operand.vmem [shape: bf16[32,16], index: 7, kind: input, shape index: {}]   ;;  %s1399_s8 = inlined_call_operand.vmem [shape: bf16[32,16], index: 8, kind: input, shape index: {}]   ;;  %s1400_s9 = inlined_call_operand.vmem [shape: bf16[16,16], index: 9, kind: input, shape index: {}]   ;;  %s1401_s10 = inlined_call_operand.vmem [shape: bf16[16,16], index: 10, kind: input, shape index: {}]   ;;  %s1402_s11 = inlined_call_operand.vmem [shape: bf16[16,16], index: 11, kind: input, shape index: {}]   ;;  %s1403_s12 = inlined_call_operand.vmem [shape: bf16[16,16], index: 12, kind: input, shape index: {}]   ;;  %s1404_s13 = inlined_call_operand.vmem [shape: bf16[16,16], index: 13, kind: input, shape index: {}]   ;;  %s1405_s14 = inlined_call_operand.hbm [shape: f32[12,16], index: 14, kind: output, shape index: {}]  }
   0x1   :  { %v1052_v0 = vld [vmem:[%s1396_s5 + $0x8] sm:$0xff]   ;;  %979 = vmatprep.subr.bf16.mxu0 %v1112_v1  ;;  %987 = vmatprep.subr.bf16.mxu1 %v1112_v1  ;;  %v1054_v3 = vld [vmem:[%s1396_s5] sm:$0xff]  }
   0x2   :  { %v1053_v2 = vld [vmem:[%s1395_s4 + $0x8] sm:$0xff]   ;;  %980 = vmatpush3.bf16.msra.mxu0 %v1052_v0  ;;  %983 = vmatprep.mubr.msk.bf16.mxu0 %vm1113_vm0, %v1112_v1  ;;  %v1055_v4 = vld [vmem:[%s1395_s4] sm:$0xff]  }
   0x3   :  { %988 = vmatpush3.bf16.msra.mxu1 %v1053_v2  ;;  %981 = vmatprep.subr.bf16.mxu0 %v1112_v1  ;;  %v51_v5 = vld [vmem:[%s1392_s1] sm:$0xff]  ;;  %v52_v6 = vld [vmem:[%s1392_s1 + $0x8] sm:$0xf] }
   0x4   :  { %989 = vmatprep.subr.bf16.mxu1 %v1112_v1  ;;  %991 = vmatprep.mubr.msk.bf16.mxu1 %vm1113_vm0, %v1112_v1  ;;  %v49_v7 = vld [vmem:[%s1391_s0] sm:$0xff]  ;;  %v67_v8 = vpack.c.bf16 %v52_v6, %v51_v5  ;;  %v50_v9 = vld [vmem:[%s1391_s0 + $0x8] sm:$0xf] }
   0x5   :  { %v1224_v10 = vpack.c.bf16 %v50_v9, %v49_v7 }
   0x6   :  { %982 = vmatpush3.bf16.msra.mxu0 %v1054_v3 }
   0x7   :  { %990 = vmatpush3.bf16.msra.mxu1 %v1055_v4  ;;  %995 = vmatprep.subr.bf16.mxu0 %v1112_v1 }
   0x8   :  { %1001 = vmatprep.subr.bf16.mxu1 %v1112_v1 }
   0x9   :  { %984 = vmatmul.mubr.msk.bf16.vlgmr.msra.gmra.mxu0 %vm84_vm1, %v67_v8 }
   0xa   :  { %992 = vmatmul.mubr.msk.bf16.vlgmr.msra.gmra.mxu1 %vm84_vm1, %v1224_v10  ;;  %997 = vmatprep.mubr.msk.bf16.mxu0 %vm1113_vm0, %v1112_v1 }
   0xb   :  { %1005 = vmatprep.mubr.msk.bf16.mxu1 %vm1113_vm0, %v1112_v1 }
   0xc   :  { %19 = vsyncpa [#allocation3], 0  ;;  %v919_v13 = vld [vmem:[%s1394_s3] ss:$0 sm:$0xff]  ;;  %vm191_vm2 = vcmask 130048   ;;  %vm195_vm3 = vcmask 125952  }
   0xd   :  { %v1056_v36 = vld [vmem:[%s1397_s6] sm:$0xff]   ;;  %v1057_v37 = vld [vmem:[%s1399_s8 + $0x8] sm:$0xff]   ;;  %s1114_s30 = smov [#allocation2]  }
   0xe   :  { %996 = vmatpush3.bf16.msra.mxu0 %v1056_v36  ;;  %1002 = vmatpush3.bf16.msra.mxu1 %v1057_v37  ;;  %v1058_v38 = vld [vmem:[%s1399_s8] sm:$0xff]   ;;  %v1059_v57 = vld [vmem:[%s1398_s7 + $0x8] sm:$0xff]   ;;  %s902_s15 = sshll.u32 %s1114_s30, 4  ;;  %s903_s15 = int_to_ptr.vmem [resolvable:$true] %s902_s15 }
   0xf   :  { %1003 = vmatprep.subr.bf16.mxu1 %v1112_v1  ;;  %1009 = vmatprep.subr.bf16.mxu0 %v1112_v1  ;;  %v920_v46 = vld [vmem:[%s1394_s3 + $0x1] ss:$0 sm:$0xff]  ;;  %v921_v50 = vld [vmem:[%s1394_s3 + $0x2] ss:$0 sm:$0xff]  ;;  %v922_v0 = vld [vmem:[%s1394_s3 + $0x3] ss:$0 sm:$0xff]  ;;  %p1095_p1 = scmp.lt.s32.totalorder %s903_s15, %s903_s15 }
  0x10   :  { %v1060_v59 = vld [vmem:[%s1398_s7] sm:$0xff]  }
  0x12   :  { %1004 = vmatpush3.bf16.msra.mxu1 %v1058_v38 }
  0x13   :  { %1017 = vmatprep.subr.bf16.mxu1 %v1112_v1 }
  0x15   :  { %1006 = vmatmul.mubr.msk.bf16.vlgmr.msra.gmra.mxu1 %vm84_vm1, %v67_v8 }
  0x16   :  { %1019 = vmatprep.mubr.msk.bf16.mxu1 %vm1113_vm0, %v1112_v1 }
  0xc9   :  { %v122_v11 = vpop.f32.mrf.mxu0 }
  0xca   :  { %v178_v12 = vpop.f32.mrf.mxu1 }
  0xcb   :  { %v179_v14 = vadd.f32 %v178_v12, %v122_v11  ;;  %v985_v15 = vpop.f32.mrf.mxu0  ;;  %v933_v11 = vld [vmem:[%s1394_s3 + $0x6] ss:$0 sm:$0xff] }
  0xcc   :  { %v993_v16 = vpop.f32.mrf.mxu1 }
  0xcd   :  { %v125_v17 = vpop.f32.mrf.mxu0  ;;  %v189_v18 = vadd.f32 %v919_v13, %v179_v14 }
  0xce   :  { %v181_v19 = vpop.f32.mrf.mxu1 }
  0xcf   :  { %v182_v20 = vadd.f32 %v181_v19, %v125_v17  ;;  %v986_v21 = vpop.f32.mrf.mxu0  ;;  %v192_v22 = vsel %vm191_vm2, %v189_v18, 0.0 }
  0xd0   :  { %193 = vadd.xlane.f32.xlu0 %v192_v22  ;;  %v994_v23 = vpop.f32.mrf.mxu1 }
  0xd1   :  { %v190_v24 = vadd.f32 %v919_v13, %v182_v20 }
  0xd3   :  { %v196_v25 = vsel %vm195_vm3, %v190_v24, 0.0 }
  0xd4   :  { %197 = vadd.xlane.f32.xlu0 %v196_v25 }
  0xd5   :  { %v383_v60 = vpop.f32.mrf.mxu1 }
  0xd7   :  { %v1007_v61 = vpop.f32.mrf.mxu1 }
  0xd9   :  { %v386_v62 = vpop.f32.mrf.mxu1 }
  0xdb   :  { %v1008_v63 = vpop.f32.mrf.mxu1 }
  0xdc   :  { %v934_v63 = vld [vmem:[%s1394_s3 + $0x7] ss:$0 sm:$0xff] }
 0x159   :  { %v194_v26 = vpop.xlane.xlu0 %193 }
 0x15a   :  { %v200_v27 = vmul.f32 0.0625, %v194_v26 }
 0x15c   :  { %v202_v28 = vsub.f32 %v189_v18, %v200_v27 }
 0x15d   :  { %v198_v29 = vpop.xlane.xlu0 %197 }
 0x15e   :  { %v201_v30 = vmul.f32 0.0625, %v198_v29  ;;  %v204_v31 = vmul.f32 %v202_v28, %v202_v28 }
 0x160   :  { %v203_v32 = vsub.f32 %v190_v24, %v201_v30  ;;  %v206_v33 = vsel %vm191_vm2, %v204_v31, 0.0 }
 0x161   :  { %207 = vadd.xlane.f32.xlu1 %v206_v33 }
 0x162   :  { %v205_v34 = vmul.f32 %v203_v32, %v203_v32 }
 0x164   :  { %v209_v35 = vsel %vm195_vm3, %v205_v34, 0.0 }
 0x165   :  { %210 = vadd.xlane.f32.xlu1 %v209_v35 }
 0x1ea   :  { %v208_v39 = vpop.xlane.xlu1 %207 }
 0x1eb   :  { %v212_v40 = vmul.f32 0.0625, %v208_v39 }
 0x1ed   :  { %v214_v41 = vadd.f32 1e-05, %v212_v40 }
 0x1ee   :  { %v211_v42 = vpop.xlane.xlu1 %210 }
 0x1ef   :  { %1066 = vrsqrt.f32 %v214_v41  ;;  %v213_v43 = vmul.f32 0.0625, %v211_v42  ;;  %v1061_v41 = vld [vmem:[%s1401_s10] sm:$0xff]  }
 0x1f0   :  { %v1062_v42 = vld [vmem:[%s1400_s9] sm:$0xff]   ;;  %1018 = vmatpush3.bf16.msra.mxu1 %v1061_v41 }
 0x1f1   :  { %v215_v44 = vadd.f32 1e-05, %v213_v43  ;;  %v491_v43 = vld [vmem:[%s1393_s2] sm:$0xff]  ;;  %1029 = vmatprep.subr.bf16.mxu1 %v1112_v1 }
 0x1f3   :  { %1068 = vrsqrt.f32 %v215_v44  ;;  %v492_v44 = vld [vmem:[%s1393_s2 + $0x8] sm:$0xf] }
 0x1fc   :  { %v1067_v45 = vpop.eup %1066 }
 0x1fd   :  { %v218_v47 = vmul.f32 %v1067_v45, %v202_v28  ;;  %v1304_v45 = vpack.c.bf16 %v492_v44, %v491_v43 }
 0x1ff   :  { %v224_v48 = vmul.f32 %v920_v46, %v218_v47  ;;  %1020 = vmatmul.mubr.msk.bf16.vlgmr.msra.gmra.mxu1 %vm191_vm2, %v1304_v45 }
 0x200   :  { %v1069_v49 = vpop.eup %1068  ;;  %1031 = vmatprep.mubr.msk.bf16.mxu1 %vm1113_vm0, %v1112_v1 }
 0x201   :  { %v219_v51 = vmul.f32 %v1069_v49, %v203_v32  ;;  %v230_v53 = vadd.f32 %v921_v50, %v224_v48 }
 0x203   :  { %v225_v52 = vmul.f32 %v920_v46, %v219_v51  ;;  %v232_v55 = vmax.f32 %v230_v53, 0.0 }
 0x205   :  { %v231_v54 = vadd.f32 %v921_v50, %v225_v52 }
 0x207   :  { %v233_v56 = vmax.f32 %v231_v54, 0.0 }
 0x209   :  { %v234_v58 = vpack.c.bf16 %v233_v56, %v232_v55 }
 0x20b   :  { %998 = vmatmul.mubr.msk.bf16.vlgmr.msra.gmra.mxu0 %vm191_vm2, %v234_v58 }
 0x20c   :  { %1010 = vmatpush3.bf16.msra.mxu0 %v1059_v57  ;;  %1013 = vmatprep.mubr.msk.bf16.mxu0 %vm1113_vm0, %v1112_v1 }
 0x20d   :  { %1011 = vmatprep.subr.bf16.mxu0 %v1112_v1 }
 0x210   :  { %1012 = vmatpush3.bf16.msra.mxu0 %v1060_v59 }
 0x211   :  { %1023 = vmatprep.subr.bf16.mxu0 %v1112_v1 }
 0x213   :  { %1014 = vmatmul.mubr.msk.bf16.vlgmr.msra.gmra.mxu0 %vm84_vm1, %v1224_v10 }
 0x214   :  { %1025 = vmatprep.mubr.msk.bf16.mxu0 %vm1113_vm0, %v1112_v1  ;;  %1024 = vmatpush3.bf16.msra.mxu0 %v1062_v42 }
 0x215   :  { %1035 = vmatprep.subr.bf16.mxu0 %v1112_v1 }
 0x2cb   :  { %v284_v2 = vpop.f32.mrf.mxu0 }
 0x2cc   :  { %v285_v3 = vadd.f32 %v922_v0, %v284_v2 }
 0x2cd   :  { %v999_v4 = vpop.f32.mrf.mxu0 }
 0x2ce   :  { %v291_v5 = vsel %vm191_vm2, %v285_v3, 0.0 }
 0x2cf   :  { %292 = vadd.xlane.f32.xlu0 %v291_v5  ;;  %v287_v6 = vpop.f32.mrf.mxu0 }
 0x2d0   :  { %v288_v7 = vadd.f32 %v922_v0, %v287_v6 }
 0x2d1   :  { %v1000_v8 = vpop.f32.mrf.mxu0 }
 0x2d2   :  { %v294_v9 = vsel %vm195_vm3, %v288_v7, 0.0 }
 0x2d3   :  { %295 = vadd.xlane.f32.xlu1 %v294_v9  ;;  %v436_v10 = vpop.f32.mrf.mxu0 }
 0x2d4   :  { %v437_v12 = vadd.f32 %v436_v10, %v383_v60 }
 0x2d5   :  { %v1015_v13 = vpop.f32.mrf.mxu0 }
 0x2d6   :  { %v447_v14 = vadd.f32 %v933_v11, %v437_v12 }
 0x2d7   :  { %v439_v15 = vpop.f32.mrf.mxu0 }
 0x2d8   :  { %v440_v16 = vadd.f32 %v439_v15, %v386_v62  ;;  %v449_v17 = vsel %vm191_vm2, %v447_v14, 0.0  ;;  %v925_v62 = vld [vmem:[%s1394_s3 + $0x4] ss:$0 sm:$0xff] }
 0x2d9   :  { %v1016_v18 = vpop.f32.mrf.mxu0  ;;  %450 = vadd.xlane.f32.xlu0 %v449_v17 }
 0x2da   :  { %v448_v19 = vadd.f32 %v933_v11, %v440_v16 }
 0x2dc   :  { %v452_v20 = vsel %vm195_vm3, %v448_v19, 0.0 }
 0x2dd   :  { %453 = vadd.xlane.f32.xlu1 %v452_v20  ;;  %v551_v20 = vpop.f32.mrf.mxu1 }
 0x358   :  { %v293_v21 = vpop.xlane.xlu0 %292 }
 0x359   :  { %v297_v22 = vmul.f32 0.0625, %v293_v21  ;;  %v1021_v21 = vpop.f32.mrf.mxu1 }
 0x35b   :  { %v299_v23 = vsub.f32 %v285_v3, %v297_v22  ;;  %v935_v3 = vld [vmem:[%s1394_s3 + $0x8] ss:$0 sm:$0xff]  ;;  %v554_v22 = vpop.f32.mrf.mxu1 }
 0x35c   :  { %v296_v24 = vpop.xlane.xlu1 %295 }
 0x35d   :  { %v298_v25 = vmul.f32 0.0625, %v296_v24  ;;  %v301_v26 = vmul.f32 %v299_v23, %v299_v23 }
 0x35f   :  { %v300_v27 = vsub.f32 %v288_v7, %v298_v25  ;;  %v303_v28 = vsel %vm191_vm2, %v301_v26, 0.0  ;;  %v926_v7 = vld [vmem:[%s1394_s3 + $0x5] ss:$0 sm:$0xff]  ;;  %v940_v25 = vld [vmem:[%s1394_s3 + $0x9] ss:$0 sm:$0xff] }
 0x360   :  { %304 = vadd.xlane.f32.xlu0 %v303_v28 }
 0x361   :  { %v302_v29 = vmul.f32 %v300_v27, %v300_v27 }
 0x362   :  { %v451_v30 = vpop.xlane.xlu0 %450 }
 0x363   :  { %v455_v31 = vmul.f32 0.0625, %v451_v30  ;;  %v306_v32 = vsel %vm195_vm3, %v302_v29, 0.0 }
 0x364   :  { %307 = vadd.xlane.f32.xlu1 %v306_v32 }
 0x365   :  { %v457_v33 = vsub.f32 %v447_v14, %v455_v31 }
 0x366   :  { %v454_v34 = vpop.xlane.xlu1 %453 }
 0x367   :  { %v456_v35 = vmul.f32 0.0625, %v454_v34  ;;  %v459_v36 = vmul.f32 %v457_v33, %v457_v33 }
 0x369   :  { %v458_v37 = vsub.f32 %v448_v19, %v456_v35  ;;  %v461_v38 = vsel %vm191_vm2, %v459_v36, 0.0 }
 0x36a   :  { %462 = vadd.xlane.f32.xlu0 %v461_v38 }
 0x36b   :  { %v460_v39 = vmul.f32 %v458_v37, %v458_v37 }
 0x36d   :  { %v464_v40 = vsel %vm195_vm3, %v460_v39, 0.0 }
 0x36e   :  { %465 = vadd.xlane.f32.xlu1 %v464_v40 }
 0x3e9   :  { %v305_v46 = vpop.xlane.xlu0 %304 }
 0x3ea   :  { %v309_v47 = vmul.f32 0.0625, %v305_v46  ;;  %v1063_v46 = vld [vmem:[%s1402_s11] sm:$0xff]  }
 0x3eb   :  { %1030 = vmatpush3.bf16.msra.mxu1 %v1063_v46 }
 0x3ec   :  { %v311_v50 = vadd.f32 1e-05, %v309_v47  ;;  %v1064_v47 = vld [vmem:[%s1404_s13] sm:$0xff]   ;;  %1041 = vmatprep.subr.bf16.mxu1 %v1112_v1 }
 0x3ed   :  { %v308_v48 = vpop.xlane.xlu1 %307 }
 0x3ee   :  { %v310_v49 = vmul.f32 0.0625, %v308_v48  ;;  %1070 = vrsqrt.f32 %v311_v50 }
 0x3f0   :  { %v312_v51 = vadd.f32 1e-05, %v310_v49 }
 0x3f2   :  { %1072 = vrsqrt.f32 %v312_v51 }
 0x3f3   :  { %v463_v52 = vpop.xlane.xlu0 %462 }
 0x3f4   :  { %v467_v53 = vmul.f32 0.0625, %v463_v52 }
 0x3f6   :  { %v469_v54 = vadd.f32 1e-05, %v467_v53 }
 0x3f7   :  { %v466_v55 = vpop.xlane.xlu1 %465 }
 0x3f8   :  { %1074 = vrsqrt.f32 %v469_v54  ;;  %v468_v56 = vmul.f32 0.0625, %v466_v55  ;;  %v941_v55 = vld [vmem:[%s1394_s3 + $0xa] ss:$0 sm:$0xff] }
 0x3fa   :  { %v470_v57 = vadd.f32 1e-05, %v468_v56 }
 0x3fb   :  { %v1071_v58 = vpop.eup %1070 }
 0x3fc   :  { %1076 = vrsqrt.f32 %v470_v57  ;;  %v315_v60 = vmul.f32 %v1071_v58, %v299_v23  ;;  %v1022_v23 = vpop.f32.mrf.mxu1 }
 0x3fe   :  { %v321_v4 = vmul.f32 %v925_v62, %v315_v60 }
 0x3ff   :  { %v1073_v59 = vpop.eup %1072 }
 0x400   :  { %v316_v0 = vmul.f32 %v1073_v59, %v300_v27  ;;  %v327_v12 = vadd.f32 %v926_v7, %v321_v4 }
 0x402   :  { %v322_v8 = vmul.f32 %v925_v62, %v316_v0 }
 0x404   :  { %v328_v13 = vadd.f32 %v926_v7, %v322_v8  ;;  %v943_v8 = vld [vmem:[%s1394_s3 + $0xc] ss:$0 sm:$0xff] }
 0x405   :  { %v1075_v61 = vpop.eup %1074 }
 0x406   :  { %v473_v2 = vmul.f32 %v1075_v61, %v457_v33 }
 0x408   :  { %v479_v5 = vmul.f32 %v934_v63, %v473_v2  ;;  %v1065_v2 = vld [vmem:[%s1403_s12] sm:$0xff]  }
 0x409   :  { %v1077_v6 = vpop.eup %1076 }
 0x40a   :  { %v474_v9 = vmul.f32 %v1077_v6, %v458_v37  ;;  %v485_v10 = vadd.f32 %v935_v3, %v479_v5 }
 0x40c   :  { %v480_v11 = vmul.f32 %v934_v63, %v474_v9  ;;  %v487_v15 = vadd.f32 %v485_v10, %v327_v12 }
 0x40e   :  { %v486_v14 = vadd.f32 %v935_v3, %v480_v11  ;;  %v489_v17 = vmax.f32 %v487_v15, 0.0 }
 0x410   :  { %v488_v16 = vadd.f32 %v486_v14, %v328_v13 }
 0x412   :  { %v490_v18 = vmax.f32 %v488_v16, 0.0 }
 0x414   :  { %v1324_v19 = vpack.c.bf16 %v490_v18, %v489_v17  ;;  %v952_v17 = vld [vmem:[%s1394_s3 + $0xf] ss:$0 sm:$0xff] }
 0x416   :  { %1026 = vmatmul.mubr.msk.bf16.vlgmr.msra.gmra.mxu0 %vm191_vm2, %v1324_v19 }
 0x417   :  { %1037 = vmatprep.mubr.msk.bf16.mxu0 %vm1113_vm0, %v1112_v1  ;;  %1036 = vmatpush3.bf16.msra.mxu0 %v1064_v47 }
 0x41e   :  { %1038 = vmatmul.mubr.msk.bf16.vlgmr.msra.gmra.mxu0 %vm191_vm2, %v1304_v45  ;;  %v942_v45 = vld [vmem:[%s1394_s3 + $0xb] ss:$0 sm:$0xff] }
 0x4d6   :  { %v601_v24 = vpop.f32.mrf.mxu0 }
 0x4d7   :  { %v602_v26 = vadd.f32 %v601_v24, %v551_v20 }
 0x4d8   :  { %v1027_v27 = vpop.f32.mrf.mxu0 }
 0x4d9   :  { %v612_v28 = vadd.f32 %v940_v25, %v602_v26 }
 0x4da   :  { %v604_v29 = vpop.f32.mrf.mxu0 }
 0x4db   :  { %v605_v30 = vadd.f32 %v604_v29, %v554_v22  ;;  %v614_v31 = vsel %vm191_vm2, %v612_v28, 0.0 }
 0x4dc   :  { %v1028_v32 = vpop.f32.mrf.mxu0  ;;  %615 = vadd.xlane.f32.xlu0 %v614_v31 }
 0x4dd   :  { %v613_v33 = vadd.f32 %v940_v25, %v605_v30 }
 0x4de   :  { %v793_v4 = vpop.f32.mrf.mxu0 }
 0x4df   :  { %v617_v34 = vsel %vm195_vm3, %v613_v33, 0.0 }
 0x4e0   :  { %618 = vadd.xlane.f32.xlu1 %v617_v34  ;;  %v1039_v5 = vpop.f32.mrf.mxu0 }
 0x4e1   :  { %v947_v5 = vld [vmem:[%s1394_s3 + $0xe] ss:$0 sm:$0xff] }
 0x4e2   :  { %v796_v6 = vpop.f32.mrf.mxu0 }
 0x4e4   :  { %v1040_v7 = vpop.f32.mrf.mxu0 }
 0x565   :  { %v616_v35 = vpop.xlane.xlu0 %615 }
 0x566   :  { %v620_v36 = vmul.f32 0.0625, %v616_v35 }
 0x568   :  { %v622_v37 = vsub.f32 %v612_v28, %v620_v36 }
 0x569   :  { %v619_v38 = vpop.xlane.xlu1 %618 }
 0x56a   :  { %v621_v39 = vmul.f32 0.0625, %v619_v38  ;;  %v624_v40 = vmul.f32 %v622_v37, %v622_v37 }
 0x56c   :  { %v623_v41 = vsub.f32 %v613_v33, %v621_v39  ;;  %v626_v42 = vsel %vm191_vm2, %v624_v40, 0.0 }
 0x56d   :  { %627 = vadd.xlane.f32.xlu0 %v626_v42 }
 0x56e   :  { %v625_v43 = vmul.f32 %v623_v41, %v623_v41 }
 0x570   :  { %v629_v44 = vsel %vm195_vm3, %v625_v43, 0.0 }
 0x571   :  { %630 = vadd.xlane.f32.xlu1 %v629_v44 }
 0x5f6   :  { %v628_v48 = vpop.xlane.xlu0 %627 }
 0x5f7   :  { %v632_v49 = vmul.f32 0.0625, %v628_v48 }
 0x5f9   :  { %v634_v50 = vadd.f32 1e-05, %v632_v49 }
 0x5fa   :  { %v631_v51 = vpop.xlane.xlu1 %630 }
 0x5fb   :  { %1078 = vrsqrt.f32 %v634_v50  ;;  %v633_v52 = vmul.f32 0.0625, %v631_v51 }
 0x5fd   :  { %v635_v53 = vadd.f32 1e-05, %v633_v52 }
 0x5ff   :  { %1080 = vrsqrt.f32 %v635_v53 }
 0x608   :  { %v1079_v54 = vpop.eup %1078 }
 0x609   :  { %v638_v56 = vmul.f32 %v1079_v54, %v622_v37 }
 0x60b   :  { %v644_v57 = vmul.f32 %v941_v55, %v638_v56 }
 0x60c   :  { %v1081_v58 = vpop.eup %1080 }
 0x60d   :  { %v639_v59 = vmul.f32 %v1081_v58, %v623_v41  ;;  %v650_v61 = vadd.f32 %v942_v45, %v644_v57 }
 0x60f   :  { %v645_v60 = vmul.f32 %v941_v55, %v639_v59  ;;  %v652_v63 = vmax.f32 %v650_v61, 0.0 }
 0x611   :  { %v651_v62 = vadd.f32 %v942_v45, %v645_v60 }
 0x613   :  { %v653_v0 = vmax.f32 %v651_v62, 0.0  ;;  %v946_v62 = vld [vmem:[%s1394_s3 + $0xd] ss:$0 sm:$0xff] }
 0x615   :  { %v654_v3 = vpack.c.bf16 %v653_v0, %v652_v63  ;;  %v953_v0 = vld [vmem:[%s1394_s3 + $0x10] ss:$0 sm:$0xff] }
 0x617   :  { %1032 = vmatmul.mubr.msk.bf16.vlgmr.msra.gmra.mxu1 %vm191_vm2, %v654_v3 }
 0x618   :  { %1042 = vmatpush3.bf16.msra.mxu1 %v1065_v2  ;;  %1043 = vmatprep.mubr.msk.bf16.mxu1 %vm1113_vm0, %v1112_v1 }
 0x61f   :  { %1044 = vmatmul.mubr.msk.bf16.vlgmr.msra.gmra.mxu1 %vm191_vm2, %v1324_v19 }
 0x6d7   :  { %v704_v9 = vpop.f32.mrf.mxu1 }
 0x6d8   :  { %v705_v10 = vadd.f32 %v943_v8, %v704_v9 }
 0x6d9   :  { %v1033_v11 = vpop.f32.mrf.mxu1 }
 0x6da   :  { %v711_v12 = vsel %vm191_vm2, %v705_v10, 0.0 }
 0x6db   :  { %712 = vadd.xlane.f32.xlu0 %v711_v12  ;;  %v707_v13 = vpop.f32.mrf.mxu1 }
 0x6dc   :  { %v708_v14 = vadd.f32 %v943_v8, %v707_v13 }
 0x6dd   :  { %v1034_v1 = vpop.f32.mrf.mxu1 }
 0x6de   :  { %v714_v15 = vsel %vm195_vm3, %v708_v14, 0.0 }
 0x6df   :  { %715 = vadd.xlane.f32.xlu1 %v714_v15  ;;  %v840_v16 = vpop.f32.mrf.mxu1 }
 0x6e0   :  { %v841_v18 = vadd.f32 %v840_v16, %v793_v4 }
 0x6e1   :  { %v1045_v19 = vpop.f32.mrf.mxu1 }
 0x6e2   :  { %v851_v20 = vadd.f32 %v952_v17, %v841_v18 }
 0x6e3   :  { %v843_v21 = vpop.f32.mrf.mxu1 }
 0x6e4   :  { %v844_v22 = vadd.f32 %v843_v21, %v796_v6  ;;  %v853_v23 = vsel %vm191_vm2, %v851_v20, 0.0  ;;  %v954_v6 = vld [vmem:[%s1394_s3 + $0x11] ss:$0 sm:$0xff]  ;;  %s1090_s3 = scalar_lea.vmem %s903_s15, 256 }
 0x6e5   :  { %854 = vadd.xlane.f32.xlu0 %v853_v23  ;;  %v1046_v24 = vpop.f32.mrf.mxu1  ;;  %p1091_p0 = scmp.ne.s32.totalorder %s903_s15, %s1090_s3  ;;  %p1096_p2 = scmp.lt.s32.totalorder %s1090_s3, %s1090_s3 }
 0x6e6   :  { %v852_v25 = vadd.f32 %v952_v17, %v844_v22 }
 0x6e7   :  { %p1097_p3 = por %p1096_p2, %p1095_p1 }
 0x6e8   :  { %v856_v26 = vsel %vm195_vm3, %v852_v25, 0.0 }
 0x6e9   :  { %857 = vadd.xlane.f32.xlu1 %v856_v26  ;;  %p1098_p4 = pnand %p1097_p3, %p1091_p0 }
 0x764   :  { %v713_v27 = vpop.xlane.xlu0 %712 }
 0x765   :  { %v717_v28 = vmul.f32 0.0625, %v713_v27 }
 0x767   :  { %v719_v29 = vsub.f32 %v705_v10, %v717_v28 }
 0x768   :  { %v716_v30 = vpop.xlane.xlu1 %715 }
 0x769   :  { %v718_v31 = vmul.f32 0.0625, %v716_v30  ;;  %v721_v32 = vmul.f32 %v719_v29, %v719_v29 }
 0x76b   :  { %v720_v33 = vsub.f32 %v708_v14, %v718_v31  ;;  %v723_v34 = vsel %vm191_vm2, %v721_v32, 0.0 }
 0x76c   :  { %724 = vadd.xlane.f32.xlu0 %v723_v34 }
 0x76d   :  { %v722_v35 = vmul.f32 %v720_v33, %v720_v33 }
 0x76e   :  { %v855_v36 = vpop.xlane.xlu0 %854 }
 0x76f   :  { %v859_v37 = vmul.f32 0.0625, %v855_v36  ;;  %v726_v38 = vsel %vm195_vm3, %v722_v35, 0.0 }
 0x770   :  { %727 = vadd.xlane.f32.xlu1 %v726_v38 }
 0x771   :  { %v861_v39 = vsub.f32 %v851_v20, %v859_v37 }
 0x772   :  { %v858_v40 = vpop.xlane.xlu1 %857 }
 0x773   :  { %v860_v41 = vmul.f32 0.0625, %v858_v40  ;;  %v863_v42 = vmul.f32 %v861_v39, %v861_v39 }
 0x775   :  { %v862_v43 = vsub.f32 %v852_v25, %v860_v41  ;;  %v865_v44 = vsel %vm191_vm2, %v863_v42, 0.0 }
 0x776   :  { %866 = vadd.xlane.f32.xlu0 %v865_v44 }
 0x777   :  { %v864_v46 = vmul.f32 %v862_v43, %v862_v43 }
 0x779   :  { %v868_v47 = vsel %vm195_vm3, %v864_v46, 0.0 }
 0x77a   :  { %869 = vadd.xlane.f32.xlu1 %v868_v47 }
 0x7f5   :  { %v725_v48 = vpop.xlane.xlu0 %724 }
 0x7f6   :  { %v729_v49 = vmul.f32 0.0625, %v725_v48 }
 0x7f8   :  { %v731_v51 = vadd.f32 1e-05, %v729_v49 }
 0x7f9   :  { %v728_v50 = vpop.xlane.xlu1 %727 }
 0x7fa   :  { %v730_v52 = vmul.f32 0.0625, %v728_v50  ;;  %1082 = vrsqrt.f32 %v731_v51 }
 0x7fc   :  { %v732_v53 = vadd.f32 1e-05, %v730_v52 }
 0x7fe   :  { %1084 = vrsqrt.f32 %v732_v53 }
 0x7ff   :  { %v867_v54 = vpop.xlane.xlu0 %866 }
 0x800   :  { %v871_v55 = vmul.f32 0.0625, %v867_v54 }
 0x802   :  { %v873_v56 = vadd.f32 1e-05, %v871_v55 }
 0x803   :  { %v870_v57 = vpop.xlane.xlu1 %869 }
 0x804   :  { %1086 = vrsqrt.f32 %v873_v56  ;;  %v872_v58 = vmul.f32 0.0625, %v870_v57 }
 0x806   :  { %v874_v45 = vadd.f32 1e-05, %v872_v58 }
 0x807   :  { %v1083_v59 = vpop.eup %1082 }
 0x808   :  { %1088 = vrsqrt.f32 %v874_v45  ;;  %v735_v60 = vmul.f32 %v1083_v59, %v719_v29 }
 0x80a   :  { %v741_v4 = vmul.f32 %v946_v62, %v735_v60 }
 0x80b   :  { %v1085_v61 = vpop.eup %1084 }
 0x80c   :  { %v736_v2 = vmul.f32 %v1085_v61, %v720_v33  ;;  %v747_v11 = vadd.f32 %v947_v5, %v741_v4 }
 0x80e   :  { %v742_v10 = vmul.f32 %v946_v62, %v736_v2 }
 0x810   :  { %v748_v1 = vadd.f32 %v947_v5, %v742_v10 }
 0x811   :  { %v1087_v63 = vpop.eup %1086 }
 0x812   :  { %v877_v3 = vmul.f32 %v1087_v63, %v861_v39 }
 0x814   :  { %v883_v7 = vmul.f32 %v953_v0, %v877_v3 }
 0x815   :  { %v1089_v8 = vpop.eup %1088 }
 0x816   :  { %v878_v9 = vmul.f32 %v1089_v8, %v862_v43  ;;  %v889_v12 = vadd.f32 %v954_v6, %v883_v7 }
 0x818   :  { %v884_v13 = vmul.f32 %v953_v0, %v878_v9  ;;  %v891_v14 = vadd.f32 %v889_v12, %v747_v11 }
 0x81a   :  { %v890_v15 = vadd.f32 %v954_v6, %v884_v13  ;;  %v893_v16 = vmax.f32 %v891_v14, 0.0 }
 0x81c   :  { %v892_v17 = vadd.f32 %v890_v15, %v748_v1  ;;  %895 = vst.msk [vmem:[#allocation2] sm:$0xff] %vm191_vm2, %v893_v16 }
 0x81e   :  { %v894_v18 = vmax.f32 %v892_v17, 0.0 }
 0x820   :  { %896 = vst.msk [vmem:[#allocation2 + $0x8] sm:$0xf] %vm195_vm3, %v894_v18 }
 0x821   :  { %1101 = shalt.err (!%p1098_p4)
}
 0x822   :  { %s1115_s16 = smov 128   ;;  %s1116_s6 = smov 8  }
 0x823   :  { %908 = dma.vmem_to_hbm [thread:$0]  %s903_s15, 256, %s1405_s14, [#allocation3], %s1115_s16, %s1115_s16, %s1116_s6  }
 0x824   :  { %1110 = dma.done.wait [#allocation3], 256  }
 0x825   :  { %1111 = vsyncadd [#allocation3], 4294967040 }
 0x826   :  { %912 = vsyncpa [#allocation3], 1 }

</bundles_post_ra>
